<compile_context>
chip_gen: v7x
topology: tpu7x:2x2x1
jax: 0.10.0
libtpu: 0.0.40
codegen_flags: <defaults>
</compile_context>

<pallas_src>
import functools

import jax
import jax.numpy as jnp
from jax.experimental import pallas as pl
from jax.experimental.pallas import tpu as pltpu


# Model configuration (synthetic backbone + neck).
C_IN = 3
STAGE_DIMS = (32, 64, 128)     # backbone stage widths (strides 4, 8, 16)
C_OUT = 32                     # neck (ChannelMapper) out channels
GN_GROUPS = 4
GN_EPS = 1e-5

# Row tile: tune toward 512-1024 per generation; kept small here so the toy run
# exercises the multi-tile accumulating GroupNorm path.
ROW_TILE = 128
# v7x has 64 MiB VMEM/TC -> keep <= ~48-56 MiB; raise toward 64-100 MiB on
# v5e/v6e (128 MiB parts) together with a larger ROW_TILE.
VMEM_LIMIT_BYTES = 48 * 1024 * 1024


# ----------------------------- Pallas kernels ------------------------------

def _stage_a_kernel(tok_ref, pw_ref, pb_ref, w1_ref, b1_ref, w2_ref, b2_ref,
                    nw_ref, nb_ref, *refs, groups, eps, n_rows, store_feat):
    """Per (batch, row-tile): proj -> MLP(+residual) -> neck 1x1 conv.

    Also accumulates per-channel sum / sum-of-squares for GroupNorm and writes
    finalized per-channel (mean, var) on the last row tile of each sample.
    """
    if store_feat:
        feat_ref, y_ref, stats_ref, sum_acc, sq_acc = refs
    else:
        y_ref, stats_ref, sum_acc, sq_acc = refs
        feat_ref = None

    f32 = jnp.float32
    bf16 = jnp.bfloat16
    t = pl.program_id(1)

    @pl.when(t == 0)
    def _():
        sum_acc[...] = jnp.zeros_like(sum_acc)
        sq_acc[...] = jnp.zeros_like(sq_acc)

    def mm(x, w_ref, b_ref):
        # bf16 MXU operands, f32 accumulation; bias add runs on the VPU.
        return jnp.dot(x.astype(bf16), w_ref[...],
                       preferred_element_type=f32) + b_ref[...]

    tok = tok_ref[0]                                   # (TR, K_in) bf16 -> MXU

    # projection: patch-embed (stage 0) / patch-merge linear (stages 1, 2)
    x = mm(tok, pw_ref, pb_ref)                        # (TR, D) f32

    # pointwise MLP block, residual kept in f32 inside the kernel
    hid = jax.nn.gelu(mm(x, w1_ref, b1_ref), approximate=True)
    x = x + mm(hid, w2_ref, b2_ref)
    if store_feat:
        feat_ref[0] = x.astype(feat_ref.dtype)         # bf16 HBM writeback

    # neck 1x1 conv (pre-GroupNorm activations)
    y = mm(x, nw_ref, nb_ref)                          # (TR, C) f32
    y_ref[0] = y.astype(y_ref.dtype)                   # bf16 intermediate

    # accumulating GroupNorm statistics (f32, per channel)
    sum_acc[...] += jnp.sum(y, axis=0, keepdims=True)
    sq_acc[...] += jnp.sum(y * y, axis=0, keepdims=True)

    @pl.when(t == pl.num_programs(1) - 1)
    def _():
        C = y.shape[1]
        cg = C // groups
        # group membership via iota + compares (VPU) and XLU reductions.
        ch = jax.lax.broadcasted_iota(jnp.int32, (groups, C), 1)
        gr = jax.lax.broadcasted_iota(jnp.int32, (groups, C), 0)
        lo = gr * cg
        mask = jnp.logical_and(ch >= lo, ch < lo + cg).astype(f32)   # (G, C)
        n = float(n_rows * cg)
        mean_g = jnp.sum(sum_acc[...] * mask, axis=1, keepdims=True) / n
        esq_g = jnp.sum(sq_acc[...] * mask, axis=1, keepdims=True) / n
        var_g = jnp.maximum(esq_g - mean_g * mean_g, 0.0)            # (G, 1)
        mean_c = jnp.sum(mask * mean_g, axis=0, keepdims=True)       # (1, C)
        var_c = jnp.sum(mask * var_g, axis=0, keepdims=True)         # (1, C)
        stats_ref[0] = jnp.concatenate([mean_c, var_c], axis=0)      # (2, C)


def _stage_b_kernel(y_ref, stats_ref, gamma_ref, beta_ref, neck_ref, *, eps):
    """Per (batch, row-tile): apply GroupNorm affine, store channels-first."""
    f32 = jnp.float32
    y = y_ref[0].astype(f32)                           # (TR, C)
    stats = stats_ref[0]                               # (2, C)
    mean = stats[0:1, :]
    var = stats[1:2, :]
    scale = gamma_ref[...] * jax.lax.rsqrt(var + eps)  # (1, C)
    shift = beta_ref[...] - mean * scale               # (1, C)
    out = y * scale + shift                            # (TR, C)
    # channels-first store: lane dim = rows (lane-dense at real resolutions)
    # and yields NCHW directly — no XLA transpose afterwards.
    neck_ref[0] = jnp.transpose(out).astype(neck_ref.dtype)   # (C, TR)


# ------------------------------ stage driver -------------------------------

def _row_tile(rows):
    tr = min(ROW_TILE, rows)
    while rows % tr:               # synthetic sizes are powers of two
        tr //= 2
    return tr


def _stage_forward(tokens, pw, pb, w1, b1, w2, b2, nw, nb, gamma, beta,
                   *, store_feat):
    """tokens (B, rows, K_in) bf16 -> (feat (B,rows,D) bf16 | None,
                                       neck (B, C_OUT, rows) f32)."""
    B, rows, k_in = tokens.shape
    D = pw.shape[1]
    Dh = w1.shape[1]
    C = nw.shape[1]
    tr = _row_tile(rows)
    nt = rows // tr

    const = lambda b, t: (0, 0)
    row_blk = lambda b, t: (b, t, 0)
    per_sample = lambda b, t: (b, 0, 0)

    # ---- kernel A: fused backbone stage + neck conv + GN stats ----
    kern_a = functools.partial(_stage_a_kernel, groups=GN_GROUPS, eps=GN_EPS,
                               n_rows=rows, store_feat=store_feat)
    out_shapes = []
    out_specs = []
    if store_feat:
        out_shapes.append(jax.ShapeDtypeStruct((B, rows, D), jnp.bfloat16))
        out_specs.append(pl.BlockSpec((1, tr, D), row_blk))
    out_shapes += [jax.ShapeDtypeStruct((B, rows, C), jnp.bfloat16),
                   jax.ShapeDtypeStruct((B, 2, C), jnp.float32)]
    out_specs += [pl.BlockSpec((1, tr, C), row_blk),
                  pl.BlockSpec((1, 2, C), per_sample)]

    outs = pl.pallas_call(
        kern_a,
        out_shape=tuple(out_shapes),
        grid_spec=pltpu.PrefetchScalarGridSpec(
            num_scalar_prefetch=0,
            grid=(B, nt),
            in_specs=[
                pl.BlockSpec((1, tr, k_in), row_blk),
                pl.BlockSpec((k_in, D), const),
                pl.BlockSpec((1, D), const),
                pl.BlockSpec((D, Dh), const),
                pl.BlockSpec((1, Dh), const),
                pl.BlockSpec((Dh, D), const),
                pl.BlockSpec((1, D), const),
                pl.BlockSpec((D, C), const),
                pl.BlockSpec((1, C), const),
            ],
            out_specs=tuple(out_specs),
            scratch_shapes=[pltpu.VMEM((1, C), jnp.float32),   # sum accumulator
                            pltpu.VMEM((1, C), jnp.float32)],  # sumsq accumulator
        ),
        compiler_params=pltpu.CompilerParams(
            dimension_semantics=("parallel", "arbitrary"),
            vmem_limit_bytes=VMEM_LIMIT_BYTES),
    )(tokens, pw, pb, w1, b1, w2, b2, nw, nb)

    if store_feat:
        feat, y, stats = outs
    else:
        y, stats = outs
        feat = None

    # ---- kernel B: GroupNorm normalize, channels-first (NCHW) store ----
    kern_b = functools.partial(_stage_b_kernel, eps=GN_EPS)
    neck = pl.pallas_call(
        kern_b,
        out_shape=jax.ShapeDtypeStruct((B, C, rows), jnp.float32),
        grid_spec=pltpu.PrefetchScalarGridSpec(
            num_scalar_prefetch=0,
            grid=(B, nt),
            in_specs=[
                pl.BlockSpec((1, tr, C), row_blk),
                pl.BlockSpec((1, 2, C), per_sample),
                pl.BlockSpec((1, C), const),
                pl.BlockSpec((1, C), const),
            ],
            out_specs=pl.BlockSpec((1, C, tr), lambda b, t: (b, 0, t)),
        ),
        compiler_params=pltpu.CompilerParams(
            dimension_semantics=("parallel", "parallel"),
            vmem_limit_bytes=VMEM_LIMIT_BYTES),
    )(y, stats, gamma, beta)

    return feat, neck


# ------------------------------- glue (JAX) --------------------------------

def _patchify_nchw(img_nchw, p):
    """NCHW -> (B, (H/p)*(W/p), p*p*C) bf16 tokens: one fused transpose."""
    B, C, H, W = img_nchw.shape
    x = img_nchw.reshape(B, C, H // p, p, W // p, p)
    x = x.transpose(0, 2, 4, 3, 5, 1)
    return x.reshape(B, (H // p) * (W // p), p * p * C).astype(jnp.bfloat16)


def _patch_merge(feat, h, w):
    """(B, h*w, D) row-major -> (B, (h/2)*(w/2), 4*D) 2x2 patch-merge tokens."""
    # TODO(synk): fuse this gather into the next stage's BlockSpec index_maps to
    # avoid the feat HBM round-trip at real resolutions.
    B, _, D = feat.shape
    x = feat.reshape(B, h // 2, 2, w // 2, 2, D)
    x = x.transpose(0, 1, 3, 2, 4, 5)
    return x.reshape(B, (h // 2) * (w // 2), 4 * D)


def init_params(key):
    """Deterministic synthetic weights (this is not a checkpoint load)."""
    params = {}
    keys = iter(jax.random.split(key, 64))

    def w(shape, scale=0.05):
        # matmul weights stored in bf16 (MXU-native, halves HBM/VMEM bytes);
        # accumulation stays f32 inside the kernel.
        return (jax.random.normal(next(keys), shape, jnp.float32)
                * scale).astype(jnp.bfloat16)

    def b(n):
        return jnp.zeros((1, n), jnp.float32)

    k_in = 4 * 4 * C_IN
    for i, d in enumerate(STAGE_DIMS):
        params[f"proj{i}_w"] = w((k_in, d))        # patch-embed / patch-merge
        params[f"proj{i}_b"] = b(d)
        params[f"mlp{i}_w1"] = w((d, 2 * d))
        params[f"mlp{i}_b1"] = b(2 * d)
        params[f"mlp{i}_w2"] = w((2 * d, d))
        params[f"mlp{i}_b2"] = b(d)
        params[f"neck{i}_w"] = w((d, C_OUT))       # 1x1 conv d -> C_OUT
        params[f"neck{i}_b"] = b(C_OUT)
        params[f"gn{i}_gamma"] = jnp.ones((1, C_OUT), jnp.float32)
        params[f"gn{i}_beta"] = jnp.zeros((1, C_OUT), jnp.float32)
        k_in = 4 * d                               # next stage merges 2x2 patches
    return params


def extract_feat(img_nchw, params):
    """Synthetic GroundingDINO visual extract_feat. Returns tuple of NCHW maps."""
    B = img_nchw.shape[0]
    H, W = img_nchw.shape[2], img_nchw.shape[3]
    h, w = H // 4, W // 4
    tokens = _patchify_nchw(img_nchw, 4)           # (B, h*w, 48) bf16, stride 4

    feat = None
    outs = []
    n_stages = len(STAGE_DIMS)
    for i in range(n_stages):
        if i > 0:
            tokens = _patch_merge(feat, h, w)      # 2x2 merge -> stride doubles
            h, w = h // 2, w // 2
        last = (i == n_stages - 1)
        feat, neck = _stage_forward(
            tokens,
            params[f"proj{i}_w"], params[f"proj{i}_b"],
            params[f"mlp{i}_w1"], params[f"mlp{i}_b1"],
            params[f"mlp{i}_w2"], params[f"mlp{i}_b2"],
            params[f"neck{i}_w"], params[f"neck{i}_b"],
            params[f"gn{i}_gamma"], params[f"gn{i}_beta"],
            store_feat=not last)                   # final-stage feat never consumed
        # neck is already channels-first (B, C_OUT, rows) -> just reshape to NCHW.
        outs.append(neck.reshape(B, C_OUT, h, w))
    return tuple(outs)


class VisualModelWrapper:
    """JAX/Pallas analogue of the PyTorch VisualModelWrapper."""

    def __init__(self, params, img_shape):
        self.params = params
        # img_meta is carried for parity with the PyTorch wrapper; forward() does
        # not consume it (matches the reference module).
        self.img_meta = dict(img_shape=img_shape, pad_shape=img_shape,
                             batch_input_shape=img_shape)

    def __call__(self, img):
        return extract_feat(img, self.params)


# ---------------------------------- main -----------------------------------

if __name__ == "__main__":
    key = jax.random.PRNGKey(0)
    k_img, k_par = jax.random.split(key)

    B, H, W = 2, 64, 64
    img = jax.random.normal(k_img, (B, C_IN, H, W), jnp.float32)   # NCHW input

    params = init_params(k_par)
    wrapper = VisualModelWrapper(params, img_shape=(H, W))

    feats = jax.jit(wrapper.__call__)(img)
    feats = jax.block_until_ready(feats)

    expected_shapes = [(B, C_OUT, H // 4, W // 4),
                       (B, C_OUT, H // 8, W // 8),
                       (B, C_OUT, H // 16, W // 16)]
    assert [tuple(f.shape) for f in feats] == expected_shapes
    assert all(bool(jnp.all(jnp.isfinite(f))) for f in feats)

    print("KERNEL_OK")
</pallas_src>

<mosaic_0001>
module attributes {stable_mosaic.version = 11 : i64} {
  func.func @_stage_a_kernel(%arg0: i32, %arg1: i32, %arg2: memref<1x128x48xbf16, #tpu.memory_space<vmem>>, %arg3: memref<48x32xbf16, #tpu.memory_space<vmem>>, %arg4: memref<1x32xf32, #tpu.memory_space<vmem>>, %arg5: memref<32x64xbf16, #tpu.memory_space<vmem>>, %arg6: memref<1x64xf32, #tpu.memory_space<vmem>>, %arg7: memref<64x32xbf16, #tpu.memory_space<vmem>>, %arg8: memref<1x32xf32, #tpu.memory_space<vmem>>, %arg9: memref<32x32xbf16, #tpu.memory_space<vmem>>, %arg10: memref<1x32xf32, #tpu.memory_space<vmem>>, %arg11: memref<1x128x32xbf16, #tpu.memory_space<vmem>>, %arg12: memref<1x128x32xbf16, #tpu.memory_space<vmem>>, %arg13: memref<1x2x32xf32, #tpu.memory_space<vmem>>, %arg14: memref<1x32xf32, #tpu.memory_space<vmem>>, %arg15: memref<1x32xf32, #tpu.memory_space<vmem>>) attributes {dimension_semantics = [#tpu.dimension_semantics<parallel>, #tpu.dimension_semantics<arbitrary>], iteration_bounds = array<i64: 2, 2>, scalar_prefetch = 0 : i64, scratch_operands = 2 : i64, tpu.core_type = #tpu.core_type<tc>, window_params = [{transform_indices = @transform_0, window_bounds = array<i64: 1, 128, 48>}, {pipeline_mode = #tpu.pipeline_mode<synchronous>, transform_indices = @transform_1, window_bounds = array<i64: 48, 32>}, {pipeline_mode = #tpu.pipeline_mode<synchronous>, transform_indices = @transform_2, window_bounds = array<i64: 1, 32>}, {pipeline_mode = #tpu.pipeline_mode<synchronous>, transform_indices = @transform_3, window_bounds = array<i64: 32, 64>}, {pipeline_mode = #tpu.pipeline_mode<synchronous>, transform_indices = @transform_4, window_bounds = array<i64: 1, 64>}, {pipeline_mode = #tpu.pipeline_mode<synchronous>, transform_indices = @transform_5, window_bounds = array<i64: 64, 32>}, {pipeline_mode = #tpu.pipeline_mode<synchronous>, transform_indices = @transform_6, window_bounds = array<i64: 1, 32>}, {pipeline_mode = #tpu.pipeline_mode<synchronous>, transform_indices = @transform_7, window_bounds = array<i64: 32, 32>}, {pipeline_mode = #tpu.pipeline_mode<synchronous>, transform_indices = @transform_8, window_bounds = array<i64: 1, 32>}, {transform_indices = @transform_9, window_bounds = array<i64: 1, 128, 32>}, {transform_indices = @transform_10, window_bounds = array<i64: 1, 128, 32>}, {transform_indices = @transform_11, window_bounds = array<i64: 1, 2, 32>}]} {
    %c0_i32 = arith.constant 0 : i32
    %0 = arith.cmpi eq, %arg1, %c0_i32 : i32
    %1 = arith.extui %0 : i1 to i32
    %c0_i32_0 = arith.constant 0 : i32
    %2 = arith.cmpi ne, %1, %c0_i32_0 : i32
    scf.if %2 {
      %cst_43 = arith.constant 0.000000e+00 : f32
      %64 = vector.broadcast %cst_43 : f32 to vector<1x32xf32>
      %c0_44 = arith.constant 0 : index
      %c0_45 = arith.constant 0 : index
      %65 = vector.load %arg14[%c0_44, %c0_45] : memref<1x32xf32, #tpu.memory_space<vmem>>, vector<1x32xf32>
      tpu.vector_store %arg14[%c0_44, %c0_45], %64 {strides = array<i32>} : memref<1x32xf32, #tpu.memory_space<vmem>>, vector<1x32xf32>,
      %cst_46 = arith.constant 0.000000e+00 : f32
      %66 = vector.broadcast %cst_46 : f32 to vector<1x32xf32>
      %c0_47 = arith.constant 0 : index
      %c0_48 = arith.constant 0 : index
      %67 = vector.load %arg15[%c0_47, %c0_48] : memref<1x32xf32, #tpu.memory_space<vmem>>, vector<1x32xf32>
      tpu.vector_store %arg15[%c0_47, %c0_48], %66 {strides = array<i32>} : memref<1x32xf32, #tpu.memory_space<vmem>>, vector<1x32xf32>,
    } else {
    }
    %c0 = arith.constant 0 : index
    %c0_1 = arith.constant 0 : index
    %c0_2 = arith.constant 0 : index
    %3 = vector.load %arg2[%c0, %c0_1, %c0_2] : memref<1x128x48xbf16, #tpu.memory_space<vmem>>, vector<1x128x48xbf16>
    %4 = vector.shape_cast %3 : vector<1x128x48xbf16> to vector<128x48xbf16>
    %c0_3 = arith.constant 0 : index
    %c0_4 = arith.constant 0 : index
    %5 = vector.load %arg3[%c0_3, %c0_4] : memref<48x32xbf16, #tpu.memory_space<vmem>>, vector<48x32xbf16>
    %cst = arith.constant dense<0.000000e+00> : vector<128x32xf32>
    %6 = tpu.matmul %4, %5, %cst {dimension_numbers = #tpu.dot_dimension_numbers<[1], [0], [0], [1], [0, 0, 1, 1], [], []>} : vector<128x48xbf16>, vector<48x32xbf16>, vector<128x32xf32> -> vector<128x32xf32>
    %c0_5 = arith.constant 0 : index
    %c0_6 = arith.constant 0 : index
    %7 = vector.load %arg4[%c0_5, %c0_6] : memref<1x32xf32, #tpu.memory_space<vmem>>, vector<1x32xf32>
    %8 = vector.broadcast %7 : vector<1x32xf32> to vector<128x32xf32>
    %9 = arith.addf %6, %8 : vector<128x32xf32>
    %10 = arith.truncf %9 : vector<128x32xf32> to vector<128x32xbf16>
    %c0_7 = arith.constant 0 : index
    %c0_8 = arith.constant 0 : index
    %11 = vector.load %arg5[%c0_7, %c0_8] : memref<32x64xbf16, #tpu.memory_space<vmem>>, vector<32x64xbf16>
    %cst_9 = arith.constant dense<0.000000e+00> : vector<128x64xf32>
    %12 = tpu.matmul %10, %11, %cst_9 {dimension_numbers = #tpu.dot_dimension_numbers<[1], [0], [0], [1], [0, 0, 1, 1], [], []>} : vector<128x32xbf16>, vector<32x64xbf16>, vector<128x64xf32> -> vector<128x64xf32>
    %c0_10 = arith.constant 0 : index
    %c0_11 = arith.constant 0 : index
    %13 = vector.load %arg6[%c0_10, %c0_11] : memref<1x64xf32, #tpu.memory_space<vmem>>, vector<1x64xf32>
    %14 = vector.broadcast %13 : vector<1x64xf32> to vector<128x64xf32>
    %15 = arith.addf %12, %14 : vector<128x64xf32>
    %16 = arith.mulf %15, %15 : vector<128x64xf32>
    %17 = arith.mulf %15, %16 : vector<128x64xf32>
    %cst_12 = arith.constant 4.471500e-02 : f32
    %18 = vector.broadcast %cst_12 : f32 to vector<128x64xf32>
    %19 = arith.mulf %18, %17 : vector<128x64xf32>
    %20 = arith.addf %15, %19 : vector<128x64xf32>
    %cst_13 = arith.constant 0.797884583 : f32
    %21 = vector.broadcast %cst_13 : f32 to vector<128x64xf32>
    %22 = arith.mulf %21, %20 : vector<128x64xf32>
    %23 = math.tanh %22 : vector<128x64xf32>
    %cst_14 = arith.constant 1.000000e+00 : f32
    %24 = vector.broadcast %cst_14 : f32 to vector<128x64xf32>
    %25 = arith.addf %24, %23 : vector<128x64xf32>
    %cst_15 = arith.constant 5.000000e-01 : f32
    %26 = vector.broadcast %cst_15 : f32 to vector<128x64xf32>
    %27 = arith.mulf %26, %25 : vector<128x64xf32>
    %28 = arith.mulf %15, %27 : vector<128x64xf32>
    %29 = arith.truncf %28 : vector<128x64xf32> to vector<128x64xbf16>
    %c0_16 = arith.constant 0 : index
    %c0_17 = arith.constant 0 : index
    %30 = vector.load %arg7[%c0_16, %c0_17] : memref<64x32xbf16, #tpu.memory_space<vmem>>, vector<64x32xbf16>
    %cst_18 = arith.constant dense<0.000000e+00> : vector<128x32xf32>
    %31 = tpu.matmul %29, %30, %cst_18 {dimension_numbers = #tpu.dot_dimension_numbers<[1], [0], [0], [1], [0, 0, 1, 1], [], []>} : vector<128x64xbf16>, vector<64x32xbf16>, vector<128x32xf32> -> vector<128x32xf32>
    %c0_19 = arith.constant 0 : index
    %c0_20 = arith.constant 0 : index
    %32 = vector.load %arg8[%c0_19, %c0_20] : memref<1x32xf32, #tpu.memory_space<vmem>>, vector<1x32xf32>
    %33 = vector.broadcast %32 : vector<1x32xf32> to vector<128x32xf32>
    %34 = arith.addf %31, %33 : vector<128x32xf32>
    %35 = arith.addf %9, %34 : vector<128x32xf32>
    %36 = arith.truncf %35 : vector<128x32xf32> to vector<128x32xbf16>
    %c0_21 = arith.constant 0 : index
    %c0_22 = arith.constant 0 : index
    %c0_23 = arith.constant 0 : index
    %37 = vector.load %arg11[%c0_21, %c0_22, %c0_23] : memref<1x128x32xbf16, #tpu.memory_space<vmem>>, vector<1x128x32xbf16>
    %38 = vector.shape_cast %37 : vector<1x128x32xbf16> to vector<128x32xbf16>
    %39 = vector.shape_cast %36 : vector<128x32xbf16> to vector<1x128x32xbf16>
    tpu.vector_store %arg11[%c0_21, %c0_22, %c0_23], %39 {strides = array<i32>} : memref<1x128x32xbf16, #tpu.memory_space<vmem>>, vector<1x128x32xbf16>,
    %40 = arith.truncf %35 : vector<128x32xf32> to vector<128x32xbf16>
    %c0_24 = arith.constant 0 : index
    %c0_25 = arith.constant 0 : index
    %41 = vector.load %arg9[%c0_24, %c0_25] : memref<32x32xbf16, #tpu.memory_space<vmem>>, vector<32x32xbf16>
    %cst_26 = arith.constant dense<0.000000e+00> : vector<128x32xf32>
    %42 = tpu.matmul %40, %41, %cst_26 {dimension_numbers = #tpu.dot_dimension_numbers<[1], [0], [0], [1], [0, 0, 1, 1], [], []>} : vector<128x32xbf16>, vector<32x32xbf16>, vector<128x32xf32> -> vector<128x32xf32>
    %c0_27 = arith.constant 0 : index
    %c0_28 = arith.constant 0 : index
    %43 = vector.load %arg10[%c0_27, %c0_28] : memref<1x32xf32, #tpu.memory_space<vmem>>, vector<1x32xf32>
    %44 = vector.broadcast %43 : vector<1x32xf32> to vector<128x32xf32>
    %45 = arith.addf %42, %44 : vector<128x32xf32>
    %46 = arith.truncf %45 : vector<128x32xf32> to vector<128x32xbf16>
    %c0_29 = arith.constant 0 : index
    %c0_30 = arith.constant 0 : index
    %c0_31 = arith.constant 0 : index
    %47 = vector.load %arg12[%c0_29, %c0_30, %c0_31] : memref<1x128x32xbf16, #tpu.memory_space<vmem>>, vector<1x128x32xbf16>
    %48 = vector.shape_cast %47 : vector<1x128x32xbf16> to vector<128x32xbf16>
    %49 = vector.shape_cast %46 : vector<128x32xbf16> to vector<1x128x32xbf16>
    tpu.vector_store %arg12[%c0_29, %c0_30, %c0_31], %49 {strides = array<i32>} : memref<1x128x32xbf16, #tpu.memory_space<vmem>>, vector<1x128x32xbf16>,
    %c0_32 = arith.constant 0 : index
    %c0_33 = arith.constant 0 : index
    %50 = vector.load %arg14[%c0_32, %c0_33] : memref<1x32xf32, #tpu.memory_space<vmem>>, vector<1x32xf32>
    %cst_34 = arith.constant dense<0.000000e+00> : vector<32xf32>
    %51 = vector.multi_reduction <add>, %45, %cst_34 [0] : vector<128x32xf32> to vector<32xf32>
    %52 = vector.shape_cast %51 : vector<32xf32> to vector<1x32xf32>
    %53 = arith.addf %50, %52 : vector<1x32xf32>
    %c0_35 = arith.constant 0 : index
    %c0_36 = arith.constant 0 : index
    %54 = vector.load %arg14[%c0_35, %c0_36] : memref<1x32xf32, #tpu.memory_space<vmem>>, vector<1x32xf32>
    tpu.vector_store %arg14[%c0_35, %c0_36], %53 {strides = array<i32>} : memref<1x32xf32, #tpu.memory_space<vmem>>, vector<1x32xf32>,
    %c0_37 = arith.constant 0 : index
    %c0_38 = arith.constant 0 : index
    %55 = vector.load %arg15[%c0_37, %c0_38] : memref<1x32xf32, #tpu.memory_space<vmem>>, vector<1x32xf32>
    %56 = arith.mulf %45, %45 : vector<128x32xf32>
    %cst_39 = arith.constant dense<0.000000e+00> : vector<32xf32>
    %57 = vector.multi_reduction <add>, %56, %cst_39 [0] : vector<128x32xf32> to vector<32xf32>
    %58 = vector.shape_cast %57 : vector<32xf32> to vector<1x32xf32>
    %59 = arith.addf %55, %58 : vector<1x32xf32>
    %c0_40 = arith.constant 0 : index
    %c0_41 = arith.constant 0 : index
    %60 = vector.load %arg15[%c0_40, %c0_41] : memref<1x32xf32, #tpu.memory_space<vmem>>, vector<1x32xf32>
    tpu.vector_store %arg15[%c0_40, %c0_41], %59 {strides = array<i32>} : memref<1x32xf32, #tpu.memory_space<vmem>>, vector<1x32xf32>,
    %c1_i32 = arith.constant 1 : i32
    %61 = arith.cmpi eq, %arg1, %c1_i32 : i32
    %62 = arith.extui %61 : i1 to i32
    %c0_i32_42 = arith.constant 0 : i32
    %63 = arith.cmpi ne, %62, %c0_i32_42 : i32
    scf.if %63 {
      %64 = tpu.iota {dimensions = array<i32: 1>} : vector<4x32xi32>
      %65 = tpu.iota {dimensions = array<i32: 0>} : vector<4x32xi32>
      %c8_i32 = arith.constant 8 : i32
      %66 = vector.broadcast %c8_i32 : i32 to vector<4x32xi32>
      %67 = arith.muli %65, %66 : vector<4x32xi32>
      %68 = arith.cmpi sge, %64, %67 : vector<4x32xi32>
      %c8_i32_43 = arith.constant 8 : i32
      %69 = vector.broadcast %c8_i32_43 : i32 to vector<4x32xi32>
      %70 = arith.addi %67, %69 : vector<4x32xi32>
      %71 = arith.cmpi slt, %64, %70 : vector<4x32xi32>
      %72 = arith.andi %68, %71 : vector<4x32xi1>
      %73 = arith.extui %72 : vector<4x32xi1> to vector<4x32xi32>
      %74 = arith.sitofp %73 : vector<4x32xi32> to vector<4x32xf32>
      %c0_44 = arith.constant 0 : index
      %c0_45 = arith.constant 0 : index
      %75 = vector.load %arg14[%c0_44, %c0_45] : memref<1x32xf32, #tpu.memory_space<vmem>>, vector<1x32xf32>
      %76 = vector.broadcast %75 : vector<1x32xf32> to vector<4x32xf32>
      %77 = arith.mulf %76, %74 : vector<4x32xf32>
      %cst_46 = arith.constant dense<0.000000e+00> : vector<4xf32>
      %78 = vector.multi_reduction <add>, %77, %cst_46 [1] : vector<4x32xf32> to vector<4xf32>
      %79 = vector.shape_cast %78 : vector<4xf32> to vector<4x1xf32>
      %cst_47 = arith.constant 2.048000e+03 : f32
      %80 = vector.broadcast %cst_47 : f32 to vector<4x1xf32>
      %81 = arith.divf %79, %80 : vector<4x1xf32>
      %c0_48 = arith.constant 0 : index
      %c0_49 = arith.constant 0 : index
      %82 = vector.load %arg15[%c0_48, %c0_49] : memref<1x32xf32, #tpu.memory_space<vmem>>, vector<1x32xf32>
      %83 = vector.broadcast %82 : vector<1x32xf32> to vector<4x32xf32>
      %84 = arith.mulf %83, %74 : vector<4x32xf32>
      %cst_50 = arith.constant dense<0.000000e+00> : vector<4xf32>
      %85 = vector.multi_reduction <add>, %84, %cst_50 [1] : vector<4x32xf32> to vector<4xf32>
      %86 = vector.shape_cast %85 : vector<4xf32> to vector<4x1xf32>
      %cst_51 = arith.constant 2.048000e+03 : f32
      %87 = vector.broadcast %cst_51 : f32 to vector<4x1xf32>
      %88 = arith.divf %86, %87 : vector<4x1xf32>
      %89 = arith.mulf %81, %81 : vector<4x1xf32>
      %90 = arith.subf %88, %89 : vector<4x1xf32>
      %cst_52 = arith.constant 0.000000e+00 : f32
      %91 = vector.broadcast %cst_52 : f32 to vector<4x1xf32>
      %92 = arith.maximumf %90, %91 : vector<4x1xf32>
      %93 = vector.broadcast %81 : vector<4x1xf32> to vector<4x32xf32>
      %94 = arith.mulf %74, %93 : vector<4x32xf32>
      %cst_53 = arith.constant dense<0.000000e+00> : vector<32xf32>
      %95 = vector.multi_reduction <add>, %94, %cst_53 [0] : vector<4x32xf32> to vector<32xf32>
      %96 = vector.shape_cast %95 : vector<32xf32> to vector<1x32xf32>
      %97 = vector.broadcast %92 : vector<4x1xf32> to vector<4x32xf32>
      %98 = arith.mulf %74, %97 : vector<4x32xf32>
      %cst_54 = arith.constant dense<0.000000e+00> : vector<32xf32>
      %99 = vector.multi_reduction <add>, %98, %cst_54 [0] : vector<4x32xf32> to vector<32xf32>
      %100 = vector.shape_cast %99 : vector<32xf32> to vector<1x32xf32>
      %101 = tpu.concatenate %96, %100 in 0 : vector<1x32xf32>, vector<1x32xf32> -> vector<2x32xf32>
      %c0_55 = arith.constant 0 : index
      %c0_56 = arith.constant 0 : index
      %c0_57 = arith.constant 0 : index
      %102 = vector.load %arg13[%c0_55, %c0_56, %c0_57] : memref<1x2x32xf32, #tpu.memory_space<vmem>>, vector<1x2x32xf32>
      %103 = vector.shape_cast %102 : vector<1x2x32xf32> to vector<2x32xf32>
      %104 = vector.shape_cast %101 : vector<2x32xf32> to vector<1x2x32xf32>
      tpu.vector_store %arg13[%c0_55, %c0_56, %c0_57], %104 {strides = array<i32>} : memref<1x2x32xf32, #tpu.memory_space<vmem>>, vector<1x2x32xf32>,
    } else {
    }
    return
  }
  func.func @transform_0(%arg0: i32, %arg1: i32) -> (i32, i32, i32) {
    %c0_i32 = arith.constant 0 : i32
    %c0_i32_0 = arith.constant 0 : i32
    return %arg0, %arg1, %c0_i32 : i32, i32, i32
  }
  func.func @transform_1(%arg0: i32, %arg1: i32) -> (i32, i32) {
    %c0_i32 = arith.constant 0 : i32
    %c0_i32_0 = arith.constant 0 : i32
    %c0_i32_1 = arith.constant 0 : i32
    return %c0_i32, %c0_i32_0 : i32, i32
  }
  func.func @transform_2(%arg0: i32, %arg1: i32) -> (i32, i32) {
    %c0_i32 = arith.constant 0 : i32
    %c0_i32_0 = arith.constant 0 : i32
    %c0_i32_1 = arith.constant 0 : i32
    return %c0_i32, %c0_i32_0 : i32, i32
  }
  func.func @transform_3(%arg0: i32, %arg1: i32) -> (i32, i32) {
    %c0_i32 = arith.constant 0 : i32
    %c0_i32_0 = arith.constant 0 : i32
    %c0_i32_1 = arith.constant 0 : i32
    return %c0_i32, %c0_i32_0 : i32, i32
  }
  func.func @transform_4(%arg0: i32, %arg1: i32) -> (i32, i32) {
    %c0_i32 = arith.constant 0 : i32
    %c0_i32_0 = arith.constant 0 : i32
    %c0_i32_1 = arith.constant 0 : i32
    return %c0_i32, %c0_i32_0 : i32, i32
  }
  func.func @transform_5(%arg0: i32, %arg1: i32) -> (i32, i32) {
    %c0_i32 = arith.constant 0 : i32
    %c0_i32_0 = arith.constant 0 : i32
    %c0_i32_1 = arith.constant 0 : i32
    return %c0_i32, %c0_i32_0 : i32, i32
  }
  func.func @transform_6(%arg0: i32, %arg1: i32) -> (i32, i32) {
    %c0_i32 = arith.constant 0 : i32
    %c0_i32_0 = arith.constant 0 : i32
    %c0_i32_1 = arith.constant 0 : i32
    return %c0_i32, %c0_i32_0 : i32, i32
  }
  func.func @transform_7(%arg0: i32, %arg1: i32) -> (i32, i32) {
    %c0_i32 = arith.constant 0 : i32
    %c0_i32_0 = arith.constant 0 : i32
    %c0_i32_1 = arith.constant 0 : i32
    return %c0_i32, %c0_i32_0 : i32, i32
  }
  func.func @transform_8(%arg0: i32, %arg1: i32) -> (i32, i32) {
    %c0_i32 = arith.constant 0 : i32
    %c0_i32_0 = arith.constant 0 : i32
    %c0_i32_1 = arith.constant 0 : i32
    return %c0_i32, %c0_i32_0 : i32, i32
  }
  func.func @transform_9(%arg0: i32, %arg1: i32) -> (i32, i32, i32) {
    %c0_i32 = arith.constant 0 : i32
    %c0_i32_0 = arith.constant 0 : i32
    return %arg0, %arg1, %c0_i32 : i32, i32, i32
  }
  func.func @transform_10(%arg0: i32, %arg1: i32) -> (i32, i32, i32) {
    %c0_i32 = arith.constant 0 : i32
    %c0_i32_0 = arith.constant 0 : i32
    return %arg0, %arg1, %c0_i32 : i32, i32, i32
  }
  func.func @transform_11(%arg0: i32, %arg1: i32) -> (i32, i32, i32) {
    %c0_i32 = arith.constant 0 : i32
    %c0_i32_0 = arith.constant 0 : i32
    %c0_i32_1 = arith.constant 0 : i32
    return %arg0, %c0_i32, %c0_i32_0 : i32, i32, i32
  }
}

module attributes {stable_mosaic.version = 11 : i64} {
  func.func @_stage_b_kernel(%arg0: i32, %arg1: i32, %arg2: memref<1x128x32xbf16, #tpu.memory_space<vmem>>, %arg3: memref<1x2x32xf32, #tpu.memory_space<vmem>>, %arg4: memref<1x32xf32, #tpu.memory_space<vmem>>, %arg5: memref<1x32xf32, #tpu.memory_space<vmem>>, %arg6: memref<1x32x128xf32, #tpu.memory_space<vmem>>) attributes {dimension_semantics = [#tpu.dimension_semantics<parallel>, #tpu.dimension_semantics<parallel>], iteration_bounds = array<i64: 2, 2>, scalar_prefetch = 0 : i64, scratch_operands = 0 : i64, tpu.core_type = #tpu.core_type<tc>, window_params = [{transform_indices = @transform_0, window_bounds = array<i64: 1, 128, 32>}, {transform_indices = @transform_1, window_bounds = array<i64: 1, 2, 32>}, {pipeline_mode = #tpu.pipeline_mode<synchronous>, transform_indices = @transform_2, window_bounds = array<i64: 1, 32>}, {pipeline_mode = #tpu.pipeline_mode<synchronous>, transform_indices = @transform_3, window_bounds = array<i64: 1, 32>}, {transform_indices = @transform_4, window_bounds = array<i64: 1, 32, 128>}]} {
    %c0 = arith.constant 0 : index
    %c0_0 = arith.constant 0 : index
    %c0_1 = arith.constant 0 : index
    %0 = vector.load %arg2[%c0, %c0_0, %c0_1] : memref<1x128x32xbf16, #tpu.memory_space<vmem>>, vector<1x128x32xbf16>
    %1 = vector.shape_cast %0 : vector<1x128x32xbf16> to vector<128x32xbf16>
    %2 = arith.extf %1 : vector<128x32xbf16> to vector<128x32xf32>
    %c0_2 = arith.constant 0 : index
    %c0_3 = arith.constant 0 : index
    %c0_4 = arith.constant 0 : index
    %3 = vector.load %arg3[%c0_2, %c0_3, %c0_4] : memref<1x2x32xf32, #tpu.memory_space<vmem>>, vector<1x2x32xf32>
    %4 = vector.shape_cast %3 : vector<1x2x32xf32> to vector<2x32xf32>
    %5 = vector.extract_strided_slice %4 {offsets = [0, 0], sizes = [1, 32], strides = [1, 1]} : vector<2x32xf32> to vector<1x32xf32>
    %6 = vector.extract_strided_slice %4 {offsets = [1, 0], sizes = [1, 32], strides = [1, 1]} : vector<2x32xf32> to vector<1x32xf32>
    %c0_5 = arith.constant 0 : index
    %c0_6 = arith.constant 0 : index
    %7 = vector.load %arg4[%c0_5, %c0_6] : memref<1x32xf32, #tpu.memory_space<vmem>>, vector<1x32xf32>
    %cst = arith.constant 9.99999974E-6 : f32
    %8 = vector.broadcast %cst : f32 to vector<1x32xf32>
    %9 = arith.addf %6, %8 : vector<1x32xf32>
    %10 = math.rsqrt %9 : vector<1x32xf32>
    %11 = arith.mulf %7, %10 : vector<1x32xf32>
    %c0_7 = arith.constant 0 : index
    %c0_8 = arith.constant 0 : index
    %12 = vector.load %arg5[%c0_7, %c0_8] : memref<1x32xf32, #tpu.memory_space<vmem>>, vector<1x32xf32>
    %13 = arith.mulf %5, %11 : vector<1x32xf32>
    %14 = arith.subf %12, %13 : vector<1x32xf32>
    %15 = vector.broadcast %11 : vector<1x32xf32> to vector<128x32xf32>
    %16 = arith.mulf %2, %15 : vector<128x32xf32>
    %17 = vector.broadcast %14 : vector<1x32xf32> to vector<128x32xf32>
    %18 = arith.addf %16, %17 : vector<128x32xf32>
    %19 = tpu.transpose %18, [1, 0] : vector<128x32xf32> -> vector<32x128xf32>
    %c0_9 = arith.constant 0 : index
    %c0_10 = arith.constant 0 : index
    %c0_11 = arith.constant 0 : index
    %20 = vector.load %arg6[%c0_9, %c0_10, %c0_11] : memref<1x32x128xf32, #tpu.memory_space<vmem>>, vector<1x32x128xf32>
    %21 = vector.shape_cast %20 : vector<1x32x128xf32> to vector<32x128xf32>
    %22 = vector.shape_cast %19 : vector<32x128xf32> to vector<1x32x128xf32>
    tpu.vector_store %arg6[%c0_9, %c0_10, %c0_11], %22 {strides = array<i32>} : memref<1x32x128xf32, #tpu.memory_space<vmem>>, vector<1x32x128xf32>,
    return
  }
  func.func @transform_0(%arg0: i32, %arg1: i32) -> (i32, i32, i32) {
    %c0_i32 = arith.constant 0 : i32
    %c0_i32_0 = arith.constant 0 : i32
    return %arg0, %arg1, %c0_i32 : i32, i32, i32
  }
  func.func @transform_1(%arg0: i32, %arg1: i32) -> (i32, i32, i32) {
    %c0_i32 = arith.constant 0 : i32
    %c0_i32_0 = arith.constant 0 : i32
    %c0_i32_1 = arith.constant 0 : i32
    return %arg0, %c0_i32, %c0_i32_0 : i32, i32, i32
  }
  func.func @transform_2(%arg0: i32, %arg1: i32) -> (i32, i32) {
    %c0_i32 = arith.constant 0 : i32
    %c0_i32_0 = arith.constant 0 : i32
    %c0_i32_1 = arith.constant 0 : i32
    return %c0_i32, %c0_i32_0 : i32, i32
  }
  func.func @transform_3(%arg0: i32, %arg1: i32) -> (i32, i32) {
    %c0_i32 = arith.constant 0 : i32
    %c0_i32_0 = arith.constant 0 : i32
    %c0_i32_1 = arith.constant 0 : i32
    return %c0_i32, %c0_i32_0 : i32, i32
  }
  func.func @transform_4(%arg0: i32, %arg1: i32) -> (i32, i32, i32) {
    %c0_i32 = arith.constant 0 : i32
    %c0_i32_0 = arith.constant 0 : i32
    return %arg0, %c0_i32, %arg1 : i32, i32, i32
  }
}

module attributes {stable_mosaic.version = 11 : i64} {
  func.func @_stage_a_kernel(%arg0: i32, %arg1: i32, %arg2: memref<1x64x128xbf16, #tpu.memory_space<vmem>>, %arg3: memref<128x64xbf16, #tpu.memory_space<vmem>>, %arg4: memref<1x64xf32, #tpu.memory_space<vmem>>, %arg5: memref<64x128xbf16, #tpu.memory_space<vmem>>, %arg6: memref<1x128xf32, #tpu.memory_space<vmem>>, %arg7: memref<128x64xbf16, #tpu.memory_space<vmem>>, %arg8: memref<1x64xf32, #tpu.memory_space<vmem>>, %arg9: memref<64x32xbf16, #tpu.memory_space<vmem>>, %arg10: memref<1x32xf32, #tpu.memory_space<vmem>>, %arg11: memref<1x64x64xbf16, #tpu.memory_space<vmem>>, %arg12: memref<1x64x32xbf16, #tpu.memory_space<vmem>>, %arg13: memref<1x2x32xf32, #tpu.memory_space<vmem>>, %arg14: memref<1x32xf32, #tpu.memory_space<vmem>>, %arg15: memref<1x32xf32, #tpu.memory_space<vmem>>) attributes {dimension_semantics = [#tpu.dimension_semantics<parallel>, #tpu.dimension_semantics<arbitrary>], iteration_bounds = array<i64: 2, 1>, scalar_prefetch = 0 : i64, scratch_operands = 2 : i64, tpu.core_type = #tpu.core_type<tc>, window_params = [{transform_indices = @transform_0, window_bounds = array<i64: 1, 64, 128>}, {pipeline_mode = #tpu.pipeline_mode<synchronous>, transform_indices = @transform_1, window_bounds = array<i64: 128, 64>}, {pipeline_mode = #tpu.pipeline_mode<synchronous>, transform_indices = @transform_2, window_bounds = array<i64: 1, 64>}, {pipeline_mode = #tpu.pipeline_mode<synchronous>, transform_indices = @transform_3, window_bounds = array<i64: 64, 128>}, {pipeline_mode = #tpu.pipeline_mode<synchronous>, transform_indices = @transform_4, window_bounds = array<i64: 1, 128>}, {pipeline_mode = #tpu.pipeline_mode<synchronous>, transform_indices = @transform_5, window_bounds = array<i64: 128, 64>}, {pipeline_mode = #tpu.pipeline_mode<synchronous>, transform_indices = @transform_6, window_bounds = array<i64: 1, 64>}, {pipeline_mode = #tpu.pipeline_mode<synchronous>, transform_indices = @transform_7, window_bounds = array<i64: 64, 32>}, {pipeline_mode = #tpu.pipeline_mode<synchronous>, transform_indices = @transform_8, window_bounds = array<i64: 1, 32>}, {transform_indices = @transform_9, window_bounds = array<i64: 1, 64, 64>}, {transform_indices = @transform_10, window_bounds = array<i64: 1, 64, 32>}, {transform_indices = @transform_11, window_bounds = array<i64: 1, 2, 32>}]} {
    %c0_i32 = arith.constant 0 : i32
    %0 = arith.cmpi eq, %arg1, %c0_i32 : i32
    %1 = arith.extui %0 : i1 to i32
    %c0_i32_0 = arith.constant 0 : i32
    %2 = arith.cmpi ne, %1, %c0_i32_0 : i32
    scf.if %2 {
      %cst_44 = arith.constant 0.000000e+00 : f32
      %64 = vector.broadcast %cst_44 : f32 to vector<1x32xf32>
      %c0_45 = arith.constant 0 : index
      %c0_46 = arith.constant 0 : index
      %65 = vector.load %arg14[%c0_45, %c0_46] : memref<1x32xf32, #tpu.memory_space<vmem>>, vector<1x32xf32>
      tpu.vector_store %arg14[%c0_45, %c0_46], %64 {strides = array<i32>} : memref<1x32xf32, #tpu.memory_space<vmem>>, vector<1x32xf32>,
      %cst_47 = arith.constant 0.000000e+00 : f32
      %66 = vector.broadcast %cst_47 : f32 to vector<1x32xf32>
      %c0_48 = arith.constant 0 : index
      %c0_49 = arith.constant 0 : index
      %67 = vector.load %arg15[%c0_48, %c0_49] : memref<1x32xf32, #tpu.memory_space<vmem>>, vector<1x32xf32>
      tpu.vector_store %arg15[%c0_48, %c0_49], %66 {strides = array<i32>} : memref<1x32xf32, #tpu.memory_space<vmem>>, vector<1x32xf32>,
    } else {
    }
    %c0 = arith.constant 0 : index
    %c0_1 = arith.constant 0 : index
    %c0_2 = arith.constant 0 : index
    %3 = vector.load %arg2[%c0, %c0_1, %c0_2] : memref<1x64x128xbf16, #tpu.memory_space<vmem>>, vector<1x64x128xbf16>
    %4 = vector.shape_cast %3 : vector<1x64x128xbf16> to vector<64x128xbf16>
    %c0_3 = arith.constant 0 : index
    %c0_4 = arith.constant 0 : index
    %5 = vector.load %arg3[%c0_3, %c0_4] : memref<128x64xbf16, #tpu.memory_space<vmem>>, vector<128x64xbf16>
    %cst = arith.constant dense<0.000000e+00> : vector<64x64xf32>
    %6 = tpu.matmul %4, %5, %cst {dimension_numbers = #tpu.dot_dimension_numbers<[1], [0], [0], [1], [0, 0, 1, 1], [], []>} : vector<64x128xbf16>, vector<128x64xbf16>, vector<64x64xf32> -> vector<64x64xf32>
    %c0_5 = arith.constant 0 : index
    %c0_6 = arith.constant 0 : index
    %7 = vector.load %arg4[%c0_5, %c0_6] : memref<1x64xf32, #tpu.memory_space<vmem>>, vector<1x64xf32>
    %8 = vector.broadcast %7 : vector<1x64xf32> to vector<64x64xf32>
    %9 = arith.addf %6, %8 : vector<64x64xf32>
    %10 = arith.truncf %9 : vector<64x64xf32> to vector<64x64xbf16>
    %c0_7 = arith.constant 0 : index
    %c0_8 = arith.constant 0 : index
    %11 = vector.load %arg5[%c0_7, %c0_8] : memref<64x128xbf16, #tpu.memory_space<vmem>>, vector<64x128xbf16>
    %cst_9 = arith.constant dense<0.000000e+00> : vector<64x128xf32>
    %12 = tpu.matmul %10, %11, %cst_9 {dimension_numbers = #tpu.dot_dimension_numbers<[1], [0], [0], [1], [0, 0, 1, 1], [], []>} : vector<64x64xbf16>, vector<64x128xbf16>, vector<64x128xf32> -> vector<64x128xf32>
    %c0_10 = arith.constant 0 : index
    %c0_11 = arith.constant 0 : index
    %13 = vector.load %arg6[%c0_10, %c0_11] : memref<1x128xf32, #tpu.memory_space<vmem>>, vector<1x128xf32>
    %14 = vector.broadcast %13 : vector<1x128xf32> to vector<64x128xf32>
    %15 = arith.addf %12, %14 : vector<64x128xf32>
    %16 = arith.mulf %15, %15 : vector<64x128xf32>
    %17 = arith.mulf %15, %16 : vector<64x128xf32>
    %cst_12 = arith.constant 4.471500e-02 : f32
    %18 = vector.broadcast %cst_12 : f32 to vector<64x128xf32>
    %19 = arith.mulf %18, %17 : vector<64x128xf32>
    %20 = arith.addf %15, %19 : vector<64x128xf32>
    %cst_13 = arith.constant 0.797884583 : f32
    %21 = vector.broadcast %cst_13 : f32 to vector<64x128xf32>
    %22 = arith.mulf %21, %20 : vector<64x128xf32>
    %23 = math.tanh %22 : vector<64x128xf32>
    %cst_14 = arith.constant 1.000000e+00 : f32
    %24 = vector.broadcast %cst_14 : f32 to vector<64x128xf32>
    %25 = arith.addf %24, %23 : vector<64x128xf32>
    %cst_15 = arith.constant 5.000000e-01 : f32
    %26 = vector.broadcast %cst_15 : f32 to vector<64x128xf32>
    %27 = arith.mulf %26, %25 : vector<64x128xf32>
    %28 = arith.mulf %15, %27 : vector<64x128xf32>
    %29 = arith.truncf %28 : vector<64x128xf32> to vector<64x128xbf16>
    %c0_16 = arith.constant 0 : index
    %c0_17 = arith.constant 0 : index
    %30 = vector.load %arg7[%c0_16, %c0_17] : memref<128x64xbf16, #tpu.memory_space<vmem>>, vector<128x64xbf16>
    %cst_18 = arith.constant dense<0.000000e+00> : vector<64x64xf32>
    %31 = tpu.matmul %29, %30, %cst_18 {dimension_numbers = #tpu.dot_dimension_numbers<[1], [0], [0], [1], [0, 0, 1, 1], [], []>} : vector<64x128xbf16>, vector<128x64xbf16>, vector<64x64xf32> -> vector<64x64xf32>
    %c0_19 = arith.constant 0 : index
    %c0_20 = arith.constant 0 : index
    %32 = vector.load %arg8[%c0_19, %c0_20] : memref<1x64xf32, #tpu.memory_space<vmem>>, vector<1x64xf32>
    %33 = vector.broadcast %32 : vector<1x64xf32> to vector<64x64xf32>
    %34 = arith.addf %31, %33 : vector<64x64xf32>
    %35 = arith.addf %9, %34 : vector<64x64xf32>
    %36 = arith.truncf %35 : vector<64x64xf32> to vector<64x64xbf16>
    %c0_21 = arith.constant 0 : index
    %c0_22 = arith.constant 0 : index
    %c0_23 = arith.constant 0 : index
    %37 = vector.load %arg11[%c0_21, %c0_22, %c0_23] : memref<1x64x64xbf16, #tpu.memory_space<vmem>>, vector<1x64x64xbf16>
    %38 = vector.shape_cast %37 : vector<1x64x64xbf16> to vector<64x64xbf16>
    %39 = vector.shape_cast %36 : vector<64x64xbf16> to vector<1x64x64xbf16>
    tpu.vector_store %arg11[%c0_21, %c0_22, %c0_23], %39 {strides = array<i32>} : memref<1x64x64xbf16, #tpu.memory_space<vmem>>, vector<1x64x64xbf16>,
    %40 = arith.truncf %35 : vector<64x64xf32> to vector<64x64xbf16>
    %c0_24 = arith.constant 0 : index
    %c0_25 = arith.constant 0 : index
    %41 = vector.load %arg9[%c0_24, %c0_25] : memref<64x32xbf16, #tpu.memory_space<vmem>>, vector<64x32xbf16>
    %cst_26 = arith.constant dense<0.000000e+00> : vector<64x32xf32>
    %42 = tpu.matmul %40, %41, %cst_26 {dimension_numbers = #tpu.dot_dimension_numbers<[1], [0], [0], [1], [0, 0, 1, 1], [], []>} : vector<64x64xbf16>, vector<64x32xbf16>, vector<64x32xf32> -> vector<64x32xf32>
    %c0_27 = arith.constant 0 : index
    %c0_28 = arith.constant 0 : index
    %43 = vector.load %arg10[%c0_27, %c0_28] : memref<1x32xf32, #tpu.memory_space<vmem>>, vector<1x32xf32>
    %44 = vector.broadcast %43 : vector<1x32xf32> to vector<64x32xf32>
    %45 = arith.addf %42, %44 : vector<64x32xf32>
    %46 = arith.truncf %45 : vector<64x32xf32> to vector<64x32xbf16>
    %c0_29 = arith.constant 0 : index
    %c0_30 = arith.constant 0 : index
    %c0_31 = arith.constant 0 : index
    %47 = vector.load %arg12[%c0_29, %c0_30, %c0_31] : memref<1x64x32xbf16, #tpu.memory_space<vmem>>, vector<1x64x32xbf16>
    %48 = vector.shape_cast %47 : vector<1x64x32xbf16> to vector<64x32xbf16>
    %49 = vector.shape_cast %46 : vector<64x32xbf16> to vector<1x64x32xbf16>
    tpu.vector_store %arg12[%c0_29, %c0_30, %c0_31], %49 {strides = array<i32>} : memref<1x64x32xbf16, #tpu.memory_space<vmem>>, vector<1x64x32xbf16>,
    %c0_32 = arith.constant 0 : index
    %c0_33 = arith.constant 0 : index
    %50 = vector.load %arg14[%c0_32, %c0_33] : memref<1x32xf32, #tpu.memory_space<vmem>>, vector<1x32xf32>
    %cst_34 = arith.constant dense<0.000000e+00> : vector<32xf32>
    %51 = vector.multi_reduction <add>, %45, %cst_34 [0] : vector<64x32xf32> to vector<32xf32>
    %52 = vector.shape_cast %51 : vector<32xf32> to vector<1x32xf32>
    %53 = arith.addf %50, %52 : vector<1x32xf32>
    %c0_35 = arith.constant 0 : index
    %c0_36 = arith.constant 0 : index
    %54 = vector.load %arg14[%c0_35, %c0_36] : memref<1x32xf32, #tpu.memory_space<vmem>>, vector<1x32xf32>
    tpu.vector_store %arg14[%c0_35, %c0_36], %53 {strides = array<i32>} : memref<1x32xf32, #tpu.memory_space<vmem>>, vector<1x32xf32>,
    %c0_37 = arith.constant 0 : index
    %c0_38 = arith.constant 0 : index
    %55 = vector.load %arg15[%c0_37, %c0_38] : memref<1x32xf32, #tpu.memory_space<vmem>>, vector<1x32xf32>
    %56 = arith.mulf %45, %45 : vector<64x32xf32>
    %cst_39 = arith.constant dense<0.000000e+00> : vector<32xf32>
    %57 = vector.multi_reduction <add>, %56, %cst_39 [0] : vector<64x32xf32> to vector<32xf32>
    %58 = vector.shape_cast %57 : vector<32xf32> to vector<1x32xf32>
    %59 = arith.addf %55, %58 : vector<1x32xf32>
    %c0_40 = arith.constant 0 : index
    %c0_41 = arith.constant 0 : index
    %60 = vector.load %arg15[%c0_40, %c0_41] : memref<1x32xf32, #tpu.memory_space<vmem>>, vector<1x32xf32>
    tpu.vector_store %arg15[%c0_40, %c0_41], %59 {strides = array<i32>} : memref<1x32xf32, #tpu.memory_space<vmem>>, vector<1x32xf32>,
    %c0_i32_42 = arith.constant 0 : i32
    %61 = arith.cmpi eq, %arg1, %c0_i32_42 : i32
    %62 = arith.extui %61 : i1 to i32
    %c0_i32_43 = arith.constant 0 : i32
    %63 = arith.cmpi ne, %62, %c0_i32_43 : i32
    scf.if %63 {
      %64 = tpu.iota {dimensions = array<i32: 1>} : vector<4x32xi32>
      %65 = tpu.iota {dimensions = array<i32: 0>} : vector<4x32xi32>
      %c8_i32 = arith.constant 8 : i32
      %66 = vector.broadcast %c8_i32 : i32 to vector<4x32xi32>
      %67 = arith.muli %65, %66 : vector<4x32xi32>
      %68 = arith.cmpi sge, %64, %67 : vector<4x32xi32>
      %c8_i32_44 = arith.constant 8 : i32
      %69 = vector.broadcast %c8_i32_44 : i32 to vector<4x32xi32>
      %70 = arith.addi %67, %69 : vector<4x32xi32>
      %71 = arith.cmpi slt, %64, %70 : vector<4x32xi32>
      %72 = arith.andi %68, %71 : vector<4x32xi1>
      %73 = arith.extui %72 : vector<4x32xi1> to vector<4x32xi32>
      %74 = arith.sitofp %73 : vector<4x32xi32> to vector<4x32xf32>
      %c0_45 = arith.constant 0 : index
      %c0_46 = arith.constant 0 : index
      %75 = vector.load %arg14[%c0_45, %c0_46] : memref<1x32xf32, #tpu.memory_space<vmem>>, vector<1x32xf32>
      %76 = vector.broadcast %75 : vector<1x32xf32> to vector<4x32xf32>
      %77 = arith.mulf %76, %74 : vector<4x32xf32>
      %cst_47 = arith.constant dense<0.000000e+00> : vector<4xf32>
      %78 = vector.multi_reduction <add>, %77, %cst_47 [1] : vector<4x32xf32> to vector<4xf32>
      %79 = vector.shape_cast %78 : vector<4xf32> to vector<4x1xf32>
      %cst_48 = arith.constant 5.120000e+02 : f32
      %80 = vector.broadcast %cst_48 : f32 to vector<4x1xf32>
      %81 = arith.divf %79, %80 : vector<4x1xf32>
      %c0_49 = arith.constant 0 : index
      %c0_50 = arith.constant 0 : index
      %82 = vector.load %arg15[%c0_49, %c0_50] : memref<1x32xf32, #tpu.memory_space<vmem>>, vector<1x32xf32>
      %83 = vector.broadcast %82 : vector<1x32xf32> to vector<4x32xf32>
      %84 = arith.mulf %83, %74 : vector<4x32xf32>
      %cst_51 = arith.constant dense<0.000000e+00> : vector<4xf32>
      %85 = vector.multi_reduction <add>, %84, %cst_51 [1] : vector<4x32xf32> to vector<4xf32>
      %86 = vector.shape_cast %85 : vector<4xf32> to vector<4x1xf32>
      %cst_52 = arith.constant 5.120000e+02 : f32
      %87 = vector.broadcast %cst_52 : f32 to vector<4x1xf32>
      %88 = arith.divf %86, %87 : vector<4x1xf32>
      %89 = arith.mulf %81, %81 : vector<4x1xf32>
      %90 = arith.subf %88, %89 : vector<4x1xf32>
      %cst_53 = arith.constant 0.000000e+00 : f32
      %91 = vector.broadcast %cst_53 : f32 to vector<4x1xf32>
      %92 = arith.maximumf %90, %91 : vector<4x1xf32>
      %93 = vector.broadcast %81 : vector<4x1xf32> to vector<4x32xf32>
      %94 = arith.mulf %74, %93 : vector<4x32xf32>
      %cst_54 = arith.constant dense<0.000000e+00> : vector<32xf32>
      %95 = vector.multi_reduction <add>, %94, %cst_54 [0] : vector<4x32xf32> to vector<32xf32>
      %96 = vector.shape_cast %95 : vector<32xf32> to vector<1x32xf32>
      %97 = vector.broadcast %92 : vector<4x1xf32> to vector<4x32xf32>
      %98 = arith.mulf %74, %97 : vector<4x32xf32>
      %cst_55 = arith.constant dense<0.000000e+00> : vector<32xf32>
      %99 = vector.multi_reduction <add>, %98, %cst_55 [0] : vector<4x32xf32> to vector<32xf32>
      %100 = vector.shape_cast %99 : vector<32xf32> to vector<1x32xf32>
      %101 = tpu.concatenate %96, %100 in 0 : vector<1x32xf32>, vector<1x32xf32> -> vector<2x32xf32>
      %c0_56 = arith.constant 0 : index
      %c0_57 = arith.constant 0 : index
      %c0_58 = arith.constant 0 : index
      %102 = vector.load %arg13[%c0_56, %c0_57, %c0_58] : memref<1x2x32xf32, #tpu.memory_space<vmem>>, vector<1x2x32xf32>
      %103 = vector.shape_cast %102 : vector<1x2x32xf32> to vector<2x32xf32>
      %104 = vector.shape_cast %101 : vector<2x32xf32> to vector<1x2x32xf32>
      tpu.vector_store %arg13[%c0_56, %c0_57, %c0_58], %104 {strides = array<i32>} : memref<1x2x32xf32, #tpu.memory_space<vmem>>, vector<1x2x32xf32>,
    } else {
    }
    return
  }
  func.func @transform_0(%arg0: i32, %arg1: i32) -> (i32, i32, i32) {
    %c0_i32 = arith.constant 0 : i32
    %c0_i32_0 = arith.constant 0 : i32
    return %arg0, %arg1, %c0_i32 : i32, i32, i32
  }
  func.func @transform_1(%arg0: i32, %arg1: i32) -> (i32, i32) {
    %c0_i32 = arith.constant 0 : i32
    %c0_i32_0 = arith.constant 0 : i32
    %c0_i32_1 = arith.constant 0 : i32
    return %c0_i32, %c0_i32_0 : i32, i32
  }
  func.func @transform_2(%arg0: i32, %arg1: i32) -> (i32, i32) {
    %c0_i32 = arith.constant 0 : i32
    %c0_i32_0 = arith.constant 0 : i32
    %c0_i32_1 = arith.constant 0 : i32
    return %c0_i32, %c0_i32_0 : i32, i32
  }
  func.func @transform_3(%arg0: i32, %arg1: i32) -> (i32, i32) {
    %c0_i32 = arith.constant 0 : i32
    %c0_i32_0 = arith.constant 0 : i32
    %c0_i32_1 = arith.constant 0 : i32
    return %c0_i32, %c0_i32_0 : i32, i32
  }
  func.func @transform_4(%arg0: i32, %arg1: i32) -> (i32, i32) {
    %c0_i32 = arith.constant 0 : i32
    %c0_i32_0 = arith.constant 0 : i32
    %c0_i32_1 = arith.constant 0 : i32
    return %c0_i32, %c0_i32_0 : i32, i32
  }
  func.func @transform_5(%arg0: i32, %arg1: i32) -> (i32, i32) {
    %c0_i32 = arith.constant 0 : i32
    %c0_i32_0 = arith.constant 0 : i32
    %c0_i32_1 = arith.constant 0 : i32
    return %c0_i32, %c0_i32_0 : i32, i32
  }
  func.func @transform_6(%arg0: i32, %arg1: i32) -> (i32, i32) {
    %c0_i32 = arith.constant 0 : i32
    %c0_i32_0 = arith.constant 0 : i32
    %c0_i32_1 = arith.constant 0 : i32
    return %c0_i32, %c0_i32_0 : i32, i32
  }
  func.func @transform_7(%arg0: i32, %arg1: i32) -> (i32, i32) {
    %c0_i32 = arith.constant 0 : i32
    %c0_i32_0 = arith.constant 0 : i32
    %c0_i32_1 = arith.constant 0 : i32
    return %c0_i32, %c0_i32_0 : i32, i32
  }
  func.func @transform_8(%arg0: i32, %arg1: i32) -> (i32, i32) {
    %c0_i32 = arith.constant 0 : i32
    %c0_i32_0 = arith.constant 0 : i32
    %c0_i32_1 = arith.constant 0 : i32
    return %c0_i32, %c0_i32_0 : i32, i32
  }
  func.func @transform_9(%arg0: i32, %arg1: i32) -> (i32, i32, i32) {
    %c0_i32 = arith.constant 0 : i32
    %c0_i32_0 = arith.constant 0 : i32
    return %arg0, %arg1, %c0_i32 : i32, i32, i32
  }
  func.func @transform_10(%arg0: i32, %arg1: i32) -> (i32, i32, i32) {
    %c0_i32 = arith.constant 0 : i32
    %c0_i32_0 = arith.constant 0 : i32
    return %arg0, %arg1, %c0_i32 : i32, i32, i32
  }
  func.func @transform_11(%arg0: i32, %arg1: i32) -> (i32, i32, i32) {
    %c0_i32 = arith.constant 0 : i32
    %c0_i32_0 = arith.constant 0 : i32
    %c0_i32_1 = arith.constant 0 : i32
    return %arg0, %c0_i32, %c0_i32_0 : i32, i32, i32
  }
}

module attributes {stable_mosaic.version = 11 : i64} {
  func.func @_stage_b_kernel(%arg0: i32, %arg1: i32, %arg2: memref<1x64x32xbf16, #tpu.memory_space<vmem>>, %arg3: memref<1x2x32xf32, #tpu.memory_space<vmem>>, %arg4: memref<1x32xf32, #tpu.memory_space<vmem>>, %arg5: memref<1x32xf32, #tpu.memory_space<vmem>>, %arg6: memref<1x32x64xf32, #tpu.memory_space<vmem>>) attributes {dimension_semantics = [#tpu.dimension_semantics<parallel>, #tpu.dimension_semantics<parallel>], iteration_bounds = array<i64: 2, 1>, scalar_prefetch = 0 : i64, scratch_operands = 0 : i64, tpu.core_type = #tpu.core_type<tc>, window_params = [{transform_indices = @transform_0, window_bounds = array<i64: 1, 64, 32>}, {transform_indices = @transform_1, window_bounds = array<i64: 1, 2, 32>}, {pipeline_mode = #tpu.pipeline_mode<synchronous>, transform_indices = @transform_2, window_bounds = array<i64: 1, 32>}, {pipeline_mode = #tpu.pipeline_mode<synchronous>, transform_indices = @transform_3, window_bounds = array<i64: 1, 32>}, {transform_indices = @transform_4, window_bounds = array<i64: 1, 32, 64>}]} {
    %c0 = arith.constant 0 : index
    %c0_0 = arith.constant 0 : index
    %c0_1 = arith.constant 0 : index
    %0 = vector.load %arg2[%c0, %c0_0, %c0_1] : memref<1x64x32xbf16, #tpu.memory_space<vmem>>, vector<1x64x32xbf16>
    %1 = vector.shape_cast %0 : vector<1x64x32xbf16> to vector<64x32xbf16>
    %2 = arith.extf %1 : vector<64x32xbf16> to vector<64x32xf32>
    %c0_2 = arith.constant 0 : index
    %c0_3 = arith.constant 0 : index
    %c0_4 = arith.constant 0 : index
    %3 = vector.load %arg3[%c0_2, %c0_3, %c0_4] : memref<1x2x32xf32, #tpu.memory_space<vmem>>, vector<1x2x32xf32>
    %4 = vector.shape_cast %3 : vector<1x2x32xf32> to vector<2x32xf32>
    %5 = vector.extract_strided_slice %4 {offsets = [0, 0], sizes = [1, 32], strides = [1, 1]} : vector<2x32xf32> to vector<1x32xf32>
    %6 = vector.extract_strided_slice %4 {offsets = [1, 0], sizes = [1, 32], strides = [1, 1]} : vector<2x32xf32> to vector<1x32xf32>
    %c0_5 = arith.constant 0 : index
    %c0_6 = arith.constant 0 : index
    %7 = vector.load %arg4[%c0_5, %c0_6] : memref<1x32xf32, #tpu.memory_space<vmem>>, vector<1x32xf32>
    %cst = arith.constant 9.99999974E-6 : f32
    %8 = vector.broadcast %cst : f32 to vector<1x32xf32>
    %9 = arith.addf %6, %8 : vector<1x32xf32>
    %10 = math.rsqrt %9 : vector<1x32xf32>
    %11 = arith.mulf %7, %10 : vector<1x32xf32>
    %c0_7 = arith.constant 0 : index
    %c0_8 = arith.constant 0 : index
    %12 = vector.load %arg5[%c0_7, %c0_8] : memref<1x32xf32, #tpu.memory_space<vmem>>, vector<1x32xf32>
    %13 = arith.mulf %5, %11 : vector<1x32xf32>
    %14 = arith.subf %12, %13 : vector<1x32xf32>
    %15 = vector.broadcast %11 : vector<1x32xf32> to vector<64x32xf32>
    %16 = arith.mulf %2, %15 : vector<64x32xf32>
    %17 = vector.broadcast %14 : vector<1x32xf32> to vector<64x32xf32>
    %18 = arith.addf %16, %17 : vector<64x32xf32>
    %19 = tpu.transpose %18, [1, 0] : vector<64x32xf32> -> vector<32x64xf32>
    %c0_9 = arith.constant 0 : index
    %c0_10 = arith.constant 0 : index
    %c0_11 = arith.constant 0 : index
    %20 = vector.load %arg6[%c0_9, %c0_10, %c0_11] : memref<1x32x64xf32, #tpu.memory_space<vmem>>, vector<1x32x64xf32>
    %21 = vector.shape_cast %20 : vector<1x32x64xf32> to vector<32x64xf32>
    %22 = vector.shape_cast %19 : vector<32x64xf32> to vector<1x32x64xf32>
    tpu.vector_store %arg6[%c0_9, %c0_10, %c0_11], %22 {strides = array<i32>} : memref<1x32x64xf32, #tpu.memory_space<vmem>>, vector<1x32x64xf32>,
    return
  }
  func.func @transform_0(%arg0: i32, %arg1: i32) -> (i32, i32, i32) {
    %c0_i32 = arith.constant 0 : i32
    %c0_i32_0 = arith.constant 0 : i32
    return %arg0, %arg1, %c0_i32 : i32, i32, i32
  }
  func.func @transform_1(%arg0: i32, %arg1: i32) -> (i32, i32, i32) {
    %c0_i32 = arith.constant 0 : i32
    %c0_i32_0 = arith.constant 0 : i32
    %c0_i32_1 = arith.constant 0 : i32
    return %arg0, %c0_i32, %c0_i32_0 : i32, i32, i32
  }
  func.func @transform_2(%arg0: i32, %arg1: i32) -> (i32, i32) {
    %c0_i32 = arith.constant 0 : i32
    %c0_i32_0 = arith.constant 0 : i32
    %c0_i32_1 = arith.constant 0 : i32
    return %c0_i32, %c0_i32_0 : i32, i32
  }
  func.func @transform_3(%arg0: i32, %arg1: i32) -> (i32, i32) {
    %c0_i32 = arith.constant 0 : i32
    %c0_i32_0 = arith.constant 0 : i32
    %c0_i32_1 = arith.constant 0 : i32
    return %c0_i32, %c0_i32_0 : i32, i32
  }
  func.func @transform_4(%arg0: i32, %arg1: i32) -> (i32, i32, i32) {
    %c0_i32 = arith.constant 0 : i32
    %c0_i32_0 = arith.constant 0 : i32
    return %arg0, %c0_i32, %arg1 : i32, i32, i32
  }
}

module attributes {stable_mosaic.version = 11 : i64} {
  func.func @_stage_a_kernel(%arg0: i32, %arg1: i32, %arg2: memref<1x16x256xbf16, #tpu.memory_space<vmem>>, %arg3: memref<256x128xbf16, #tpu.memory_space<vmem>>, %arg4: memref<1x128xf32, #tpu.memory_space<vmem>>, %arg5: memref<128x256xbf16, #tpu.memory_space<vmem>>, %arg6: memref<1x256xf32, #tpu.memory_space<vmem>>, %arg7: memref<256x128xbf16, #tpu.memory_space<vmem>>, %arg8: memref<1x128xf32, #tpu.memory_space<vmem>>, %arg9: memref<128x32xbf16, #tpu.memory_space<vmem>>, %arg10: memref<1x32xf32, #tpu.memory_space<vmem>>, %arg11: memref<1x16x32xbf16, #tpu.memory_space<vmem>>, %arg12: memref<1x2x32xf32, #tpu.memory_space<vmem>>, %arg13: memref<1x32xf32, #tpu.memory_space<vmem>>, %arg14: memref<1x32xf32, #tpu.memory_space<vmem>>) attributes {dimension_semantics = [#tpu.dimension_semantics<parallel>, #tpu.dimension_semantics<arbitrary>], iteration_bounds = array<i64: 2, 1>, scalar_prefetch = 0 : i64, scratch_operands = 2 : i64, tpu.core_type = #tpu.core_type<tc>, window_params = [{transform_indices = @transform_0, window_bounds = array<i64: 1, 16, 256>}, {pipeline_mode = #tpu.pipeline_mode<synchronous>, transform_indices = @transform_1, window_bounds = array<i64: 256, 128>}, {pipeline_mode = #tpu.pipeline_mode<synchronous>, transform_indices = @transform_2, window_bounds = array<i64: 1, 128>}, {pipeline_mode = #tpu.pipeline_mode<synchronous>, transform_indices = @transform_3, window_bounds = array<i64: 128, 256>}, {pipeline_mode = #tpu.pipeline_mode<synchronous>, transform_indices = @transform_4, window_bounds = array<i64: 1, 256>}, {pipeline_mode = #tpu.pipeline_mode<synchronous>, transform_indices = @transform_5, window_bounds = array<i64: 256, 128>}, {pipeline_mode = #tpu.pipeline_mode<synchronous>, transform_indices = @transform_6, window_bounds = array<i64: 1, 128>}, {pipeline_mode = #tpu.pipeline_mode<synchronous>, transform_indices = @transform_7, window_bounds = array<i64: 128, 32>}, {pipeline_mode = #tpu.pipeline_mode<synchronous>, transform_indices = @transform_8, window_bounds = array<i64: 1, 32>}, {transform_indices = @transform_9, window_bounds = array<i64: 1, 16, 32>}, {transform_indices = @transform_10, window_bounds = array<i64: 1, 2, 32>}]} {
    %c0_i32 = arith.constant 0 : i32
    %0 = arith.cmpi eq, %arg1, %c0_i32 : i32
    %1 = arith.extui %0 : i1 to i32
    %c0_i32_0 = arith.constant 0 : i32
    %2 = arith.cmpi ne, %1, %c0_i32_0 : i32
    scf.if %2 {
      %cst_41 = arith.constant 0.000000e+00 : f32
      %60 = vector.broadcast %cst_41 : f32 to vector<1x32xf32>
      %c0_42 = arith.constant 0 : index
      %c0_43 = arith.constant 0 : index
      %61 = vector.load %arg13[%c0_42, %c0_43] : memref<1x32xf32, #tpu.memory_space<vmem>>, vector<1x32xf32>
      tpu.vector_store %arg13[%c0_42, %c0_43], %60 {strides = array<i32>} : memref<1x32xf32, #tpu.memory_space<vmem>>, vector<1x32xf32>,
      %cst_44 = arith.constant 0.000000e+00 : f32
      %62 = vector.broadcast %cst_44 : f32 to vector<1x32xf32>
      %c0_45 = arith.constant 0 : index
      %c0_46 = arith.constant 0 : index
      %63 = vector.load %arg14[%c0_45, %c0_46] : memref<1x32xf32, #tpu.memory_space<vmem>>, vector<1x32xf32>
      tpu.vector_store %arg14[%c0_45, %c0_46], %62 {strides = array<i32>} : memref<1x32xf32, #tpu.memory_space<vmem>>, vector<1x32xf32>,
    } else {
    }
    %c0 = arith.constant 0 : index
    %c0_1 = arith.constant 0 : index
    %c0_2 = arith.constant 0 : index
    %3 = vector.load %arg2[%c0, %c0_1, %c0_2] : memref<1x16x256xbf16, #tpu.memory_space<vmem>>, vector<1x16x256xbf16>
    %4 = vector.shape_cast %3 : vector<1x16x256xbf16> to vector<16x256xbf16>
    %c0_3 = arith.constant 0 : index
    %c0_4 = arith.constant 0 : index
    %5 = vector.load %arg3[%c0_3, %c0_4] : memref<256x128xbf16, #tpu.memory_space<vmem>>, vector<256x128xbf16>
    %cst = arith.constant dense<0.000000e+00> : vector<16x128xf32>
    %6 = tpu.matmul %4, %5, %cst {dimension_numbers = #tpu.dot_dimension_numbers<[1], [0], [0], [1], [0, 0, 1, 1], [], []>} : vector<16x256xbf16>, vector<256x128xbf16>, vector<16x128xf32> -> vector<16x128xf32>
    %c0_5 = arith.constant 0 : index
    %c0_6 = arith.constant 0 : index
    %7 = vector.load %arg4[%c0_5, %c0_6] : memref<1x128xf32, #tpu.memory_space<vmem>>, vector<1x128xf32>
    %8 = vector.broadcast %7 : vector<1x128xf32> to vector<16x128xf32>
    %9 = arith.addf %6, %8 : vector<16x128xf32>
    %10 = arith.truncf %9 : vector<16x128xf32> to vector<16x128xbf16>
    %c0_7 = arith.constant 0 : index
    %c0_8 = arith.constant 0 : index
    %11 = vector.load %arg5[%c0_7, %c0_8] : memref<128x256xbf16, #tpu.memory_space<vmem>>, vector<128x256xbf16>
    %cst_9 = arith.constant dense<0.000000e+00> : vector<16x256xf32>
    %12 = tpu.matmul %10, %11, %cst_9 {dimension_numbers = #tpu.dot_dimension_numbers<[1], [0], [0], [1], [0, 0, 1, 1], [], []>} : vector<16x128xbf16>, vector<128x256xbf16>, vector<16x256xf32> -> vector<16x256xf32>
    %c0_10 = arith.constant 0 : index
    %c0_11 = arith.constant 0 : index
    %13 = vector.load %arg6[%c0_10, %c0_11] : memref<1x256xf32, #tpu.memory_space<vmem>>, vector<1x256xf32>
    %14 = vector.broadcast %13 : vector<1x256xf32> to vector<16x256xf32>
    %15 = arith.addf %12, %14 : vector<16x256xf32>
    %16 = arith.mulf %15, %15 : vector<16x256xf32>
    %17 = arith.mulf %15, %16 : vector<16x256xf32>
    %cst_12 = arith.constant 4.471500e-02 : f32
    %18 = vector.broadcast %cst_12 : f32 to vector<16x256xf32>
    %19 = arith.mulf %18, %17 : vector<16x256xf32>
    %20 = arith.addf %15, %19 : vector<16x256xf32>
    %cst_13 = arith.constant 0.797884583 : f32
    %21 = vector.broadcast %cst_13 : f32 to vector<16x256xf32>
    %22 = arith.mulf %21, %20 : vector<16x256xf32>
    %23 = math.tanh %22 : vector<16x256xf32>
    %cst_14 = arith.constant 1.000000e+00 : f32
    %24 = vector.broadcast %cst_14 : f32 to vector<16x256xf32>
    %25 = arith.addf %24, %23 : vector<16x256xf32>
    %cst_15 = arith.constant 5.000000e-01 : f32
    %26 = vector.broadcast %cst_15 : f32 to vector<16x256xf32>
    %27 = arith.mulf %26, %25 : vector<16x256xf32>
    %28 = arith.mulf %15, %27 : vector<16x256xf32>
    %29 = arith.truncf %28 : vector<16x256xf32> to vector<16x256xbf16>
    %c0_16 = arith.constant 0 : index
    %c0_17 = arith.constant 0 : index
    %30 = vector.load %arg7[%c0_16, %c0_17] : memref<256x128xbf16, #tpu.memory_space<vmem>>, vector<256x128xbf16>
    %cst_18 = arith.constant dense<0.000000e+00> : vector<16x128xf32>
    %31 = tpu.matmul %29, %30, %cst_18 {dimension_numbers = #tpu.dot_dimension_numbers<[1], [0], [0], [1], [0, 0, 1, 1], [], []>} : vector<16x256xbf16>, vector<256x128xbf16>, vector<16x128xf32> -> vector<16x128xf32>
    %c0_19 = arith.constant 0 : index
    %c0_20 = arith.constant 0 : index
    %32 = vector.load %arg8[%c0_19, %c0_20] : memref<1x128xf32, #tpu.memory_space<vmem>>, vector<1x128xf32>
    %33 = vector.broadcast %32 : vector<1x128xf32> to vector<16x128xf32>
    %34 = arith.addf %31, %33 : vector<16x128xf32>
    %35 = arith.addf %9, %34 : vector<16x128xf32>
    %36 = arith.truncf %35 : vector<16x128xf32> to vector<16x128xbf16>
    %c0_21 = arith.constant 0 : index
    %c0_22 = arith.constant 0 : index
    %37 = vector.load %arg9[%c0_21, %c0_22] : memref<128x32xbf16, #tpu.memory_space<vmem>>, vector<128x32xbf16>
    %cst_23 = arith.constant dense<0.000000e+00> : vector<16x32xf32>
    %38 = tpu.matmul %36, %37, %cst_23 {dimension_numbers = #tpu.dot_dimension_numbers<[1], [0], [0], [1], [0, 0, 1, 1], [], []>} : vector<16x128xbf16>, vector<128x32xbf16>, vector<16x32xf32> -> vector<16x32xf32>
    %c0_24 = arith.constant 0 : index
    %c0_25 = arith.constant 0 : index
    %39 = vector.load %arg10[%c0_24, %c0_25] : memref<1x32xf32, #tpu.memory_space<vmem>>, vector<1x32xf32>
    %40 = vector.broadcast %39 : vector<1x32xf32> to vector<16x32xf32>
    %41 = arith.addf %38, %40 : vector<16x32xf32>
    %42 = arith.truncf %41 : vector<16x32xf32> to vector<16x32xbf16>
    %c0_26 = arith.constant 0 : index
    %c0_27 = arith.constant 0 : index
    %c0_28 = arith.constant 0 : index
    %43 = vector.load %arg11[%c0_26, %c0_27, %c0_28] : memref<1x16x32xbf16, #tpu.memory_space<vmem>>, vector<1x16x32xbf16>
    %44 = vector.shape_cast %43 : vector<1x16x32xbf16> to vector<16x32xbf16>
    %45 = vector.shape_cast %42 : vector<16x32xbf16> to vector<1x16x32xbf16>
    tpu.vector_store %arg11[%c0_26, %c0_27, %c0_28], %45 {strides = array<i32>} : memref<1x16x32xbf16, #tpu.memory_space<vmem>>, vector<1x16x32xbf16>,
    %c0_29 = arith.constant 0 : index
    %c0_30 = arith.constant 0 : index
    %46 = vector.load %arg13[%c0_29, %c0_30] : memref<1x32xf32, #tpu.memory_space<vmem>>, vector<1x32xf32>
    %cst_31 = arith.constant dense<0.000000e+00> : vector<32xf32>
    %47 = vector.multi_reduction <add>, %41, %cst_31 [0] : vector<16x32xf32> to vector<32xf32>
    %48 = vector.shape_cast %47 : vector<32xf32> to vector<1x32xf32>
    %49 = arith.addf %46, %48 : vector<1x32xf32>
    %c0_32 = arith.constant 0 : index
    %c0_33 = arith.constant 0 : index
    %50 = vector.load %arg13[%c0_32, %c0_33] : memref<1x32xf32, #tpu.memory_space<vmem>>, vector<1x32xf32>
    tpu.vector_store %arg13[%c0_32, %c0_33], %49 {strides = array<i32>} : memref<1x32xf32, #tpu.memory_space<vmem>>, vector<1x32xf32>,
    %c0_34 = arith.constant 0 : index
    %c0_35 = arith.constant 0 : index
    %51 = vector.load %arg14[%c0_34, %c0_35] : memref<1x32xf32, #tpu.memory_space<vmem>>, vector<1x32xf32>
    %52 = arith.mulf %41, %41 : vector<16x32xf32>
    %cst_36 = arith.constant dense<0.000000e+00> : vector<32xf32>
    %53 = vector.multi_reduction <add>, %52, %cst_36 [0] : vector<16x32xf32> to vector<32xf32>
    %54 = vector.shape_cast %53 : vector<32xf32> to vector<1x32xf32>
    %55 = arith.addf %51, %54 : vector<1x32xf32>
    %c0_37 = arith.constant 0 : index
    %c0_38 = arith.constant 0 : index
    %56 = vector.load %arg14[%c0_37, %c0_38] : memref<1x32xf32, #tpu.memory_space<vmem>>, vector<1x32xf32>
    tpu.vector_store %arg14[%c0_37, %c0_38], %55 {strides = array<i32>} : memref<1x32xf32, #tpu.memory_space<vmem>>, vector<1x32xf32>,
    %c0_i32_39 = arith.constant 0 : i32
    %57 = arith.cmpi eq, %arg1, %c0_i32_39 : i32
    %58 = arith.extui %57 : i1 to i32
    %c0_i32_40 = arith.constant 0 : i32
    %59 = arith.cmpi ne, %58, %c0_i32_40 : i32
    scf.if %59 {
      %60 = tpu.iota {dimensions = array<i32: 1>} : vector<4x32xi32>
      %61 = tpu.iota {dimensions = array<i32: 0>} : vector<4x32xi32>
      %c8_i32 = arith.constant 8 : i32
      %62 = vector.broadcast %c8_i32 : i32 to vector<4x32xi32>
      %63 = arith.muli %61, %62 : vector<4x32xi32>
      %64 = arith.cmpi sge, %60, %63 : vector<4x32xi32>
      %c8_i32_41 = arith.constant 8 : i32
      %65 = vector.broadcast %c8_i32_41 : i32 to vector<4x32xi32>
      %66 = arith.addi %63, %65 : vector<4x32xi32>
      %67 = arith.cmpi slt, %60, %66 : vector<4x32xi32>
      %68 = arith.andi %64, %67 : vector<4x32xi1>
      %69 = arith.extui %68 : vector<4x32xi1> to vector<4x32xi32>
      %70 = arith.sitofp %69 : vector<4x32xi32> to vector<4x32xf32>
      %c0_42 = arith.constant 0 : index
      %c0_43 = arith.constant 0 : index
      %71 = vector.load %arg13[%c0_42, %c0_43] : memref<1x32xf32, #tpu.memory_space<vmem>>, vector<1x32xf32>
      %72 = vector.broadcast %71 : vector<1x32xf32> to vector<4x32xf32>
      %73 = arith.mulf %72, %70 : vector<4x32xf32>
      %cst_44 = arith.constant dense<0.000000e+00> : vector<4xf32>
      %74 = vector.multi_reduction <add>, %73, %cst_44 [1] : vector<4x32xf32> to vector<4xf32>
      %75 = vector.shape_cast %74 : vector<4xf32> to vector<4x1xf32>
      %cst_45 = arith.constant 1.280000e+02 : f32
      %76 = vector.broadcast %cst_45 : f32 to vector<4x1xf32>
      %77 = arith.divf %75, %76 : vector<4x1xf32>
      %c0_46 = arith.constant 0 : index
      %c0_47 = arith.constant 0 : index
      %78 = vector.load %arg14[%c0_46, %c0_47] : memref<1x32xf32, #tpu.memory_space<vmem>>, vector<1x32xf32>
      %79 = vector.broadcast %78 : vector<1x32xf32> to vector<4x32xf32>
      %80 = arith.mulf %79, %70 : vector<4x32xf32>
      %cst_48 = arith.constant dense<0.000000e+00> : vector<4xf32>
      %81 = vector.multi_reduction <add>, %80, %cst_48 [1] : vector<4x32xf32> to vector<4xf32>
      %82 = vector.shape_cast %81 : vector<4xf32> to vector<4x1xf32>
      %cst_49 = arith.constant 1.280000e+02 : f32
      %83 = vector.broadcast %cst_49 : f32 to vector<4x1xf32>
      %84 = arith.divf %82, %83 : vector<4x1xf32>
      %85 = arith.mulf %77, %77 : vector<4x1xf32>
      %86 = arith.subf %84, %85 : vector<4x1xf32>
      %cst_50 = arith.constant 0.000000e+00 : f32
      %87 = vector.broadcast %cst_50 : f32 to vector<4x1xf32>
      %88 = arith.maximumf %86, %87 : vector<4x1xf32>
      %89 = vector.broadcast %77 : vector<4x1xf32> to vector<4x32xf32>
      %90 = arith.mulf %70, %89 : vector<4x32xf32>
      %cst_51 = arith.constant dense<0.000000e+00> : vector<32xf32>
      %91 = vector.multi_reduction <add>, %90, %cst_51 [0] : vector<4x32xf32> to vector<32xf32>
      %92 = vector.shape_cast %91 : vector<32xf32> to vector<1x32xf32>
      %93 = vector.broadcast %88 : vector<4x1xf32> to vector<4x32xf32>
      %94 = arith.mulf %70, %93 : vector<4x32xf32>
      %cst_52 = arith.constant dense<0.000000e+00> : vector<32xf32>
      %95 = vector.multi_reduction <add>, %94, %cst_52 [0] : vector<4x32xf32> to vector<32xf32>
      %96 = vector.shape_cast %95 : vector<32xf32> to vector<1x32xf32>
      %97 = tpu.concatenate %92, %96 in 0 : vector<1x32xf32>, vector<1x32xf32> -> vector<2x32xf32>
      %c0_53 = arith.constant 0 : index
      %c0_54 = arith.constant 0 : index
      %c0_55 = arith.constant 0 : index
      %98 = vector.load %arg12[%c0_53, %c0_54, %c0_55] : memref<1x2x32xf32, #tpu.memory_space<vmem>>, vector<1x2x32xf32>
      %99 = vector.shape_cast %98 : vector<1x2x32xf32> to vector<2x32xf32>
      %100 = vector.shape_cast %97 : vector<2x32xf32> to vector<1x2x32xf32>
      tpu.vector_store %arg12[%c0_53, %c0_54, %c0_55], %100 {strides = array<i32>} : memref<1x2x32xf32, #tpu.memory_space<vmem>>, vector<1x2x32xf32>,
    } else {
    }
    return
  }
  func.func @transform_0(%arg0: i32, %arg1: i32) -> (i32, i32, i32) {
    %c0_i32 = arith.constant 0 : i32
    %c0_i32_0 = arith.constant 0 : i32
    return %arg0, %arg1, %c0_i32 : i32, i32, i32
  }
  func.func @transform_1(%arg0: i32, %arg1: i32) -> (i32, i32) {
    %c0_i32 = arith.constant 0 : i32
    %c0_i32_0 = arith.constant 0 : i32
    %c0_i32_1 = arith.constant 0 : i32
    return %c0_i32, %c0_i32_0 : i32, i32
  }
  func.func @transform_2(%arg0: i32, %arg1: i32) -> (i32, i32) {
    %c0_i32 = arith.constant 0 : i32
    %c0_i32_0 = arith.constant 0 : i32
    %c0_i32_1 = arith.constant 0 : i32
    return %c0_i32, %c0_i32_0 : i32, i32
  }
  func.func @transform_3(%arg0: i32, %arg1: i32) -> (i32, i32) {
    %c0_i32 = arith.constant 0 : i32
    %c0_i32_0 = arith.constant 0 : i32
    %c0_i32_1 = arith.constant 0 : i32
    return %c0_i32, %c0_i32_0 : i32, i32
  }
  func.func @transform_4(%arg0: i32, %arg1: i32) -> (i32, i32) {
    %c0_i32 = arith.constant 0 : i32
    %c0_i32_0 = arith.constant 0 : i32
    %c0_i32_1 = arith.constant 0 : i32
    return %c0_i32, %c0_i32_0 : i32, i32
  }
  func.func @transform_5(%arg0: i32, %arg1: i32) -> (i32, i32) {
    %c0_i32 = arith.constant 0 : i32
    %c0_i32_0 = arith.constant 0 : i32
    %c0_i32_1 = arith.constant 0 : i32
    return %c0_i32, %c0_i32_0 : i32, i32
  }
  func.func @transform_6(%arg0: i32, %arg1: i32) -> (i32, i32) {
    %c0_i32 = arith.constant 0 : i32
    %c0_i32_0 = arith.constant 0 : i32
    %c0_i32_1 = arith.constant 0 : i32
    return %c0_i32, %c0_i32_0 : i32, i32
  }
  func.func @transform_7(%arg0: i32, %arg1: i32) -> (i32, i32) {
    %c0_i32 = arith.constant 0 : i32
    %c0_i32_0 = arith.constant 0 : i32
    %c0_i32_1 = arith.constant 0 : i32
    return %c0_i32, %c0_i32_0 : i32, i32
  }
  func.func @transform_8(%arg0: i32, %arg1: i32) -> (i32, i32) {
    %c0_i32 = arith.constant 0 : i32
    %c0_i32_0 = arith.constant 0 : i32
    %c0_i32_1 = arith.constant 0 : i32
    return %c0_i32, %c0_i32_0 : i32, i32
  }
  func.func @transform_9(%arg0: i32, %arg1: i32) -> (i32, i32, i32) {
    %c0_i32 = arith.constant 0 : i32
    %c0_i32_0 = arith.constant 0 : i32
    return %arg0, %arg1, %c0_i32 : i32, i32, i32
  }
  func.func @transform_10(%arg0: i32, %arg1: i32) -> (i32, i32, i32) {
    %c0_i32 = arith.constant 0 : i32
    %c0_i32_0 = arith.constant 0 : i32
    %c0_i32_1 = arith.constant 0 : i32
    return %arg0, %c0_i32, %c0_i32_0 : i32, i32, i32
  }
}

module attributes {stable_mosaic.version = 11 : i64} {
  func.func @_stage_b_kernel(%arg0: i32, %arg1: i32, %arg2: memref<1x16x32xbf16, #tpu.memory_space<vmem>>, %arg3: memref<1x2x32xf32, #tpu.memory_space<vmem>>, %arg4: memref<1x32xf32, #tpu.memory_space<vmem>>, %arg5: memref<1x32xf32, #tpu.memory_space<vmem>>, %arg6: memref<1x32x16xf32, #tpu.memory_space<vmem>>) attributes {dimension_semantics = [#tpu.dimension_semantics<parallel>, #tpu.dimension_semantics<parallel>], iteration_bounds = array<i64: 2, 1>, scalar_prefetch = 0 : i64, scratch_operands = 0 : i64, tpu.core_type = #tpu.core_type<tc>, window_params = [{transform_indices = @transform_0, window_bounds = array<i64: 1, 16, 32>}, {transform_indices = @transform_1, window_bounds = array<i64: 1, 2, 32>}, {pipeline_mode = #tpu.pipeline_mode<synchronous>, transform_indices = @transform_2, window_bounds = array<i64: 1, 32>}, {pipeline_mode = #tpu.pipeline_mode<synchronous>, transform_indices = @transform_3, window_bounds = array<i64: 1, 32>}, {transform_indices = @transform_4, window_bounds = array<i64: 1, 32, 16>}]} {
    %c0 = arith.constant 0 : index
    %c0_0 = arith.constant 0 : index
    %c0_1 = arith.constant 0 : index
    %0 = vector.load %arg2[%c0, %c0_0, %c0_1] : memref<1x16x32xbf16, #tpu.memory_space<vmem>>, vector<1x16x32xbf16>
    %1 = vector.shape_cast %0 : vector<1x16x32xbf16> to vector<16x32xbf16>
    %2 = arith.extf %1 : vector<16x32xbf16> to vector<16x32xf32>
    %c0_2 = arith.constant 0 : index
    %c0_3 = arith.constant 0 : index
    %c0_4 = arith.constant 0 : index
    %3 = vector.load %arg3[%c0_2, %c0_3, %c0_4] : memref<1x2x32xf32, #tpu.memory_space<vmem>>, vector<1x2x32xf32>
    %4 = vector.shape_cast %3 : vector<1x2x32xf32> to vector<2x32xf32>
    %5 = vector.extract_strided_slice %4 {offsets = [0, 0], sizes = [1, 32], strides = [1, 1]} : vector<2x32xf32> to vector<1x32xf32>
    %6 = vector.extract_strided_slice %4 {offsets = [1, 0], sizes = [1, 32], strides = [1, 1]} : vector<2x32xf32> to vector<1x32xf32>
    %c0_5 = arith.constant 0 : index
    %c0_6 = arith.constant 0 : index
    %7 = vector.load %arg4[%c0_5, %c0_6] : memref<1x32xf32, #tpu.memory_space<vmem>>, vector<1x32xf32>
    %cst = arith.constant 9.99999974E-6 : f32
    %8 = vector.broadcast %cst : f32 to vector<1x32xf32>
    %9 = arith.addf %6, %8 : vector<1x32xf32>
    %10 = math.rsqrt %9 : vector<1x32xf32>
    %11 = arith.mulf %7, %10 : vector<1x32xf32>
    %c0_7 = arith.constant 0 : index
    %c0_8 = arith.constant 0 : index
    %12 = vector.load %arg5[%c0_7, %c0_8] : memref<1x32xf32, #tpu.memory_space<vmem>>, vector<1x32xf32>
    %13 = arith.mulf %5, %11 : vector<1x32xf32>
    %14 = arith.subf %12, %13 : vector<1x32xf32>
    %15 = vector.broadcast %11 : vector<1x32xf32> to vector<16x32xf32>
    %16 = arith.mulf %2, %15 : vector<16x32xf32>
    %17 = vector.broadcast %14 : vector<1x32xf32> to vector<16x32xf32>
    %18 = arith.addf %16, %17 : vector<16x32xf32>
    %19 = tpu.transpose %18, [1, 0] : vector<16x32xf32> -> vector<32x16xf32>
    %c0_9 = arith.constant 0 : index
    %c0_10 = arith.constant 0 : index
    %c0_11 = arith.constant 0 : index
    %20 = vector.load %arg6[%c0_9, %c0_10, %c0_11] : memref<1x32x16xf32, #tpu.memory_space<vmem>>, vector<1x32x16xf32>
    %21 = vector.shape_cast %20 : vector<1x32x16xf32> to vector<32x16xf32>
    %22 = vector.shape_cast %19 : vector<32x16xf32> to vector<1x32x16xf32>
    tpu.vector_store %arg6[%c0_9, %c0_10, %c0_11], %22 {strides = array<i32>} : memref<1x32x16xf32, #tpu.memory_space<vmem>>, vector<1x32x16xf32>,
    return
  }
  func.func @transform_0(%arg0: i32, %arg1: i32) -> (i32, i32, i32) {
    %c0_i32 = arith.constant 0 : i32
    %c0_i32_0 = arith.constant 0 : i32
    return %arg0, %arg1, %c0_i32 : i32, i32, i32
  }
  func.func @transform_1(%arg0: i32, %arg1: i32) -> (i32, i32, i32) {
    %c0_i32 = arith.constant 0 : i32
    %c0_i32_0 = arith.constant 0 : i32
    %c0_i32_1 = arith.constant 0 : i32
    return %arg0, %c0_i32, %c0_i32_0 : i32, i32, i32
  }
  func.func @transform_2(%arg0: i32, %arg1: i32) -> (i32, i32) {
    %c0_i32 = arith.constant 0 : i32
    %c0_i32_0 = arith.constant 0 : i32
    %c0_i32_1 = arith.constant 0 : i32
    return %c0_i32, %c0_i32_0 : i32, i32
  }
  func.func @transform_3(%arg0: i32, %arg1: i32) -> (i32, i32) {
    %c0_i32 = arith.constant 0 : i32
    %c0_i32_0 = arith.constant 0 : i32
    %c0_i32_1 = arith.constant 0 : i32
    return %c0_i32, %c0_i32_0 : i32, i32
  }
  func.func @transform_4(%arg0: i32, %arg1: i32) -> (i32, i32, i32) {
    %c0_i32 = arith.constant 0 : i32
    %c0_i32_0 = arith.constant 0 : i32
    return %arg0, %c0_i32, %arg1 : i32, i32, i32
  }
}

</mosaic_0001>

<bundles_post_ra>
// kernel: a_call__.6
= control target key start
LH: loop header
LB: loop body
LE: loop exit
PB: predicated region body
PF: predicated region fallthrough
CT: control target
= control target key end

     0   :  { %s2260_s17 = smov 0   ;;  %s2262_s18 = smov 0   ;;  %s2746_s0 = inlined_call_operand.vmem [shape: bf16[2,256,48], index: 0, kind: input, shape index: {}]   ;;  %s2747_s1 = inlined_call_operand.vmem [shape: bf16[48,32], index: 1, kind: input, shape index: {}]   ;;  %s2748_s2 = inlined_call_operand.vmem [shape: f32[1,32], index: 2, kind: input, shape index: {}, may-alias: {2,6,8}]   ;;  %s2749_s3 = inlined_call_operand.vmem [shape: bf16[32,64], index: 3, kind: input, shape index: {}]   ;;  %s2750_s4 = inlined_call_operand.vmem [shape: f32[1,64], index: 4, kind: input, shape index: {}]   ;;  %s2751_s5 = inlined_call_operand.vmem [shape: bf16[64,32], index: 5, kind: input, shape index: {}]   ;;  %s2752_s6 = inlined_call_operand.vmem [shape: f32[1,32], index: 6, kind: input, shape index: {}, may-alias: {2,6,8}]   ;;  %s2753_s7 = inlined_call_operand.vmem [shape: bf16[32,32], index: 7, kind: input, shape index: {}]   ;;  %s2754_s8 = inlined_call_operand.vmem [shape: f32[1,32], index: 8, kind: input, shape index: {}, may-alias: {2,6,8}]   ;;  %s2755_s9 = inlined_call_operand.vmem [shape: bf16[2,256,32], index: 9, kind: output, shape index: {0}]   ;;  %s2756_s10 = inlined_call_operand.vmem [shape: bf16[2,256,32], index: 10, kind: output, shape index: {1}]   ;;  %s2757_s11 = inlined_call_operand.vmem [shape: f32[2,2,32], index: 11, kind: output, shape index: {2}]  }
   0x1   :  { %s2264_s19 = smov 0   ;;  %s2266_s20 = smov 0  }
   0x2   :  { %s2268_s21 = smov 0  }
   0x3 LB: > { %2760 = sst [smem:[#allocation4_spill]] %s2188_s19  ;;  %s31_s22 = sadd.s32 1, %s2188_s19  ;;  %s2196_s21 = sphi %s2268_s21, %s22_s21   ;;  %s2192_s20 = sphi %s2266_s20, %s2767_s20   ;;  %s2188_s19 = sphi %s2264_s19, %s2766_s19   ;;  %s2184_s18 = sphi %s2262_s18, %s2765_s18   ;;  %s2180_s17 = sphi %s2260_s17, %s2764_s17  }
   0x4   : > { %2761 = sst [smem:[#allocation5_spill]] %s2192_s20  ;;  %s34_s23 = sadd.s32 1, %s2192_s20 }
   0x5   : > { %p32_p0 = scmp.ge.s32.totalorder %s31_s22, 2  ;;  %p1799_p1 = scmp.ge.s32.totalorder %s2196_s21, 1 }
   0x6   : > { %p365_p2 = scmp.lt.s32.totalorder %s2196_s21, 5 }
   0x7   : > { %s2769_s22 = smov (%p32_p0, %s31_s22), 0  ;;  %s2771_s23 = smov (!%p32_p0, %s34_s23), %s2192_s20 }
   0x8   : > { %2762 = sst [smem:[#allocation6_spill]] %s2769_s22  ;;  %p366_p3 = pnand %p1799_p1, %p365_p2 }
   0x9   : > { %p36_p4 = scmp.ge.s32.totalorder %s2771_s23, 2  ;;  %s1800_s24 = sshll.u32 (!%p366_p3), %s2180_s17, 4 }
   0xa   : > { %369 = sbr.rel (%p366_p3) target bundleno = 1177 (0x499), region = 56  ;;  %p427_p5 = scmp.lt.s32.totalorder (!%p366_p3), %s2184_s18, 1 }
   0xb   : > { %s2773_s23 = smov (%p36_p4, %s2771_s23), 0  ;;  %p429_p6 = scmp.lt.s32.totalorder (!%p366_p3), %s1800_s24, 31 }
   0xc   : > { %2763 = sst [smem:[#allocation7_spill]] %s2773_s23  ;;  %p1810_p7 = scmp.ne.s32.totalorder (!%p366_p3), %s2180_s17, 0 }
  0x11   : > { %s2775_s18 = smov (!%p427_p5, %s2184_s18), 1  ;;  %s2777_s24 = smov (!%p429_p6, %s1800_s24), 31 }
  0x12   : > { %s1801_s25 = sshll.u32 %s2775_s18, 5  ;;  %s1809_s26 = sshll.u32 %s2775_s18, 1  ;;  %vm465_vm0 = vcmask (!%p1810_p7), 253952   ;;  %v2198_v0 = vmov (!%p1810_p7), 0.0  }
  0x13   : > { %s432_s27 = sadd.s32 %s1801_s25, %s2777_s24  ;;  %s2296_s30 = scalar_lea.vmem %s2757_s11, %s1809_s26  ;;  %466 = vst.msk [vmem:[#allocation2] sm:$0x1] (!%p1810_p7), %vm465_vm0, %v2198_v0  ;;  %467 = vst.msk [vmem:[#allocation3] sm:$0x1] (!%p1810_p7), %vm465_vm0, %v2198_v0 }
  0x14   : > { %s1802_s12 = sshll.u32 %s432_s27, 2  ;;  %464 = sbr.rel (%p1810_p7) target bundleno = 27 (0x1b), region = 60 }
  0x15   : > { %s2301_s15 = scalar_lea.vmem %s2746_s0, %s1802_s12  ;;  %s2306_s22 = scalar_lea.vmem %s2755_s9, %s1802_s12 }
  0x16   : > { %s2311_s18 = scalar_lea.vmem %s2756_s10, %s1802_s12 }
  0x1b PF: > { %v2107_v1 = vld [vmem:[%s2747_s1] sm:$0xff]   ;;  %v2108_v2 = vld [vmem:[%s2747_s1 + $0x8] sm:$0xff]   ;;  %vm555_vm1 = vcmask 392192   ;;  %v2109_v4 = vld [vmem:[%s2747_s1 + $0x10] sm:$0xff]   ;;  %vm708_vm2 = vcmask 261120   ;;  %vm1021_vm3 = vcmask 523264  }
  0x1c   : > { %1979 = vmatprep.subr.bf16.mxu0 %v2107_v1  ;;  %v2110_v3 = vld [vmem:[%s2301_s15] sm:$0xff]   ;;  %v2111_v5 = vld [vmem:[%s2301_s15 + $0x8] sm:$0xff]   ;;  %v2112_v6 = vld [vmem:[%s2301_s15 + $0x10] sm:$0xff]   ;;  %vm1223_vm4 = vcmask 257024   ;;  %vm1503_vm5 = vcmask 253952   ;;  %p1898_p8 = scmp.ne.s32.totalorder %s2180_s17, 1 }
  0x1d   : > { %1980 = vmatpush3.bf16.msra.mxu0 %v2107_v1  ;;  %1985 = vmatprep.mubr.msk.bf16.mxu0 %vm555_vm1, %v2110_v3  ;;  %v2113_v7 = vld [vmem:[%s2301_s15 + $0x18] sm:$0xff]   ;;  %v2114_v8 = vld [vmem:[%s2301_s15 + $0x20] sm:$0xff]   ;;  %v2115_v9 = vld [vmem:[%s2301_s15 + $0x28] sm:$0xff]   ;;  %vm1620_vm9 = vcmask (!%p1898_p8), 1040384   ;;  %vm1622_vm10 = vcmask (!%p1898_p8), 254976  }
  0x1e   : > { %1981 = vmatprep.subr.bf16.mxu0 %v2108_v2  ;;  %v2116_v10 = vld [vmem:[%s2301_s15 + $0x30] sm:$0xff]   ;;  %v2117_v11 = vld [vmem:[%s2301_s15 + $0x38] sm:$0xff]   ;;  %v2118_v12 = vld [vmem:[%s2749_s3] sm:$0xff]  }
  0x1f   : > { %2001 = vmatprep.subr.bf16.mxu1 %v2118_v12  ;;  %v2119_v13 = vld [vmem:[%s2749_s3 + $0x8] sm:$0xff]   ;;  %v1811_v15 = vld [vmem:[%s2748_s2] ss:$0 sm:$0xff]  ;;  %v2122_v57 = vld [vmem:[%s2751_s5 + $0x10] sm:$0xff]  }
  0x20   : > { %2002 = vmatpush3.bf16.msra.mxu1 %v2118_v12  ;;  %v2120_v55 = vld [vmem:[%s2751_s5] sm:$0xff]   ;;  %v2121_v56 = vld [vmem:[%s2751_s5 + $0x8] sm:$0xff]   ;;  %v2123_v58 = vld [vmem:[%s2751_s5 + $0x18] sm:$0xff]  }
  0x21   : > { %1982 = vmatpush3.bf16.msra.mxu0 %v2108_v2  ;;  %2003 = vmatprep.subr.bf16.mxu1 %v2119_v13  ;;  %v2124_v59 = vld [vmem:[%s2753_s7] sm:$0xff]   ;;  %v2125_v60 = vld [vmem:[%s2753_s7 + $0x8] sm:$0xff]  }
  0x22   : > { %1983 = vmatprep.subr.bf16.mxu0 %v2109_v4  ;;  %v2425_v61 = vld [vmem:[%s2750_s4] ss:$0 sm:$0xff] }
  0x24   : > { %2004 = vmatpush3.bf16.msra.mxu1 %v2119_v13 }
  0x25   : > { %1984 = vmatpush3.bf16.msra.mxu0 %v2109_v4  ;;  %2021 = vmatprep.subr.bf16.mxu1 %v2120_v55 }
  0x26   : > { %2045 = vmatprep.subr.bf16.mxu0 %v2124_v59 }
  0x28   : > { %1986 = vmatmul.mubr.msk.bf16.vlgmr.msra.gmra.mrb[0].mxu0 %vm555_vm1, %v2111_v5 }
  0x29   : > { %1989 = vmatprep.mubr.msk.bf16.mxu0 %vm555_vm1, %v2112_v6  ;;  %2046 = vmatpush3.bf16.msra.mxu0 %v2124_v59 }
  0x2a   : > { %2047 = vmatprep.subr.bf16.mxu0 %v2125_v60 }
  0x2d   : > { %2048 = vmatpush3.bf16.msra.mxu0 %v2125_v60 }
  0x30   : > { %1990 = vmatmul.mubr.msk.bf16.gmra.mrb[4].mxu0 %vm555_vm1, %v2113_v7 }
  0x31   : > { %1993 = vmatprep.mubr.msk.bf16.mxu0 %vm555_vm1, %v2114_v8 }
  0x38   : > { %1994 = vmatmul.mubr.msk.bf16.gmra.mrb[8].mxu0 %vm555_vm1, %v2115_v9 }
  0x39   : > { %1997 = vmatprep.mubr.msk.bf16.mxu0 %vm555_vm1, %v2116_v10 }
  0x40   : > { %1998 = vmatmul.mubr.msk.bf16.gmra.mrb[12].mxu0 %vm555_vm1, %v2117_v11 }
  0xfb   : > { %v1987_v14 = vpop.f32.mrb[0].mxu0 }
  0xfc   : > { %v614_v16 = vpop.f32.mrb[1].mxu0  ;;  %v2354_v22 = vadd.f32 %v1987_v14, %v1811_v15 }
  0xfd   : > { %v1988_v17 = vpop.f32.mrb[2].mxu0  ;;  %v2350_v20 = vadd.f32 %v1811_v15, %v614_v16 }
  0xfe   : > { %v2348_v18 = vadd.f32 %v1988_v17, %v1811_v15  ;;  %v617_v19 = vpop.f32.mrb[3].mxu0 }
  0xff   : > { %v2352_v21 = vadd.f32 %v1811_v15, %v617_v19 }
 0x100   : > { %v678_v24 = vpack.c.bf16 %v2348_v18, %v2354_v22 }
 0x101   : > { %v677_v23 = vpack.c.bf16 %v2352_v21, %v2350_v20 }
 0x103   : > { %v1991_v25 = vpop.f32.mrb[4].mxu0  ;;  %2005 = vmatprep.mubr.msk.bf16.mxu1 %vm708_vm2, %v677_v23 }
 0x104   : > { %v630_v26 = vpop.f32.mrb[5].mxu0  ;;  %2006 = vmatmul.mubr.msk.bf16.vlgmr.msra.gmra.mrb[0].mxu1 %vm708_vm2, %v678_v24  ;;  %v2368_v32 = vadd.f32 %v1991_v25, %v1811_v15 }
 0x105   : > { %v1992_v27 = vpop.f32.mrb[6].mxu0  ;;  %v2364_v30 = vadd.f32 %v1811_v15, %v630_v26  ;;  %2022 = vmatpush3.bf16.msra.mxu1 %v2120_v55 }
 0x106   : > { %v2362_v28 = vadd.f32 %v1992_v27, %v1811_v15  ;;  %v633_v29 = vpop.f32.mrb[7].mxu0  ;;  %2023 = vmatprep.subr.bf16.mxu1 %v2121_v56 }
 0x107   : > { %v2366_v31 = vadd.f32 %v1811_v15, %v633_v29 }
 0x108   : > { %v680_v34 = vpack.c.bf16 %v2362_v28, %v2368_v32 }
 0x109   : > { %v679_v33 = vpack.c.bf16 %v2366_v31, %v2364_v30  ;;  %2024 = vmatpush3.bf16.msra.mxu1 %v2121_v56 }
 0x10a   : > { %2025 = vmatprep.subr.bf16.mxu1 %v2122_v57 }
 0x10b   : > { %v1995_v35 = vpop.f32.mrb[8].mxu0  ;;  %2009 = vmatprep.mubr.msk.bf16.mxu1 %vm708_vm2, %v679_v33 }
 0x10c   : > { %v646_v36 = vpop.f32.mrb[9].mxu0  ;;  %2010 = vmatmul.mubr.msk.bf16.gmra.mrb[4].mxu1 %vm708_vm2, %v680_v34  ;;  %v2382_v42 = vadd.f32 %v1995_v35, %v1811_v15 }
 0x10d   : > { %v1996_v37 = vpop.f32.mrb[10].mxu0  ;;  %v2378_v40 = vadd.f32 %v1811_v15, %v646_v36  ;;  %2026 = vmatpush3.bf16.msra.mxu1 %v2122_v57 }
 0x10e   : > { %v2376_v38 = vadd.f32 %v1996_v37, %v1811_v15  ;;  %v649_v39 = vpop.f32.mrb[11].mxu0  ;;  %2027 = vmatprep.subr.bf16.mxu1 %v2123_v58 }
 0x10f   : > { %v2380_v41 = vadd.f32 %v1811_v15, %v649_v39 }
 0x110   : > { %v682_v44 = vpack.c.bf16 %v2376_v38, %v2382_v42 }
 0x111   : > { %v681_v43 = vpack.c.bf16 %v2380_v41, %v2378_v40  ;;  %2028 = vmatpush3.bf16.msra.mxu1 %v2123_v58 }
 0x113   : > { %v1999_v45 = vpop.f32.mrb[12].mxu0  ;;  %2013 = vmatprep.mubr.msk.bf16.mxu1 %vm708_vm2, %v681_v43 }
 0x114   : > { %v662_v46 = vpop.f32.mrb[13].mxu0  ;;  %2014 = vmatmul.mubr.msk.bf16.gmra.mrb[8].mxu1 %vm708_vm2, %v682_v44  ;;  %v2396_v52 = vadd.f32 %v1999_v45, %v1811_v15 }
 0x115   : > { %v2000_v47 = vpop.f32.mrb[14].mxu0  ;;  %v2392_v50 = vadd.f32 %v1811_v15, %v662_v46 }
 0x116   : > { %v2390_v48 = vadd.f32 %v2000_v47, %v1811_v15  ;;  %v665_v49 = vpop.f32.mrb[15].mxu0 }
 0x117   : > { %v2394_v51 = vadd.f32 %v1811_v15, %v665_v49 }
 0x118   : > { %v684_v54 = vpack.c.bf16 %v2390_v48, %v2396_v52 }
 0x119   : > { %v683_v53 = vpack.c.bf16 %v2394_v51, %v2392_v50 }
 0x11b   : > { %2017 = vmatprep.mubr.msk.bf16.mxu1 %vm708_vm2, %v683_v53 }
 0x11c   : > { %2018 = vmatmul.mubr.msk.bf16.gmra.mrb[12].mxu1 %vm708_vm2, %v684_v54 }
 0x1d7   : > { %v2007_v62 = vpop.f32.mrb[0].mxu1 }
 0x1d8   : > { %v2428_v63 = vadd.f32 %v2007_v62, %v2425_v61  ;;  %v767_v0 = vpop.f32.mrb[1].mxu1 }
 0x1d9   : > { %v2431_v1 = vadd.f32 %v2425_v61, %v767_v0  ;;  %v2008_v2 = vpop.f32.mrb[2].mxu1 }
 0x1da   : > { %v832_v3 = vmul.f32 %v2428_v63, %v2428_v63  ;;  %v2436_v4 = vadd.f32 %v2008_v2, %v2425_v61  ;;  %v770_v5 = vpop.f32.mrb[3].mxu1 }
 0x1db   : > { %v830_v6 = vmul.f32 %v2431_v1, %v2431_v1  ;;  %v2441_v7 = vadd.f32 %v2425_v61, %v770_v5 }
 0x1dc   : > { %v848_v8 = vmul.f32 %v832_v3, %v2428_v63  ;;  %v833_v9 = vmul.f32 %v2436_v4, %v2436_v4 }
 0x1dd   : > { %v846_v10 = vmul.f32 %v830_v6, %v2431_v1  ;;  %v831_v11 = vmul.f32 %v2441_v7, %v2441_v7 }
 0x1de   : > { %v864_v12 = vmul.f32 0.044715, %v848_v8  ;;  %v849_v13 = vmul.f32 %v833_v9, %v2436_v4 }
 0x1df   : > { %v862_v14 = vmul.f32 0.044715, %v846_v10  ;;  %v847_v15 = vmul.f32 %v831_v11, %v2441_v7  ;;  %v2011_v16 = vpop.f32.mrb[4].mxu1 }
 0x1e0   : > { %v880_v17 = vadd.f32 %v864_v12, %v2428_v63  ;;  %v865_v19 = vmul.f32 0.044715, %v849_v13  ;;  %v2453_v23 = vadd.f32 %v2011_v16, %v2425_v61  ;;  %v783_v24 = vpop.f32.mrb[5].mxu1 }
 0x1e1   : > { %v878_v25 = vadd.f32 %v862_v14, %v2431_v1  ;;  %v863_v26 = vmul.f32 0.044715, %v847_v15  ;;  %v2457_v27 = vadd.f32 %v2425_v61, %v783_v24  ;;  %v2012_v29 = vpop.f32.mrb[6].mxu1 }
 0x1e2   : > { %v896_v33 = vmul.f32 0.7978846, %v880_v17  ;;  %v881_v34 = vadd.f32 %v865_v19, %v2436_v4  ;;  %v836_v35 = vmul.f32 %v2453_v23, %v2453_v23  ;;  %v2463_v36 = vadd.f32 %v2012_v29, %v2425_v61  ;;  %v786_v37 = vpop.f32.mrb[7].mxu1 }
 0x1e3   : > { %v894_v39 = vmul.f32 0.7978846, %v878_v25  ;;  %v879_v43 = vadd.f32 %v863_v26, %v2441_v7  ;;  %v834_v44 = vmul.f32 %v2457_v27, %v2457_v27  ;;  %v2469_v45 = vadd.f32 %v2425_v61, %v786_v37 }
 0x1e4   : > { %2126 = vtanh.f32 %v896_v33  ;;  %v897_v46 = vmul.f32 0.7978846, %v881_v34  ;;  %v852_v47 = vmul.f32 %v836_v35, %v2453_v23  ;;  %v837_v49 = vmul.f32 %v2463_v36, %v2463_v36 }
 0x1e5   : > { %2128 = vtanh.f32 %v894_v39  ;;  %v895_v53 = vmul.f32 0.7978846, %v879_v43  ;;  %v850_v54 = vmul.f32 %v834_v44, %v2457_v27  ;;  %v835_v55 = vmul.f32 %v2469_v45, %v2469_v45 }
 0x1e6   : > { %2130 = vtanh.f32 %v897_v46  ;;  %v868_v56 = vmul.f32 0.044715, %v852_v47  ;;  %v853_v57 = vmul.f32 %v837_v49, %v2463_v36 }
 0x1e7   : > { %2132 = vtanh.f32 %v895_v53  ;;  %v866_v58 = vmul.f32 0.044715, %v850_v54  ;;  %v851_v59 = vmul.f32 %v835_v55, %v2469_v45  ;;  %v2015_v60 = vpop.f32.mrb[8].mxu1 }
 0x1e8   : > { %v884_v62 = vadd.f32 %v868_v56, %v2453_v23  ;;  %v869_v0 = vmul.f32 0.044715, %v853_v57  ;;  %v2481_v2 = vadd.f32 %v2015_v60, %v2425_v61  ;;  %v799_v3 = vpop.f32.mrb[9].mxu1 }
 0x1e9   : > { %v882_v5 = vadd.f32 %v866_v58, %v2457_v27  ;;  %v867_v6 = vmul.f32 0.044715, %v851_v59  ;;  %v2485_v8 = vadd.f32 %v2425_v61, %v799_v3  ;;  %v2016_v9 = vpop.f32.mrb[10].mxu1 }
 0x1ea   : > { %v900_v10 = vmul.f32 0.7978846, %v884_v62  ;;  %v885_v11 = vadd.f32 %v869_v0, %v2463_v36  ;;  %v840_v12 = vmul.f32 %v2481_v2, %v2481_v2  ;;  %v2491_v13 = vadd.f32 %v2016_v9, %v2425_v61  ;;  %v802_v14 = vpop.f32.mrb[11].mxu1 }
 0x1eb   : > { %v898_v15 = vmul.f32 0.7978846, %v882_v5  ;;  %v883_v16 = vadd.f32 %v867_v6, %v2469_v45  ;;  %v838_v17 = vmul.f32 %v2485_v8, %v2485_v8  ;;  %v2497_v19 = vadd.f32 %v2425_v61, %v802_v14 }
 0x1ec   : > { %2134 = vtanh.f32 %v900_v10  ;;  %v901_v24 = vmul.f32 0.7978846, %v885_v11  ;;  %v856_v25 = vmul.f32 %v840_v12, %v2481_v2  ;;  %v841_v26 = vmul.f32 %v2491_v13, %v2491_v13 }
 0x1ed   : > { %2136 = vtanh.f32 %v898_v15  ;;  %v899_v29 = vmul.f32 0.7978846, %v883_v16  ;;  %v854_v33 = vmul.f32 %v838_v17, %v2485_v8  ;;  %v839_v34 = vmul.f32 %v2497_v19, %v2497_v19 }
 0x1ee   : > { %v2127_v35 = vpop.eup %2126  ;;  %2138 = vtanh.f32 %v901_v24  ;;  %v872_v37 = vmul.f32 0.044715, %v856_v25  ;;  %v857_v39 = vmul.f32 %v841_v26, %v2491_v13 }
 0x1ef   : > { %v2129_v43 = vpop.eup %2128  ;;  %v928_v44 = vadd.f32 1.0, %v2127_v35  ;;  %2140 = vtanh.f32 %v899_v29  ;;  %v870_v46 = vmul.f32 0.044715, %v854_v33  ;;  %v855_v47 = vmul.f32 %v839_v34, %v2497_v19  ;;  %v2019_v49 = vpop.f32.mrb[12].mxu1 }
 0x1f0   : > { %v2131_v53 = vpop.eup %2130  ;;  %v926_v54 = vadd.f32 1.0, %v2129_v43  ;;  %v888_v55 = vadd.f32 %v872_v37, %v2481_v2  ;;  %v873_v56 = vmul.f32 0.044715, %v857_v39  ;;  %v2509_v57 = vadd.f32 %v2019_v49, %v2425_v61  ;;  %v815_v58 = vpop.f32.mrb[13].mxu1 }
 0x1f1   : > { %v2133_v59 = vpop.eup %2132  ;;  %v944_v60 = vmul.f32 0.5, %v928_v44  ;;  %v929_v62 = vadd.f32 1.0, %v2131_v53  ;;  %v886_v0 = vadd.f32 %v870_v46, %v2485_v8  ;;  %v871_v3 = vmul.f32 0.044715, %v855_v47  ;;  %v2020_v5 = vpop.f32.mrb[14].mxu1 }
 0x1f2   : > { %v942_v6 = vmul.f32 0.5, %v926_v54  ;;  %v927_v9 = vadd.f32 1.0, %v2133_v59  ;;  %v904_v10 = vmul.f32 0.7978846, %v888_v55  ;;  %v889_v11 = vadd.f32 %v873_v56, %v2491_v13  ;;  %v818_v12 = vpop.f32.mrb[15].mxu1 }
 0x1f3   : > { %v960_v14 = vmul.f32 %v944_v60, %v2428_v63  ;;  %v945_v15 = vmul.f32 0.5, %v929_v62  ;;  %v902_v16 = vmul.f32 0.7978846, %v886_v0  ;;  %v887_v17 = vadd.f32 %v871_v3, %v2497_v19 }
 0x1f4   : > { %v958_v24 = vmul.f32 %v942_v6, %v2431_v1  ;;  %v943_v25 = vmul.f32 0.5, %v927_v9  ;;  %2142 = vtanh.f32 %v904_v10  ;;  %v905_v26 = vmul.f32 0.7978846, %v889_v11 }
 0x1f5   : > { %v961_v29 = vmul.f32 %v945_v15, %v2436_v4  ;;  %2144 = vtanh.f32 %v902_v16  ;;  %v903_v33 = vmul.f32 0.7978846, %v887_v17  ;;  %v844_v34 = vmul.f32 %v2509_v57, %v2509_v57 }
 0x1f6   : > { %v2135_v35 = vpop.eup %2134  ;;  %v959_v37 = vmul.f32 %v943_v25, %v2441_v7  ;;  %2146 = vtanh.f32 %v905_v26  ;;  %v2521_v63 = vadd.f32 %v2425_v61, %v815_v58  ;;  %v2524_v39 = vadd.f32 %v2020_v5, %v2425_v61 }
 0x1f7   : > { %v2137_v1 = vpop.eup %2136  ;;  %v975_v43 = vpack.c.bf16 %v961_v29, %v960_v14  ;;  %v932_v44 = vadd.f32 1.0, %v2135_v35  ;;  %2148 = vtanh.f32 %v903_v33  ;;  %v860_v4 = vmul.f32 %v844_v34, %v2509_v57 }
 0x1f8   : > { %v2139_v46 = vpop.eup %2138  ;;  %v930_v47 = vadd.f32 1.0, %v2137_v1  ;;  %v842_v49 = vmul.f32 %v2521_v63, %v2521_v63  ;;  %v845_v7 = vmul.f32 %v2524_v39, %v2524_v39  ;;  %v2532_v53 = vadd.f32 %v2425_v61, %v818_v12 }
 0x1f9   : > { %v2141_v54 = vpop.eup %2140  ;;  %v948_v55 = vmul.f32 0.5, %v932_v44  ;;  %v933_v56 = vadd.f32 1.0, %v2139_v46  ;;  %v876_v58 = vmul.f32 0.044715, %v860_v4  ;;  %v974_v59 = vpack.c.bf16 %v959_v37, %v958_v24 }
 0x1fa   : > { %v946_v60 = vmul.f32 0.5, %v930_v47  ;;  %v931_v62 = vadd.f32 1.0, %v2141_v54  ;;  %v858_v0 = vmul.f32 %v842_v49, %v2521_v63  ;;  %v861_v3 = vmul.f32 %v845_v7, %v2524_v39 }
 0x1fb   : > { %v949_v5 = vmul.f32 0.5, %v933_v56  ;;  %v892_v6 = vadd.f32 %v876_v58, %v2509_v57  ;;  %v843_v9 = vmul.f32 %v2532_v53, %v2532_v53  ;;  %2029 = vmatprep.mubr.msk.bf16.mxu1 %vm1021_vm3, %v974_v59  ;;  %v964_v12 = vmul.f32 %v948_v55, %v2453_v23 }
 0x1fc   : > { %v947_v61 = vmul.f32 0.5, %v931_v62  ;;  %v874_v10 = vmul.f32 0.044715, %v858_v0  ;;  %v877_v11 = vmul.f32 0.044715, %v861_v3  ;;  %2030 = vmatmul.mubr.msk.bf16.vlgmr.msra.gmra.mrb[16].mxu1 %vm1021_vm3, %v975_v43  ;;  %v962_v24 = vmul.f32 %v946_v60, %v2457_v27 }
 0x1fd   : > { %v965_v14 = vmul.f32 %v949_v5, %v2463_v36  ;;  %v908_v15 = vmul.f32 0.7978846, %v892_v6  ;;  %v859_v16 = vmul.f32 %v843_v9, %v2532_v53 }
 0x1fe   : > { %v2143_v17 = vpop.eup %2142  ;;  %v963_v25 = vmul.f32 %v947_v61, %v2469_v45  ;;  %v890_v26 = vadd.f32 %v874_v10, %v2521_v63  ;;  %v893_v29 = vadd.f32 %v877_v11, %v2524_v39 }
 0x1ff   : > { %v2145_v33 = vpop.eup %2144  ;;  %v936_v34 = vadd.f32 1.0, %v2143_v17  ;;  %2150 = vtanh.f32 %v908_v15  ;;  %v875_v35 = vmul.f32 0.044715, %v859_v16  ;;  %v977_v37 = vpack.c.bf16 %v965_v14, %v964_v12 }
 0x200   : > { %v2147_v23 = vpop.eup %2146  ;;  %v934_v1 = vadd.f32 1.0, %v2145_v33  ;;  %v906_v36 = vmul.f32 0.7978846, %v890_v26  ;;  %v909_v43 = vmul.f32 0.7978846, %v893_v29  ;;  %v976_v44 = vpack.c.bf16 %v963_v25, %v962_v24 }
 0x201   : > { %v2149_v4 = vpop.eup %2148  ;;  %v952_v46 = vmul.f32 0.5, %v936_v34  ;;  %v937_v47 = vadd.f32 1.0, %v2147_v23  ;;  %v891_v27 = vadd.f32 %v875_v35, %v2532_v53  ;;  %v2566_v26 = vld [vmem:[%s2752_s6] ss:$0 sm:$0xff] }
 0x202   : > { %v950_v45 = vmul.f32 0.5, %v934_v1  ;;  %v935_v49 = vadd.f32 1.0, %v2149_v4  ;;  %2152 = vtanh.f32 %v906_v36  ;;  %2033 = vmatprep.mubr.msk.bf16.mxu1 %vm1021_vm3, %v976_v44 }
 0x203   : > { %v953_v7 = vmul.f32 0.5, %v937_v47  ;;  %2154 = vtanh.f32 %v909_v43  ;;  %v907_v54 = vmul.f32 0.7978846, %v891_v27  ;;  %v968_v56 = vmul.f32 %v952_v46, %v2481_v2 }
 0x204   : > { %v951_v55 = vmul.f32 0.5, %v935_v49  ;;  %2034 = vmatmul.mubr.msk.bf16.gmra.mrb[20].mxu1 %vm1021_vm3, %v977_v37  ;;  %v966_v59 = vmul.f32 %v950_v45, %v2485_v8 }
 0x205   : > { %v969_v58 = vmul.f32 %v953_v7, %v2491_v13  ;;  %2156 = vtanh.f32 %v907_v54 }
 0x206   : > { %v967_v60 = vmul.f32 %v951_v55, %v2497_v19 }
 0x207   : > { %v979_v62 = vpack.c.bf16 %v969_v58, %v968_v56 }
 0x208   : > { %v978_v0 = vpack.c.bf16 %v967_v60, %v966_v59 }
 0x209   : > { %v2151_v3 = vpop.eup %2150 }
 0x20a   : > { %v940_v5 = vadd.f32 1.0, %v2151_v3  ;;  %2037 = vmatprep.mubr.msk.bf16.mxu1 %vm1021_vm3, %v978_v0 }
 0x20c   : > { %v2153_v6 = vpop.eup %2152  ;;  %2038 = vmatmul.mubr.msk.bf16.gmra.mrb[24].mxu1 %vm1021_vm3, %v979_v62  ;;  %v956_v10 = vmul.f32 0.5, %v940_v5 }
 0x20d   : > { %v2155_v9 = vpop.eup %2154  ;;  %v938_v61 = vadd.f32 1.0, %v2153_v6 }
 0x20e   : > { %v941_v2 = vadd.f32 1.0, %v2155_v9  ;;  %v972_v8 = vmul.f32 %v956_v10, %v2509_v57 }
 0x20f   : > { %v2157_v11 = vpop.eup %2156  ;;  %v954_v13 = vmul.f32 0.5, %v938_v61 }
 0x210   : > { %v957_v12 = vmul.f32 0.5, %v941_v2  ;;  %v939_v14 = vadd.f32 1.0, %v2157_v11 }
 0x211   : > { %v970_v16 = vmul.f32 %v954_v13, %v2521_v63 }
 0x212   : > { %v973_v19 = vmul.f32 %v957_v12, %v2524_v39  ;;  %v955_v15 = vmul.f32 0.5, %v939_v14 }
 0x214   : > { %v971_v17 = vmul.f32 %v955_v15, %v2532_v53  ;;  %v981_v24 = vpack.c.bf16 %v973_v19, %v972_v8 }
 0x216   : > { %v980_v25 = vpack.c.bf16 %v971_v17, %v970_v16 }
 0x218   : > { %2041 = vmatprep.mubr.msk.bf16.mxu1 %vm1021_vm3, %v980_v25 }
 0x219   : > { %2042 = vmatmul.mubr.msk.bf16.gmra.mrb[28].mxu1 %vm1021_vm3, %v981_v24 }
 0x2cf   : > { %v2031_v57 = vpop.f32.mrb[16].mxu1 }
 0x2d0   : > { %v1089_v39 = vadd.f32 %v2031_v57, %v2566_v26  ;;  %v1080_v29 = vpop.f32.mrb[17].mxu1 }
 0x2d1   : > { %v1081_v63 = vadd.f32 %v2566_v26, %v1080_v29  ;;  %v2032_v53 = vpop.f32.mrb[18].mxu1 }
 0x2d2   : > { %v1145_v33 = vadd.f32 %v1089_v39, %v2354_v22  ;;  %v1092_v34 = vadd.f32 %v2032_v53, %v2566_v26  ;;  %v1083_v35 = vpop.f32.mrb[19].mxu1 }
 0x2d3   : > { %v1143_v37 = vadd.f32 %v1081_v63, %v2350_v20  ;;  %v1084_v23 = vadd.f32 %v2566_v26, %v1083_v35 }
 0x2d4   : > { %v1906_v1 = vpack.c.bf16 %v1145_v33, %v1145_v33  ;;  %v1146_v36 = vadd.f32 %v1092_v34, %v2348_v18 }
 0x2d5   : > { %v1904_v43 = vpack.c.bf16 %v1143_v37, %v1143_v37  ;;  %v1144_v44 = vadd.f32 %v1084_v23, %v2352_v21 }
 0x2d6   : > { %1226 = vst.msk [vmem:[%s2306_s22 + $0x8] sm:$0xf] %vm1223_vm4, %v1906_v1  ;;  %v1160_v4 = vpack.c.bf16 %v1146_v36, %v1145_v33  ;;  %v1907_v22 = vpack.c.bf16 %v1146_v36, %v1146_v36 }
 0x2d7   : > { %1224 = vst.msk [vmem:[%s2306_s22] sm:$0xf] %vm1223_vm4, %v1904_v43  ;;  %v1159_v46 = vpack.c.bf16 %v1144_v44, %v1143_v37  ;;  %v1905_v47 = vpack.c.bf16 %v1144_v44, %v1144_v44  ;;  %v2035_v27 = vpop.f32.mrb[20].mxu1 }
 0x2d8   : > { %1227 = vst.msk [vmem:[%s2306_s22 + $0xc] sm:$0xf] %vm1223_vm4, %v1907_v22  ;;  %v1105_v20 = vadd.f32 %v2035_v27, %v2566_v26  ;;  %v1096_v45 = vpop.f32.mrb[21].mxu1 }
 0x2d9   : > { %1225 = vst.msk [vmem:[%s2306_s22 + $0x4] sm:$0xf] %vm1223_vm4, %v1905_v47  ;;  %v1097_v18 = vadd.f32 %v2566_v26, %v1096_v45  ;;  %v2036_v21 = vpop.f32.mrb[22].mxu1  ;;  %2049 = vmatprep.mubr.msk.bf16.mxu0 %vm708_vm2, %v1159_v46 }
 0x2da   : > { %v1149_v49 = vadd.f32 %v1105_v20, %v2368_v32  ;;  %v1108_v7 = vadd.f32 %v2036_v21, %v2566_v26  ;;  %v1099_v54 = vpop.f32.mrb[23].mxu1  ;;  %2050 = vmatmul.mubr.msk.bf16.vlgmr.msra.gmra.mrb[16].mxu0 %vm708_vm2, %v1160_v4 }
 0x2db   : > { %v1147_v55 = vadd.f32 %v1097_v18, %v2364_v30  ;;  %v1100_v56 = vadd.f32 %v2566_v26, %v1099_v54 }
 0x2dc   : > { %v1910_v58 = vpack.c.bf16 %v1149_v49, %v1149_v49  ;;  %v1150_v59 = vadd.f32 %v1108_v7, %v2362_v28 }
 0x2dd   : > { %v1908_v60 = vpack.c.bf16 %v1147_v55, %v1147_v55  ;;  %v1148_v62 = vadd.f32 %v1100_v56, %v2366_v31 }
 0x2de   : > { %1230 = vst.msk [vmem:[%s2306_s22 + $0x18] sm:$0xf] %vm1223_vm4, %v1910_v58  ;;  %v1162_v32 = vpack.c.bf16 %v1150_v59, %v1149_v49  ;;  %v1911_v0 = vpack.c.bf16 %v1150_v59, %v1150_v59 }
 0x2df   : > { %1228 = vst.msk [vmem:[%s2306_s22 + $0x10] sm:$0xf] %vm1223_vm4, %v1908_v60  ;;  %v1161_v3 = vpack.c.bf16 %v1148_v62, %v1147_v55  ;;  %v1909_v5 = vpack.c.bf16 %v1148_v62, %v1148_v62  ;;  %v2039_v6 = vpop.f32.mrb[24].mxu1 }
 0x2e0   : > { %1231 = vst.msk [vmem:[%s2306_s22 + $0x1c] sm:$0xf] %vm1223_vm4, %v1911_v0  ;;  %v1121_v30 = vadd.f32 %v2039_v6, %v2566_v26  ;;  %v1112_v9 = vpop.f32.mrb[25].mxu1 }
 0x2e1   : > { %1229 = vst.msk [vmem:[%s2306_s22 + $0x14] sm:$0xf] %vm1223_vm4, %v1909_v5  ;;  %v1113_v28 = vadd.f32 %v2566_v26, %v1112_v9  ;;  %v2040_v31 = vpop.f32.mrb[26].mxu1  ;;  %2053 = vmatprep.mubr.msk.bf16.mxu0 %vm708_vm2, %v1161_v3 }
 0x2e2   : > { %v1153_v61 = vadd.f32 %v1121_v30, %v2382_v42  ;;  %v1124_v10 = vadd.f32 %v2040_v31, %v2566_v26  ;;  %v1115_v2 = vpop.f32.mrb[27].mxu1  ;;  %2054 = vmatmul.mubr.msk.bf16.gmra.mrb[20].mxu0 %vm708_vm2, %v1162_v32 }
 0x2e3   : > { %v1151_v11 = vadd.f32 %v1113_v28, %v2378_v40  ;;  %v1116_v13 = vadd.f32 %v2566_v26, %v1115_v2 }
 0x2e4   : > { %v1914_v12 = vpack.c.bf16 %v1153_v61, %v1153_v61  ;;  %v1154_v14 = vadd.f32 %v1124_v10, %v2376_v38 }
 0x2e5   : > { %v1912_v8 = vpack.c.bf16 %v1151_v11, %v1151_v11  ;;  %v1152_v19 = vadd.f32 %v1116_v13, %v2380_v41 }
 0x2e6   : > { %1234 = vst.msk [vmem:[%s2306_s22 + $0x28] sm:$0xf] %vm1223_vm4, %v1914_v12  ;;  %v1164_v42 = vpack.c.bf16 %v1154_v14, %v1153_v61  ;;  %v1915_v15 = vpack.c.bf16 %v1154_v14, %v1154_v14 }
 0x2e7   : > { %1232 = vst.msk [vmem:[%s2306_s22 + $0x20] sm:$0xf] %vm1223_vm4, %v1912_v8  ;;  %v1163_v16 = vpack.c.bf16 %v1152_v19, %v1151_v11  ;;  %v1913_v17 = vpack.c.bf16 %v1152_v19, %v1152_v19 }
 0x2e8   : > { %1235 = vst.msk [vmem:[%s2306_s22 + $0x2c] sm:$0xf] %vm1223_vm4, %v1915_v15 }
 0x2e9   : > { %1233 = vst.msk [vmem:[%s2306_s22 + $0x24] sm:$0xf] %vm1223_vm4, %v1913_v17  ;;  %2057 = vmatprep.mubr.msk.bf16.mxu0 %vm708_vm2, %v1163_v16 }
 0x2ea   : > { %2058 = vmatmul.mubr.msk.bf16.gmra.mrb[24].mxu0 %vm708_vm2, %v1164_v42 }
 0x2ec   : > { %v2043_v38 = vpop.f32.mrb[28].mxu1 }
 0x2ed   : > { %v1137_v40 = vadd.f32 %v2043_v38, %v2566_v26  ;;  %v1128_v41 = vpop.f32.mrb[29].mxu1 }
 0x2ee   : > { %v1129_v24 = vadd.f32 %v2566_v26, %v1128_v41  ;;  %v2044_v25 = vpop.f32.mrb[30].mxu1 }
 0x2ef   : > { %v1157_v57 = vadd.f32 %v1137_v40, %v2396_v52  ;;  %v1140_v39 = vadd.f32 %v2044_v25, %v2566_v26  ;;  %v1131_v29 = vpop.f32.mrb[31].mxu1 }
 0x2f0   : > { %v1155_v63 = vadd.f32 %v1129_v24, %v2392_v50  ;;  %v1132_v53 = vadd.f32 %v2566_v26, %v1131_v29 }
 0x2f1   : > { %v1918_v33 = vpack.c.bf16 %v1157_v57, %v1157_v57  ;;  %v1158_v34 = vadd.f32 %v1140_v39, %v2390_v48  ;;  %v2643_v48 = vld [vmem:[%s2754_s8] ss:$0 sm:$0xff] }
 0x2f2   : > { %v1916_v35 = vpack.c.bf16 %v1155_v63, %v1155_v63  ;;  %v1156_v37 = vadd.f32 %v1132_v53, %v2394_v51 }
 0x2f3   : > { %1238 = vst.msk [vmem:[%s2306_s22 + $0x38] sm:$0xf] %vm1223_vm4, %v1918_v33  ;;  %v1166_v23 = vpack.c.bf16 %v1158_v34, %v1157_v57  ;;  %v1919_v1 = vpack.c.bf16 %v1158_v34, %v1158_v34 }
 0x2f4   : > { %1236 = vst.msk [vmem:[%s2306_s22 + $0x30] sm:$0xf] %vm1223_vm4, %v1916_v35  ;;  %v1165_v52 = vpack.c.bf16 %v1156_v37, %v1155_v63  ;;  %v1917_v36 = vpack.c.bf16 %v1156_v37, %v1156_v37 }
 0x2f5   : > { %1239 = vst.msk [vmem:[%s2306_s22 + $0x3c] sm:$0xf] %vm1223_vm4, %v1919_v1 }
 0x2f6   : > { %1237 = vst.msk [vmem:[%s2306_s22 + $0x34] sm:$0xf] %vm1223_vm4, %v1917_v36  ;;  %2061 = vmatprep.mubr.msk.bf16.mxu0 %vm708_vm2, %v1165_v52 }
 0x2f7   : > { %2062 = vmatmul.mubr.msk.bf16.gmra.mrb[28].mxu0 %vm708_vm2, %v1166_v23 }
 0x3ad   : > { %v2051_v50 = vpop.f32.mrb[16].mxu0 }
 0x3ae   : > { %v1330_v51 = vadd.f32 %v2051_v50, %v2643_v48  ;;  %v1321_v26 = vpop.f32.mrb[17].mxu0 }
 0x3af   : > { %v1322_v43 = vadd.f32 %v2643_v48, %v1321_v26  ;;  %v2052_v44 = vpop.f32.mrb[18].mxu0 }
 0x3b0   : > { %v1922_v4 = vpack.c.bf16 %v1330_v51, %v1330_v51  ;;  %v1333_v22 = vadd.f32 %v2052_v44, %v2643_v48  ;;  %v1324_v46 = vpop.f32.mrb[19].mxu0  ;;  %v1508_v45 = vmul.f32 %v1330_v51, %v1330_v51  ;;  %v1468_v58 = vsel %vm708_vm2, %v1330_v51, 0.0 }
 0x3b1   : > { %v1920_v47 = vpack.c.bf16 %v1322_v43, %v1322_v43  ;;  %v1506_v27 = vmul.f32 %v1322_v43, %v1322_v43  ;;  %v1325_v20 = vadd.f32 %v2643_v48, %v1324_v46  ;;  %v1465_v21 = vsel %vm708_vm2, %v1322_v43, 0.0 }
 0x3b2   : > { %1450 = vst.msk [vmem:[%s2311_s18 + $0x8] sm:$0xf] %vm1223_vm4, %v1922_v4  ;;  %v1923_v18 = vpack.c.bf16 %v1333_v22, %v1333_v22  ;;  %v1509_v55 = vmul.f32 %v1333_v22, %v1333_v22  ;;  %v1525_v6 = vsel %vm708_vm2, %v1508_v45, 0.0  ;;  %v1470_v28 = vsel %vm708_vm2, %v1333_v22, 0.0 }
 0x3b3   : > { %1448 = vst.msk [vmem:[%s2311_s18] sm:$0xf] %vm1223_vm4, %v1920_v47  ;;  %v1921_v49 = vpack.c.bf16 %v1325_v20, %v1325_v20  ;;  %v1466_v7 = vsel %vm708_vm2, %v1325_v20, 0.0  ;;  %v1507_v54 = vmul.f32 %v1325_v20, %v1325_v20  ;;  %v1522_v59 = vsel %vm708_vm2, %v1506_v27, 0.0 }
 0x3b4   : > { %1451 = vst.msk [vmem:[%s2311_s18 + $0xc] sm:$0xf] %vm1223_vm4, %v1923_v18  ;;  %v1467_v56 = vadd.f32 %v1466_v7, %v1465_v21  ;;  %v1527_v31 = vsel %vm708_vm2, %v1509_v55, 0.0 }
 0x3b5   : > { %1449 = vst.msk [vmem:[%s2311_s18 + $0x4] sm:$0xf] %vm1223_vm4, %v1921_v49  ;;  %v1523_v60 = vsel %vm708_vm2, %v1507_v54, 0.0  ;;  %v2055_v62 = vpop.f32.mrb[20].mxu0 }
 0x3b6   : > { %v1469_v32 = vadd.f32 %v1468_v58, %v1467_v56  ;;  %v1524_v0 = vadd.f32 %v1523_v60, %v1522_v59  ;;  %v1346_v3 = vadd.f32 %v2055_v62, %v2643_v48  ;;  %v1337_v5 = vpop.f32.mrb[21].mxu0 }
 0x3b7   : > { %v1338_v30 = vadd.f32 %v2643_v48, %v1337_v5  ;;  %v2056_v9 = vpop.f32.mrb[22].mxu0 }
 0x3b8   : > { %v1526_v61 = vadd.f32 %v1525_v6, %v1524_v0  ;;  %v1926_v10 = vpack.c.bf16 %v1346_v3, %v1346_v3  ;;  %v1340_v2 = vpop.f32.mrb[23].mxu0  ;;  %v1471_v13 = vadd.f32 %v1470_v28, %v1469_v32  ;;  %v1349_v19 = vadd.f32 %v2056_v9, %v2643_v48 }
 0x3b9   : > { %v1924_v11 = vpack.c.bf16 %v1338_v30, %v1338_v30  ;;  %v1472_v12 = vsel %vm708_vm2, %v1338_v30, 0.0  ;;  %v1510_v14 = vmul.f32 %v1338_v30, %v1338_v30  ;;  %v1341_v42 = vadd.f32 %v2643_v48, %v1340_v2 }
 0x3ba   : > { %1454 = vst.msk [vmem:[%s2311_s18 + $0x18] sm:$0xf] %vm1223_vm4, %v1926_v10  ;;  %v1528_v8 = vadd.f32 %v1527_v31, %v1526_v61  ;;  %v1473_v15 = vadd.f32 %v1472_v12, %v1471_v13  ;;  %v1512_v17 = vmul.f32 %v1346_v3, %v1346_v3  ;;  %v1927_v40 = vpack.c.bf16 %v1349_v19, %v1349_v19 }
 0x3bb   : > { %1452 = vst.msk [vmem:[%s2311_s18 + $0x10] sm:$0xf] %vm1223_vm4, %v1924_v11  ;;  %v1529_v16 = vsel %vm708_vm2, %v1510_v14, 0.0  ;;  %v1925_v41 = vpack.c.bf16 %v1341_v42, %v1341_v42  ;;  %v1474_v24 = vsel %vm708_vm2, %v1341_v42, 0.0  ;;  %v1511_v25 = vmul.f32 %v1341_v42, %v1341_v42 }
 0x3bc   : > { %v1530_v38 = vadd.f32 %v1529_v16, %v1528_v8  ;;  %1455 = vst.msk [vmem:[%s2311_s18 + $0x1c] sm:$0xf] %vm1223_vm4, %v1927_v40  ;;  %v1475_v39 = vadd.f32 %v1474_v24, %v1473_v15  ;;  %v1476_v53 = vsel %vm708_vm2, %v1346_v3, 0.0  ;;  %v1513_v33 = vmul.f32 %v1349_v19, %v1349_v19 }
 0x3bd   : > { %v2059_v57 = vpop.f32.mrb[24].mxu0  ;;  %1453 = vst.msk [vmem:[%s2311_s18 + $0x14] sm:$0xf] %vm1223_vm4, %v1925_v41  ;;  %v1531_v34 = vsel %vm708_vm2, %v1511_v25, 0.0  ;;  %v1533_v23 = vsel %vm708_vm2, %v1512_v17, 0.0  ;;  %v1478_v51 = vsel %vm708_vm2, %v1349_v19, 0.0 }
 0x3be   : > { %v1362_v29 = vadd.f32 %v2059_v57, %v2643_v48  ;;  %v1353_v63 = vpop.f32.mrb[25].mxu0  ;;  %v1477_v1 = vadd.f32 %v1476_v53, %v1475_v39  ;;  %v1532_v52 = vadd.f32 %v1531_v34, %v1530_v38  ;;  %v1535_v27 = vsel %vm708_vm2, %v1513_v33, 0.0 }
 0x3bf   : > { %v1354_v35 = vadd.f32 %v2643_v48, %v1353_v63  ;;  %v2060_v37 = vpop.f32.mrb[26].mxu0 }
 0x3c0   : > { %v1930_v36 = vpack.c.bf16 %v1362_v29, %v1362_v29  ;;  %v1356_v50 = vpop.f32.mrb[27].mxu0  ;;  %v1534_v4 = vadd.f32 %v1533_v23, %v1532_v52  ;;  %v1479_v22 = vadd.f32 %v1478_v51, %v1477_v1  ;;  %v1365_v46 = vadd.f32 %v2060_v37, %v2643_v48 }
 0x3c1   : > { %v1928_v26 = vpack.c.bf16 %v1354_v35, %v1354_v35  ;;  %v1480_v43 = vsel %vm708_vm2, %v1354_v35, 0.0  ;;  %v1514_v44 = vmul.f32 %v1354_v35, %v1354_v35  ;;  %v1357_v47 = vadd.f32 %v2643_v48, %v1356_v50 }
 0x3c2   : > { %1458 = vst.msk [vmem:[%s2311_s18 + $0x28] sm:$0xf] %vm1223_vm4, %v1930_v36  ;;  %v1481_v45 = vadd.f32 %v1480_v43, %v1479_v22  ;;  %v1536_v18 = vadd.f32 %v1535_v27, %v1534_v4  ;;  %v1931_v21 = vpack.c.bf16 %v1365_v46, %v1365_v46  ;;  %v1516_v49 = vmul.f32 %v1362_v29, %v1362_v29 }
 0x3c3   : > { %1456 = vst.msk [vmem:[%s2311_s18 + $0x20] sm:$0xf] %vm1223_vm4, %v1928_v26  ;;  %v1537_v20 = vsel %vm708_vm2, %v1514_v44, 0.0  ;;  %v1929_v7 = vpack.c.bf16 %v1357_v47, %v1357_v47  ;;  %v1482_v54 = vsel %vm708_vm2, %v1357_v47, 0.0  ;;  %v1515_v55 = vmul.f32 %v1357_v47, %v1357_v47 }
 0x3c4   : > { %v1538_v56 = vadd.f32 %v1537_v20, %v1536_v18  ;;  %1459 = vst.msk [vmem:[%s2311_s18 + $0x2c] sm:$0xf] %vm1223_vm4, %v1931_v21  ;;  %v1483_v58 = vadd.f32 %v1482_v54, %v1481_v45  ;;  %v1484_v59 = vsel %vm708_vm2, %v1362_v29, 0.0  ;;  %v1517_v60 = vmul.f32 %v1365_v46, %v1365_v46  ;;  %v1505_v18 = vld [vmem:[#allocation3] sm:$0x1] }
 0x3c5   : > { %1457 = vst.msk [vmem:[%s2311_s18 + $0x24] sm:$0xf] %vm1223_vm4, %v1929_v7  ;;  %v1539_v62 = vsel %vm708_vm2, %v1515_v55, 0.0  ;;  %v1541_v3 = vsel %vm708_vm2, %v1516_v49, 0.0  ;;  %v1486_v5 = vsel %vm708_vm2, %v1365_v46, 0.0  ;;  %v1565_v7 = vlaneseq (!%p1898_p8) }
 0x3c6   : > { %v1485_v32 = vadd.f32 %v1484_v59, %v1483_v58  ;;  %v1540_v0 = vadd.f32 %v1539_v62, %v1538_v56  ;;  %v1543_v28 = vsel %vm708_vm2, %v1517_v60, 0.0  ;;  %v1464_v46 = vld [vmem:[#allocation2] sm:$0x1]  ;;  %v2199_v62 = vmov (!%p1898_p8), 0.0  }
 0x3c7   : > { %v1566_v54 = vand.u32 (!%p1898_p8), 127, %v1565_v7  ;;  %v1568_v55 = vshrl.u32 (!%p1898_p8), %v1565_v7, 7 }
 0x3c8   : > { %v1542_v6 = vadd.f32 %v1541_v3, %v1540_v0  ;;  %v1487_v9 = vadd.f32 %v1486_v5, %v1485_v32 }
 0x3c9   : > { %v1569_v56 = vmul.u32 (!%p1898_p8), 8, %v1568_v55 }
 0x3ca   : > { %v2063_v30 = vpop.f32.mrb[28].mxu0  ;;  %v1544_v2 = vadd.f32 %v1543_v28, %v1542_v6 }
 0x3cb   : > { %v1378_v31 = vadd.f32 %v2063_v30, %v2643_v48  ;;  %v1369_v61 = vpop.f32.mrb[29].mxu0  ;;  %vm1570_vm6 = vcmp.ge.s32.totalorder (!%p1898_p8), %v1566_v54, %v1569_v56  ;;  %v1571_v58 = vadd.s32 (!%p1898_p8), 8, %v1569_v56 }
 0x3cc   : > { %v1370_v10 = vadd.f32 %v2643_v48, %v1369_v61  ;;  %v2064_v11 = vpop.f32.mrb[30].mxu0 }
 0x3cd   : > { %v1934_v13 = vpack.c.bf16 %v1378_v31, %v1378_v31  ;;  %v1381_v12 = vadd.f32 %v2064_v11, %v2643_v48  ;;  %v1372_v14 = vpop.f32.mrb[31].mxu0  ;;  %v1520_v24 = vmul.f32 %v1378_v31, %v1378_v31  ;;  %v1492_v29 = vsel %vm708_vm2, %v1378_v31, 0.0 }
 0x3ce   : > { %v1932_v8 = vpack.c.bf16 %v1370_v10, %v1370_v10  ;;  %v1488_v19 = vsel %vm708_vm2, %v1370_v10, 0.0  ;;  %v1518_v42 = vmul.f32 %v1370_v10, %v1370_v10  ;;  %v1373_v15 = vadd.f32 %v2643_v48, %v1372_v14 }
 0x3cf   : > { %1462 = vst.msk [vmem:[%s2311_s18 + $0x38] sm:$0xf] %vm1223_vm4, %v1934_v13  ;;  %v1489_v16 = vadd.f32 %v1488_v19, %v1487_v9  ;;  %v1935_v17 = vpack.c.bf16 %v1381_v12, %v1381_v12  ;;  %v1521_v48 = vmul.f32 %v1381_v12, %v1381_v12  ;;  %v1494_v33 = vsel %vm708_vm2, %v1381_v12, 0.0 }
 0x3d0   : > { %1460 = vst.msk [vmem:[%s2311_s18 + $0x30] sm:$0xf] %vm1223_vm4, %v1932_v8  ;;  %v1545_v38 = vsel %vm708_vm2, %v1518_v42, 0.0  ;;  %v1933_v40 = vpack.c.bf16 %v1373_v15, %v1373_v15  ;;  %v1490_v41 = vsel %vm708_vm2, %v1373_v15, 0.0  ;;  %v1519_v39 = vmul.f32 %v1373_v15, %v1373_v15 }
 0x3d1   : > { %v1546_v25 = vadd.f32 %v1545_v38, %v1544_v2  ;;  %1463 = vst.msk [vmem:[%s2311_s18 + $0x3c] sm:$0xf] %vm1223_vm4, %v1935_v17  ;;  %v1491_v57 = vadd.f32 %v1490_v41, %v1489_v16  ;;  %v1549_v35 = vsel %vm708_vm2, %v1520_v24, 0.0  ;;  %v1551_v1 = vsel %vm708_vm2, %v1521_v48, 0.0 }
 0x3d2   : > { %1461 = vst.msk [vmem:[%s2311_s18 + $0x34] sm:$0xf] %vm1223_vm4, %v1933_v40  ;;  %v1547_v53 = vsel %vm708_vm2, %v1519_v39, 0.0  ;;  %vm1572_vm7 = vcmp.lt.s32.totalorder (!%p1898_p8), %v1566_v54, %v1571_v58 }
 0x3d3   : > { %v1493_v63 = vadd.f32 %v1492_v29, %v1491_v57  ;;  %v1548_v34 = vadd.f32 %v1547_v53, %v1546_v25  ;;  %vm1573_vm8 = vmand (!%p1898_p8), %vm1570_vm6, %vm1572_vm7 }
 0x3d4   : > { %v1899_v32 = vsel (!%p1898_p8), %vm1573_vm8, 1.0, %v2199_v62 }
 0x3d5   : > { %v1495_v37 = vadd.f32 %v1494_v33, %v1493_v63  ;;  %v1550_v23 = vadd.f32 %v1549_v35, %v1548_v34 }
 0x3d7   : > { %v1496_v52 = vrot.slane %v1495_v37, 4  ;;  %v1552_v36 = vadd.f32 %v1551_v1, %v1550_v23 }
 0x3d9   : > { %v1497_v50 = vadd.f32 %v1496_v52, %v1495_v37  ;;  %v1553_v51 = vrot.slane %v1552_v36, 4 }
 0x3db   : > { %v1498_v26 = vrot.slane %v1497_v50, 2  ;;  %v1554_v43 = vadd.f32 %v1553_v51, %v1552_v36 }
 0x3dd   : > { %v1499_v44 = vadd.f32 %v1498_v26, %v1497_v50  ;;  %v1555_v4 = vrot.slane %v1554_v43, 2 }
 0x3df   : > { %v1500_v22 = vrot.slane %v1499_v44, 1  ;;  %v1556_v47 = vadd.f32 %v1555_v4, %v1554_v43 }
 0x3e1   : > { %v1501_v27 = vadd.f32 %v1500_v22, %v1499_v44  ;;  %v1557_v20 = vrot.slane %v1556_v47, 1  ;;  %1564 = sbr.rel (%p1898_p8) target bundleno = 1177 (0x499), region = 64 }
 0x3e3   : > { %v1502_v45 = vadd.f32 %v1501_v27, %v1464_v46  ;;  %v1558_v21 = vadd.f32 %v1557_v20, %v1556_v47 }
 0x3e5   : > { %1504 = vst.msk [vmem:[#allocation2] sm:$0x1] %vm1503_vm5, %v1502_v45  ;;  %v1559_v49 = vadd.f32 %v1558_v21, %v1505_v18 }
 0x3e7   : > { %1560 = vst.msk [vmem:[#allocation3] sm:$0x1] %vm1503_vm5, %v1559_v49 }
 0x3ec   : > { %v1900_v59 = vld [vmem:[#allocation2] ss:$0 sm:$0xff] }
 0x3ed   : > { %v1583_v0 = vmul.f32 %v1900_v59, %v1899_v32 }
 0x3ee   : > { %v1901_v60 = vld [vmem:[#allocation3] ss:$0 sm:$0xff] }
 0x3ef   : > { %v1596_v3 = vmul.f32 %v1901_v60, %v1899_v32  ;;  %v1584_v5 = vsel %vm1223_vm4, %v1583_v0, 0.0 }
 0x3f0   : > { %1585 = vadd.xlane.f32.xlu0 %v1584_v5 }
 0x3f1   : > { %v1597_v6 = vsel %vm1223_vm4, %v1596_v3, 0.0 }
 0x3f4   : > { %1598 = vadd.xlane.f32.xlu0 %v1597_v6 }
 0x47d   : > { %v1586_v30 = vpop.xlane.xlu0 %1585 }
 0x47e   : > { %v1588_v9 = vmul.f32 0.00048828125, %v1586_v30 }
 0x480   : > { %v1604_v28 = vmul.f32 %v1899_v32, %v1588_v9  ;;  %v1601_v61 = vmul.f32 %v1588_v9, %v1588_v9 }
 0x481   : > { %v1599_v31 = vpop.xlane.xlu0 %1598 }
 0x482   : > { %v1605_v10 = vsel %vm1223_vm4, %v1604_v28, 0.0  ;;  %v1600_v2 = vmul.f32 0.00048828125, %v1599_v31 }
 0x483   : > { %v1606_v11 = vrot.slane %v1605_v10, 4 }
 0x484   : > { %v1602_v13 = vsub.f32 %v1600_v2, %v1601_v61 }
 0x485   : > { %v1607_v12 = vadd.f32 %v1606_v11, %v1605_v10 }
 0x486   : > { %v1603_v14 = vmax.f32 %v1602_v13, 0.0 }
 0x487   : > { %v1608_v19 = vrot.slane %v1607_v12, 2 }
 0x488   : > { %v1612_v8 = vmul.f32 %v1899_v32, %v1603_v14 }
 0x489   : > { %v1609_v16 = vadd.f32 %v1608_v19, %v1607_v12 }
 0x48a   : > { %v1613_v42 = vsel %vm1223_vm4, %v1612_v8, 0.0 }
 0x48b   : > { %v1614_v15 = vrot.slane %v1613_v42, 4  ;;  %v1610_v40 = vrot.slane %v1609_v16, 1 }
 0x48d   : > { %v1615_v17 = vadd.f32 %v1614_v15, %v1613_v42  ;;  %v1611_v25 = vadd.f32 %v1610_v40, %v1609_v16 }
 0x48f   : > { %v1616_v38 = vrot.slane %v1615_v17, 2 }
 0x491   : > { %v1617_v41 = vadd.f32 %v1616_v38, %v1615_v17 }
 0x493   : > { %v1618_v24 = vrot.slane %v1617_v41, 1 }
 0x495   : > { %v1619_v57 = vadd.f32 %v1618_v24, %v1617_v41 }
 0x497   : > { %v1621_v39 = vsel %vm1620_vm9, %v1611_v25, %v1619_v57 }
 0x498   : > { %1623 = vst.msk [vmem:[%s2296_s30] sm:$0x3] %vm1622_vm10, %v1621_v39 }
 0x499 PF: > { %s22_s21 = sadd.s32 1, %s2196_s21   ;;  %s2764_s17 = sld [smem:[#allocation4_spill]] }
 0x49a   : > { %p19_p9 = scmp.ge.s32.totalorder %s22_s21, 6   ;;  %s2765_s18 = sld [smem:[#allocation5_spill]] }
 0x49b   : > { %s2766_s19 = sld [smem:[#allocation6_spill]]  ;;  %s2767_s20 = sld [smem:[#allocation7_spill]] }
 0x49c   :  { %21 = sbr.rel (!%p19_p9) target bundleno = 3 (0x3), region = 118 }

// kernel: a_call__.7
= control target key start
LH: loop header
LB: loop body
LE: loop exit
PB: predicated region body
PF: predicated region fallthrough
CT: control target
= control target key end

     0   :  { %s708_s15 = smov 0   ;;  %s710_s16 = smov 0   ;;  %s857_s0 = inlined_call_operand.vmem [shape: bf16[2,256,32], index: 0, kind: input, shape index: {}]   ;;  %s858_s1 = inlined_call_operand.vmem [shape: f32[2,2,32], index: 1, kind: input, shape index: {}]   ;;  %s859_s2 = inlined_call_operand.vmem [shape: f32[1,32], index: 2, kind: input, shape index: {}]   ;;  %s860_s3 = inlined_call_operand.vmem [shape: f32[1,32], index: 3, kind: input, shape index: {}]   ;;  %s861_s4 = inlined_call_operand.vmem [shape: f32[2,32,256], index: 4, kind: output, shape index: {}]  }
   0x1   :  { %s712_s17 = smov 0   ;;  %s714_s18 = smov 0  }
   0x2   :  { %s716_s19 = smov 0   ;;  %s718_s20 = smov 0  }
   0x3   :  { %s720_s21 = smov 0  }
   0x4 LB: > { %s23_s22 = sadd.s32 1, %s672_s19  ;;  %s26_s23 = sadd.s32 1, %s676_s20  ;;  %s680_s21 = sphi %s720_s21, %s14_s21   ;;  %s676_s20 = sphi %s718_s20, %s868_s20   ;;  %s672_s19 = sphi %s716_s19, %s867_s19   ;;  %s668_s18 = sphi %s714_s18, %s866_s18   ;;  %s664_s17 = sphi %s712_s17, %s865_s17   ;;  %s660_s16 = sphi %s710_s16, %s864_s16   ;;  %s656_s15 = sphi %s708_s15, %s863_s15  }
   0x5   : > { %p24_p0 = scmp.ge.s32.totalorder %s23_s22, 2  ;;  %s513_s24 = sadd.s32 4294967295, %s680_s21  }
   0x6   : > { %p141_p1 = scmp.ne.s32.totalorder %s660_s16, %s656_s15  ;;  %p142_p2 = scmp.eq.s32.totalorder %s513_s24, 3 }
   0x7   : > { %s870_s22 = smov (%p24_p0, %s23_s22), 0  ;;  %s872_s23 = smov (!%p24_p0, %s26_s23), %s676_s20 }
   0x8   : > { %s127_s25 = ssub.s32 %s672_s19, %s870_s22  ;;  %p28_p3 = scmp.ge.s32.totalorder %s872_s23, 2 }
   0x9   : > { %p517_p4 = scmp.ge.s32.totalorder %s680_s21, 1  ;;  %p754_p5 = por %p142_p2, %p141_p1 }
   0xa   : > { %p192_p6 = scmp.lt.s32.totalorder %s680_s21, 5  ;;  %s874_s23 = smov (%p28_p3, %s872_s23), 0 }
   0xb   : > { %s126_s27 = ssub.s32 %s676_s20, %s874_s23  ;;  %s131_s29 = sadd.s32 1, %s660_s16 }
   0xc   : > { %p193_p7 = pnand %p517_p4, %p192_p6  ;;  %s128_s28 = sor.u32 %s127_s25, %s126_s27 }
   0xd   : > { %p129_p8 = scmp.eq.s32.totalorder %s128_s28, 0  ;;  %p226_p9 = scmp.lt.s32.totalorder (!%p193_p7), %s668_s18, 1  ;;  %v682_v2 = vmov (!%p193_p7), 1966171168   ;;  %v279_v4 = vlaneseq (!%p193_p7)  ;;  %v272_v12 = vld [vmem:[%s859_s2] sm:$0x1] (!%p193_p7) }
   0xe   : > { %196 = sbr.rel (%p193_p7) target bundleno = 205 (0xcd), region = 36  ;;  %s519_s6 = sshll.u32 (!%p193_p7), %s664_s17, 4  ;;  %v277_v3 = vunpack.c.l.s4 (!%p193_p7), %v682_v2  ;;  %v293_v17 = vld [vmem:[%s860_s3] sm:$0x1] (!%p193_p7) }
   0xf   : > { %s765_s30 = scalar_select %p129_p8, %s660_s16, %s131_s29  }
  0x10   : > { %p228_p10 = scmp.lt.s32.totalorder (!%p193_p7), %s519_s6, 31  ;;  %v278_v5 = vunpack.c.0.s8 (!%p193_p7), %v277_v3  ;;  %v280_v6 = vshrl.u32 (!%p193_p7), %v279_v4, 7 }
  0x12   : > { %v281_v7 = vsub.s32 (!%p193_p7), %v278_v5, %v280_v6  ;;  %v299_v14 = vsub.s32 (!%p193_p7), 0, %v280_v6 }
  0x15   : > { %s227_s5 = scalar_select %p226_p9, %s668_s18, 1 }
  0x16   : > { %s876_s6 = smov (!%p228_p10, %s519_s6), 31  ;;  %s524_s9 = sshll.u32 (%p754_p5), %s668_s18, 3 }
  0x17   : > { %s522_s7 = sshll.u32 %s227_s5, 1  ;;  %s520_s11 = sshll.u32 %s227_s5, 5 }
  0x18   : > { %s238_s10 = scalar_lea.vmem %s858_s1, %s522_s7  ;;  %s231_s12 = sadd.s32 %s520_s11, %s876_s6 }
  0x19   : > { %v271_v0 = vld [vmem:[%s238_s10] sm:$0x3]  ;;  %s521_s13 = sshll.u32 %s231_s12, 2  ;;  %s222_s6 = sand.u32 1, %s656_s15  }
  0x1a   : > { %v273_v1 = vadd.f32 1e-05, %v271_v0  ;;  %s776_s25 = scalar_lea.vmem %s857_s0, %s521_s13  ;;  %s518_s7 = sshll.u32 %s222_s6, 5 }
  0x1b   : > { %v529_v11 = vld [vmem:[%s776_s25] sm:$0xff]   ;;  %v560_v21 = vld [vmem:[%s776_s25 + $0x8] sm:$0xff]   ;;  %v561_v31 = vld [vmem:[%s776_s25 + $0x10] sm:$0xff]   ;;  %s224_s8 = scalar_lea.vmem [#allocation2], %s518_s7  ;;  %s384_s10 = sadd.s32 (%p754_p5), %s664_s17, %s524_s9 }
  0x1c   : > { %624 = vrsqrt.f32 %v273_v1  ;;  %v530_v15 = vunpack.c.l.bf16 %v529_v11  ;;  %v531_v20 = vunpack.c.h.bf16 %v529_v11  ;;  %v534_v26 = vunpack.c.l.bf16 %v560_v21  ;;  %v562_v38 = vld [vmem:[%s776_s25 + $0x18] sm:$0xff]   ;;  %v563_v45 = vld [vmem:[%s776_s25 + $0x20] sm:$0xff]   ;;  %v564_v52 = vld [vmem:[%s776_s25 + $0x28] sm:$0xff]   ;;  %s525_s15 = sshll.u32 (%p754_p5), %s384_s10, 3 }
  0x1d   : > { %v535_v30 = vunpack.c.h.bf16 %v560_v21  ;;  %v538_v34 = vunpack.c.l.bf16 %v561_v31  ;;  %v539_v37 = vunpack.c.h.bf16 %v561_v31  ;;  %v542_v41 = vunpack.c.l.bf16 %v562_v38  ;;  %v565_v59 = vld [vmem:[%s776_s25 + $0x30] sm:$0xff]   ;;  %v566_v2 = vld [vmem:[%s776_s25 + $0x38] sm:$0xff]   ;;  %s386_s13 = scalar_lea.vmem (%p754_p5), %s861_s4, %s525_s15 }
  0x1e   : > { %v543_v44 = vunpack.c.h.bf16 %v562_v38  ;;  %v546_v48 = vunpack.c.l.bf16 %v563_v45  ;;  %v547_v51 = vunpack.c.h.bf16 %v563_v45  ;;  %v550_v55 = vunpack.c.l.bf16 %v564_v52 }
  0x1f   : > { %v551_v58 = vunpack.c.h.bf16 %v564_v52  ;;  %v554_v62 = vunpack.c.l.bf16 %v565_v59  ;;  %v555_v1 = vunpack.c.h.bf16 %v565_v59  ;;  %v558_v5 = vunpack.c.l.bf16 %v566_v2 }
  0x26   : > { %v625_v8 = vpop.eup %624 }
  0x27   : > { %v282_v9 = vrot.slane %v625_v8, %v281_v7  ;;  %v559_v8 = vunpack.c.h.bf16 %v566_v2 }
  0x29   : > { %v283_v10 = vcombine.high %v282_v9, %v282_v9 }
  0x2b   : > { %v290_v13 = vrot.slane %v283_v10, %v281_v7 }
  0x2d   : > { %v292_v16 = vmul.f32 %v290_v13, %v272_v12 }
  0x2f   : > { %v294_v18 = vmul.f32 %v292_v16, %v271_v0  ;;  %v785_v19 = vrot.slane %v292_v16, %v299_v14 }
  0x31   : > { %v295_v22 = vsub.f32 %v293_v17, %v294_v18  ;;  %v302_v23 = vmul.f32 %v530_v15, %v785_v19  ;;  %v303_v25 = vmul.f32 %v531_v20, %v785_v19  ;;  %v304_v29 = vmul.f32 %v534_v26, %v785_v19 }
  0x32   : > { %v305_v33 = vmul.f32 %v535_v30, %v785_v19  ;;  %v306_v36 = vmul.f32 %v538_v34, %v785_v19  ;;  %v307_v40 = vmul.f32 %v539_v37, %v785_v19  ;;  %v308_v43 = vmul.f32 %v542_v41, %v785_v19 }
  0x33   : > { %v789_v24 = vrot.slane %v295_v22, %v299_v14  ;;  %v309_v47 = vmul.f32 %v543_v44, %v785_v19  ;;  %v310_v50 = vmul.f32 %v546_v48, %v785_v19  ;;  %v311_v54 = vmul.f32 %v547_v51, %v785_v19 }
  0x34   : > { %v312_v57 = vmul.f32 %v550_v55, %v785_v19  ;;  %v313_v61 = vmul.f32 %v551_v58, %v785_v19  ;;  %v314_v0 = vmul.f32 %v554_v62, %v785_v19  ;;  %v315_v4 = vmul.f32 %v555_v1, %v785_v19 }
  0x35   : > { %v324_v27 = vadd.f32 %v789_v24, %v302_v23  ;;  %v325_v28 = vadd.f32 %v789_v24, %v303_v25  ;;  %v326_v32 = vadd.f32 %v789_v24, %v304_v29  ;;  %v327_v35 = vadd.f32 %v789_v24, %v305_v33 }
  0x36   : > { %v328_v39 = vadd.f32 %v789_v24, %v306_v36  ;;  %v329_v42 = vadd.f32 %v789_v24, %v307_v40  ;;  %v330_v46 = vadd.f32 %v789_v24, %v308_v43  ;;  %v331_v49 = vadd.f32 %v789_v24, %v309_v47 }
  0x37   : > { %340 = vxpose.xlu0.b32.start [1/16] (narrow) %v324_v27, 32  ;;  %v332_v53 = vadd.f32 %v789_v24, %v310_v50  ;;  %v333_v56 = vadd.f32 %v789_v24, %v311_v54  ;;  %v334_v60 = vadd.f32 %v789_v24, %v312_v57  ;;  %v335_v63 = vadd.f32 %v789_v24, %v313_v61 }
  0x38   : > { %v336_v3 = vadd.f32 %v789_v24, %v314_v0  ;;  %v337_v6 = vadd.f32 %v789_v24, %v315_v4  ;;  %v316_v7 = vmul.f32 %v558_v5, %v785_v19  ;;  %v317_v10 = vmul.f32 %v559_v8, %v785_v19 }
  0x3a   : > { %v338_v9 = vadd.f32 %v789_v24, %v316_v7  ;;  %v339_v11 = vadd.f32 %v789_v24, %v317_v10 }
  0x3b   : > { %341 = vxpose.xlu0.b32.cont [2/16] (narrow) %v325_v28, 32 }
  0x3f   : > { %342 = vxpose.xlu0.b32.cont [3/16] (narrow) %v326_v32, 32 }
  0x43   : > { %343 = vxpose.xlu0.b32.cont [4/16] (narrow) %v327_v35, 32 }
  0x47   : > { %344 = vxpose.xlu0.b32.cont [5/16] (narrow) %v328_v39, 32 }
  0x4b   : > { %345 = vxpose.xlu0.b32.cont [6/16] (narrow) %v329_v42, 32 }
  0x4f   : > { %346 = vxpose.xlu0.b32.cont [7/16] (narrow) %v330_v46, 32 }
  0x53   : > { %347 = vxpose.xlu0.b32.cont [8/16] (narrow) %v331_v49, 32 }
  0x57   : > { %348 = vxpose.xlu0.b32.cont [9/16] (narrow) %v332_v53, 32 }
  0x5b   : > { %349 = vxpose.xlu0.b32.cont [10/16] (narrow) %v333_v56, 32 }
  0x5f   : > { %350 = vxpose.xlu0.b32.cont [11/16] (narrow) %v334_v60, 32 }
  0x63   : > { %351 = vxpose.xlu0.b32.cont [12/16] (narrow) %v335_v63, 32 }
  0x67   : > { %352 = vxpose.xlu0.b32.cont [13/16] (narrow) %v336_v3, 32 }
  0x6b   : > { %353 = vxpose.xlu0.b32.cont [14/16] (narrow) %v337_v6, 32 }
  0x6f   : > { %354 = vxpose.xlu0.b32.cont [15/16] (narrow) %v338_v9, 32 }
  0x73   : > { %355 = vxpose.xlu0.b32.end [16/16] (narrow) %v339_v11, 32 }
  0xb7   : > { %v356_v12 = vpop.trf.xlu0 }
  0xb8   : > { %372 = vst [vmem:[%s224_s8] sm:$0xff] %v356_v12 }
  0xbb   : > { %v357_v13 = vpop.trf.xlu0 }
  0xbc   : > { %373 = vst [vmem:[%s224_s8 + $0x8] sm:$0xff] %v357_v13 }
  0xbe   : > { %382 = sbr.rel (!%p754_p5) target bundleno = 205 (0xcd), region = 40 }
  0xbf   : > { %v358_v14 = vpop.trf.xlu0  ;;  %v420_v16 = vld [vmem:[%s224_s8] sm:$0xff] (%p754_p5) }
  0xc0   : > { %374 = vst [vmem:[%s224_s8 + $0x10] sm:$0xff] %v358_v14  ;;  %421 = vst [vmem:[%s386_s13] sm:$0xff] (%p754_p5), %v420_v16 }
  0xc3   : > { %v359_v15 = vpop.trf.xlu0  ;;  %v422_v17 = vld [vmem:[%s224_s8 + $0x8] sm:$0xff] (%p754_p5) }
  0xc4   : > { %375 = vst [vmem:[%s224_s8 + $0x18] sm:$0xff] %v359_v15  ;;  %423 = vst [vmem:[%s386_s13 + $0x10] sm:$0xff] (%p754_p5), %v422_v17 }
  0xc7   : > { %v424_v18 = vld [vmem:[%s224_s8 + $0x10] sm:$0xff] }
  0xc8   : > { %425 = vst [vmem:[%s386_s13 + $0x20] sm:$0xff] %v424_v18 }
  0xcb   : > { %v426_v19 = vld [vmem:[%s224_s8 + $0x18] sm:$0xff] }
  0xcc   : > { %427 = vst [vmem:[%s386_s13 + $0x30] sm:$0xff] %v426_v19 }
  0xcd PF: > { %s14_s21 = sadd.s32 1, %s680_s21   ;;  %s863_s15 = smov %s660_s16 }
  0xce   : > { %p11_p11 = scmp.ge.s32.totalorder %s14_s21, 6   ;;  %s864_s16 = smov %s765_s30 }
  0xcf   : > { %s865_s17 = smov %s672_s19  ;;  %s866_s18 = smov %s676_s20 }
  0xd0   : > { %s867_s19 = smov %s870_s22  ;;  %s868_s20 = smov %s874_s23 }
  0xd1   :  { %13 = sbr.rel (!%p11_p11) target bundleno = 4 (0x4), region = 107 }

// kernel: a_call__.9
= control target key start
LH: loop header
LB: loop body
LE: loop exit
PB: predicated region body
PF: predicated region fallthrough
CT: control target
= control target key end

     0   :  { %s563_s15 = smov 0   ;;  %s565_s16 = smov 0   ;;  %s619_s0 = inlined_call_operand.vmem [shape: bf16[2,64,32], index: 0, kind: input, shape index: {}]   ;;  %s620_s1 = inlined_call_operand.vmem [shape: f32[2,2,32], index: 1, kind: input, shape index: {}]   ;;  %s621_s2 = inlined_call_operand.vmem [shape: f32[1,32], index: 2, kind: input, shape index: {}]   ;;  %s622_s3 = inlined_call_operand.vmem [shape: f32[1,32], index: 3, kind: input, shape index: {}]   ;;  %s623_s4 = inlined_call_operand.vmem [shape: f32[2,32,64], index: 4, kind: output, shape index: {}]  }
   0x1   :  { %s567_s17 = smov 0  }
   0x2 LB: > { %s26_s18 = sadd.s32 1, %s531_s16  ;;  %p456_p0 = scmp.ge.s32.totalorder %s535_s17, 1  ;;  %s535_s17 = sphi %s567_s17, %s14_s17   ;;  %s531_s16 = sphi %s565_s16, %s625_s16   ;;  %s527_s15 = sphi %s563_s15, %s624_s15  }
   0x3   : > { %p28_p1 = scmp.ge.s32.totalorder %s26_s18, 2  ;;  %p192_p2 = scmp.lt.s32.totalorder %s535_s17, 3 }
   0x5   : > { %s627_s18 = smov (%p28_p1, %s26_s18), 0  ;;  %p193_p3 = pnand %p456_p0, %p192_p2 }
   0x6   : > { %p230_p4 = scmp.lt.s32.totalorder (!%p193_p3), %s527_s15, 1  ;;  %v537_v2 = vmov (!%p193_p3), 1966171168   ;;  %v275_v4 = vlaneseq (!%p193_p3)  ;;  %v268_v12 = vld [vmem:[%s621_s2] sm:$0x1] (!%p193_p3)  ;;  %vm352_vm0 = vcmask (!%p193_p3), 523264  }
   0x7   : > { %196 = sbr.rel (%p193_p3) target bundleno = 189 (0xbd), region = 36  ;;  %v273_v3 = vunpack.c.l.s4 (!%p193_p3), %v537_v2  ;;  %v289_v17 = vld [vmem:[%s622_s3] sm:$0x1] (!%p193_p3) }
   0x8   : > { %v276_v6 = vshrl.u32 (!%p193_p3), %v275_v4, 7 }
   0x9   : > { %v274_v5 = vunpack.c.0.s8 (!%p193_p3), %v273_v3 }
   0xa   : > { %v295_v14 = vsub.s32 (!%p193_p3), 0, %v276_v6 }
   0xb   : > { %v277_v7 = vsub.s32 (!%p193_p3), %v274_v5, %v276_v6 }
   0xe   : > { %s629_s15 = smov (!%p230_p4, %s527_s15), 1 }
   0xf   : > { %s459_s19 = sshll.u32 %s629_s15, 1  ;;  %s464_s23 = sshll.u32 %s629_s15, 5 }
  0x10   : > { %s242_s22 = scalar_lea.vmem %s620_s1, %s459_s19  ;;  %s593_s26 = scalar_lea.vmem %s619_s0, %s464_s23 }
  0x11   : > { %v267_v0 = vld [vmem:[%s242_s22] sm:$0x3]  ;;  %v482_v21 = vld [vmem:[%s593_s26 + $0x8] sm:$0xff]   ;;  %v483_v31 = vld [vmem:[%s593_s26 + $0x10] sm:$0xff]   ;;  %s250_s7 = scalar_lea.vmem %s623_s4, %s464_s23 }
  0x12   : > { %v269_v1 = vadd.f32 1e-05, %v267_v0  ;;  %v467_v11 = vld [vmem:[%s593_s26] sm:$0xff]   ;;  %v472_v26 = vunpack.c.l.bf16 %v482_v21  ;;  %v473_v30 = vunpack.c.h.bf16 %v482_v21  ;;  %v476_v34 = vunpack.c.l.bf16 %v483_v31  ;;  %v484_v38 = vld [vmem:[%s593_s26 + $0x18] sm:$0xff]  }
  0x13   : > { %v468_v15 = vunpack.c.l.bf16 %v467_v11  ;;  %v469_v20 = vunpack.c.h.bf16 %v467_v11  ;;  %v477_v37 = vunpack.c.h.bf16 %v483_v31  ;;  %v480_v41 = vunpack.c.l.bf16 %v484_v38 }
  0x14   : > { %511 = vrsqrt.f32 %v269_v1  ;;  %v481_v44 = vunpack.c.h.bf16 %v484_v38 }
  0x1e   : > { %v512_v8 = vpop.eup %511 }
  0x1f   : > { %v278_v9 = vrot.slane %v512_v8, %v277_v7 }
  0x21   : > { %v279_v10 = vcombine.high %v278_v9, %v278_v9 }
  0x23   : > { %v286_v13 = vrot.slane %v279_v10, %v277_v7 }
  0x25   : > { %v288_v16 = vmul.f32 %v286_v13, %v268_v12 }
  0x27   : > { %v290_v18 = vmul.f32 %v288_v16, %v267_v0  ;;  %v296_v19 = vrot.slane %v288_v16, %v295_v14 }
  0x29   : > { %v291_v22 = vsub.f32 %v289_v17, %v290_v18  ;;  %v298_v23 = vmul.f32 %v468_v15, %v296_v19  ;;  %v299_v25 = vmul.f32 %v469_v20, %v296_v19  ;;  %v300_v29 = vmul.f32 %v472_v26, %v296_v19 }
  0x2a   : > { %v301_v33 = vmul.f32 %v473_v30, %v296_v19  ;;  %v302_v36 = vmul.f32 %v476_v34, %v296_v19  ;;  %v303_v40 = vmul.f32 %v477_v37, %v296_v19  ;;  %v304_v43 = vmul.f32 %v480_v41, %v296_v19 }
  0x2b   : > { %v310_v24 = vrot.slane %v291_v22, %v295_v14  ;;  %v305_v46 = vmul.f32 %v481_v44, %v296_v19 }
  0x2d   : > { %v312_v27 = vadd.f32 %v310_v24, %v298_v23  ;;  %v313_v28 = vadd.f32 %v310_v24, %v299_v25  ;;  %v314_v32 = vadd.f32 %v310_v24, %v300_v29  ;;  %v315_v35 = vadd.f32 %v310_v24, %v301_v33 }
  0x2e   : > { %v316_v39 = vadd.f32 %v310_v24, %v302_v36  ;;  %v317_v42 = vadd.f32 %v310_v24, %v303_v40  ;;  %v318_v45 = vadd.f32 %v310_v24, %v304_v43  ;;  %v319_v47 = vadd.f32 %v310_v24, %v305_v46 }
  0x2f   : > { %320 = vxpose.xlu0.b32.start [1/8] (short) (narrow) %v312_v27, 32 }
  0x33   : > { %321 = vxpose.xlu0.b32.cont [2/8] (short) (narrow) %v313_v28, 32 }
  0x37   : > { %322 = vxpose.xlu0.b32.cont [3/8] (short) (narrow) %v314_v32, 32 }
  0x3b   : > { %323 = vxpose.xlu0.b32.cont [4/8] (short) (narrow) %v315_v35, 32 }
  0x3f   : > { %324 = vxpose.xlu0.b32.cont [5/8] (short) (narrow) %v316_v39, 32 }
  0x43   : > { %325 = vxpose.xlu0.b32.cont [6/8] (short) (narrow) %v317_v42, 32 }
  0x47   : > { %326 = vxpose.xlu0.b32.cont [7/8] (short) (narrow) %v318_v45, 32 }
  0x4b   : > { %327 = vxpose.xlu0.b32.end [8/8] (short) (narrow) %v319_v47, 32 }
  0xaf   : > { %v336_v48 = vpop.trf.xlu0 }
  0xb0   : > { %353 = vst.msk [vmem:[%s250_s7] sm:$0xff] %vm352_vm0, %v336_v48 }
  0xb3   : > { %v337_v49 = vpop.trf.xlu0 }
  0xb4   : > { %354 = vst.msk [vmem:[%s250_s7 + $0x8] sm:$0xff] %vm352_vm0, %v337_v49 }
  0xb7   : > { %v338_v50 = vpop.trf.xlu0 }
  0xb8   : > { %355 = vst.msk [vmem:[%s250_s7 + $0x10] sm:$0xff] %vm352_vm0, %v338_v50 }
  0xbb   : > { %v339_v51 = vpop.trf.xlu0 }
  0xbc   : > { %356 = vst.msk [vmem:[%s250_s7 + $0x18] sm:$0xff] %vm352_vm0, %v339_v51 }
  0xbd PF: > { %s14_s17 = sadd.s32 1, %s535_s17   ;;  %s624_s15 = smov %s531_s16 }
  0xbe   : > { %p11_p5 = scmp.ge.s32.totalorder %s14_s17, 4   ;;  %s625_s16 = smov %s627_s18 }
  0xc0   :  { %13 = sbr.rel (!%p11_p5) target bundleno = 2 (0x2), region = 69 }

// kernel: a_call__.8
= control target key start
LH: loop header
LB: loop body
LE: loop exit
PB: predicated region body
PF: predicated region fallthrough
CT: control target
= control target key end

     0   :  { %s1829_s17 = smov 0   ;;  %s1831_s18 = smov 0   ;;  %s2126_s0 = inlined_call_operand.vmem [shape: bf16[2,64,128], index: 0, kind: input, shape index: {}]   ;;  %s2127_s1 = inlined_call_operand.vmem [shape: bf16[128,64], index: 1, kind: input, shape index: {}]   ;;  %s2128_s2 = inlined_call_operand.vmem [shape: f32[1,64], index: 2, kind: input, shape index: {}, may-alias: {2,6}]   ;;  %s2129_s3 = inlined_call_operand.vmem [shape: bf16[64,128], index: 3, kind: input, shape index: {}]   ;;  %s2130_s4 = inlined_call_operand.vmem [shape: f32[1,128], index: 4, kind: input, shape index: {}]   ;;  %s2131_s5 = inlined_call_operand.vmem [shape: bf16[128,64], index: 5, kind: input, shape index: {}]   ;;  %s2132_s6 = inlined_call_operand.vmem [shape: f32[1,64], index: 6, kind: input, shape index: {}, may-alias: {2,6}]   ;;  %s2133_s7 = inlined_call_operand.vmem [shape: bf16[64,32], index: 7, kind: input, shape index: {}]   ;;  %s2134_s8 = inlined_call_operand.vmem [shape: f32[1,32], index: 8, kind: input, shape index: {}]   ;;  %s2135_s9 = inlined_call_operand.vmem [shape: bf16[2,64,64], index: 9, kind: output, shape index: {0}]   ;;  %s2136_s10 = inlined_call_operand.vmem [shape: bf16[2,64,32], index: 10, kind: output, shape index: {1}]   ;;  %s2137_s11 = inlined_call_operand.vmem [shape: f32[2,2,32], index: 11, kind: output, shape index: {2}]  }
   0x1   :  { %s1833_s19 = smov 0  }
   0x2 LB: > { %s34_s20 = sadd.s32 1, %s1762_s18  ;;  %p1467_p0 = scmp.ge.s32.totalorder %s1766_s19, 1  ;;  %s1766_s19 = sphi %s1833_s19, %s22_s19   ;;  %s1762_s18 = sphi %s1831_s18, %s2139_s18   ;;  %s1758_s17 = sphi %s1829_s17, %s2138_s17  }
   0x3   : > { %p36_p1 = scmp.ge.s32.totalorder %s34_s20, 2  ;;  %p365_p2 = scmp.lt.s32.totalorder %s1766_s19, 3 }
   0x5   : > { %s2141_s20 = smov (%p36_p1, %s34_s20), 0  ;;  %p366_p3 = pnand %p1467_p0, %p365_p2 }
   0x6   : > { %v1700_v0 = vld [vmem:[%s2127_s1] sm:$0xff] (!%p366_p3)   ;;  %p427_p4 = scmp.lt.s32.totalorder (!%p366_p3), %s1758_s17, 1  ;;  %v1701_v1 = vld [vmem:[%s2127_s1 + $0x8] sm:$0xff] (!%p366_p3)   ;;  %v1702_v2 = vld [vmem:[%s2127_s1 + $0x10] sm:$0xff] (!%p366_p3)   ;;  %vm679_vm0 = vcmask (!%p366_p3), 523264   ;;  %vm1009_vm1 = vcmask (!%p366_p3), 519168  }
   0x7   : > { %369 = sbr.rel (%p366_p3) target bundleno = 1154 (0x482), region = 56  ;;  %1595 = vmatprep.subr.bf16.mxu0 (!%p366_p3), %v1700_v0  ;;  %v1703_v3 = vld [vmem:[%s2127_s1 + $0x18] sm:$0xff] (!%p366_p3)   ;;  %v1704_v5 = vld [vmem:[%s2127_s1 + $0x20] sm:$0xff] (!%p366_p3)   ;;  %v1713_v7 = vld [vmem:[%s2129_s3 + $0x8] sm:$0xff] (!%p366_p3)   ;;  %vm465_vm2 = vcmask (!%p366_p3), 253952   ;;  %vm1166_vm3 = vcmask (!%p366_p3), 257024  }
   0x8   : > { %1596 = vmatpush3.bf16.msra.mxu0 (!%p366_p3), %v1700_v0  ;;  %v1712_v6 = vld [vmem:[%s2129_s3] sm:$0xff] (!%p366_p3)   ;;  %v1705_v8 = vld [vmem:[%s2127_s1 + $0x28] sm:$0xff] (!%p366_p3)   ;;  %v1706_v9 = vld [vmem:[%s2127_s1 + $0x30] sm:$0xff] (!%p366_p3)   ;;  %vm1176_vm4 = vcmask (!%p366_p3), 261120   ;;  %vm1291_vm8 = vcmask (!%p366_p3), 1040384   ;;  %vm1293_vm9 = vcmask (!%p366_p3), 254976  }
   0x9   : > { %1597 = vmatprep.subr.bf16.mxu0 (!%p366_p3), %v1701_v1  ;;  %1619 = vmatprep.subr.bf16.mxu1 (!%p366_p3), %v1712_v6  ;;  %v1707_v10 = vld [vmem:[%s2127_s1 + $0x38] sm:$0xff] (!%p366_p3)   ;;  %v1714_v14 = vld [vmem:[%s2129_s3 + $0x10] sm:$0xff] (!%p366_p3)   ;;  %v1475_v17 = vld [vmem:[%s2128_s2] ss:$0 sm:$0xff] (!%p366_p3) }
   0xa   : > { %1620 = vmatpush3.bf16.msra.mxu1 (!%p366_p3), %v1712_v6  ;;  %v1715_v15 = vld [vmem:[%s2129_s3 + $0x18] sm:$0xff] (!%p366_p3)   ;;  %v1716_v37 = vld [vmem:[%s2131_s5] sm:$0xff] (!%p366_p3)   ;;  %v1717_v38 = vld [vmem:[%s2131_s5 + $0x8] sm:$0xff] (!%p366_p3)  }
   0xb   : > { %1621 = vmatprep.subr.bf16.mxu1 (!%p366_p3), %v1713_v7  ;;  %v1718_v39 = vld [vmem:[%s2131_s5 + $0x10] sm:$0xff] (!%p366_p3)   ;;  %v1719_v40 = vld [vmem:[%s2131_s5 + $0x18] sm:$0xff] (!%p366_p3)   ;;  %v1720_v41 = vld [vmem:[%s2131_s5 + $0x20] sm:$0xff] (!%p366_p3)  }
   0xc   : > { %1598 = vmatpush3.bf16.msra.mxu0 (!%p366_p3), %v1701_v1  ;;  %v1721_v42 = vld [vmem:[%s2131_s5 + $0x28] sm:$0xff] (!%p366_p3)   ;;  %v1722_v43 = vld [vmem:[%s2131_s5 + $0x30] sm:$0xff] (!%p366_p3)   ;;  %v1723_v44 = vld [vmem:[%s2131_s5 + $0x38] sm:$0xff] (!%p366_p3)  }
   0xd   : > { %1599 = vmatprep.subr.bf16.mxu0 (!%p366_p3), %v1702_v2  ;;  %v1724_v45 = vld [vmem:[%s2133_s7] sm:$0xff] (!%p366_p3)   ;;  %v1725_v46 = vld [vmem:[%s2133_s7 + $0x8] sm:$0xff] (!%p366_p3)  }
   0xe   : > { %s2143_s17 = smov (!%p427_p4, %s1758_s17), 1  ;;  %1622 = vmatpush3.bf16.msra.mxu1 %v1713_v7  ;;  %v1488_v47 = vld [vmem:[%s2130_s4] ss:$0 sm:$0xff] }
   0xf   : > { %s1859_s27 = sshll.u32 %s2143_s17, 5  ;;  %1623 = vmatprep.subr.bf16.mxu1 %v1714_v14 }
  0x10   : > { %s1865_s30 = scalar_lea.vmem %s2126_s0, %s1859_s27  ;;  %1600 = vmatpush3.bf16.msra.mxu0 %v1702_v2  ;;  %s2032_s24 = scalar_lea.vmem %s2135_s9, %s1859_s27 }
  0x11   : > { %v1708_v4 = vld [vmem:[%s1865_s30] sm:$0xff]   ;;  %1601 = vmatprep.subr.bf16.mxu0 %v1703_v3  ;;  %v1709_v11 = vld [vmem:[%s1865_s30 + $0x8] sm:$0xff]   ;;  %v1710_v12 = vld [vmem:[%s1865_s30 + $0x10] sm:$0xff]   ;;  %s2072_s12 = scalar_lea.vmem %s2136_s10, %s1859_s27  ;;  %s1474_s27 = sshll.u32 %s2143_s17, 1 }
  0x12   : > { %1611 = vmatprep.mubr.bf16.mxu0 %v1708_v4  ;;  %v1711_v13 = vld [vmem:[%s1865_s30 + $0x18] sm:$0xff]   ;;  %1624 = vmatpush3.bf16.msra.mxu1 %v1714_v14  ;;  %s459_s15 = scalar_lea.vmem %s2137_s11, %s1474_s27 }
  0x13   : > { %1625 = vmatprep.subr.bf16.mxu1 %v1715_v15 }
  0x14   : > { %1602 = vmatpush3.bf16.msra.mxu0 %v1703_v3 }
  0x15   : > { %1603 = vmatprep.subr.bf16.mxu0 %v1704_v5 }
  0x16   : > { %1626 = vmatpush3.bf16.msra.mxu1 %v1715_v15 }
  0x17   : > { %1635 = vmatprep.subr.bf16.mxu1 %v1716_v37 }
  0x18   : > { %1604 = vmatpush3.bf16.msra.mxu0 %v1704_v5 }
  0x19   : > { %1605 = vmatprep.subr.bf16.mxu0 %v1705_v8 }
  0x1c   : > { %1606 = vmatpush3.bf16.msra.mxu0 %v1705_v8 }
  0x1d   : > { %1607 = vmatprep.subr.bf16.mxu0 %v1706_v9 }
  0x20   : > { %1608 = vmatpush3.bf16.msra.mxu0 %v1706_v9 }
  0x21   : > { %1609 = vmatprep.subr.bf16.mxu0 %v1707_v10 }
  0x24   : > { %1610 = vmatpush3.bf16.msra.mxu0 %v1707_v10 }
  0x25   : > { %1659 = vmatprep.subr.bf16.mxu0 %v1724_v45 }
  0x27   : > { %1612 = vmatmul.mubr.bf16.vlgmr.msra.gmra.mrb[0].mxu0 %v1709_v11 }
  0x28   : > { %1615 = vmatprep.mubr.bf16.mxu0 %v1710_v12  ;;  %1660 = vmatpush3.bf16.msra.mxu0 %v1724_v45 }
  0x29   : > { %1661 = vmatprep.subr.bf16.mxu0 %v1725_v46 }
  0x2c   : > { %1662 = vmatpush3.bf16.msra.mxu0 %v1725_v46 }
  0x2f   : > { %1616 = vmatmul.mubr.bf16.gmra.mrb[4].mxu0 %v1711_v13 }
  0xfa   : > { %v1613_v16 = vpop.f32.mrb[0].mxu0 }
  0xfb   : > { %v605_v18 = vpop.f32.mrb[1].mxu0  ;;  %v1907_v24 = vadd.f32 %v1613_v16, %v1475_v17 }
  0xfc   : > { %v1614_v19 = vpop.f32.mrb[2].mxu0  ;;  %v1903_v22 = vadd.f32 %v1475_v17, %v605_v18 }
  0xfd   : > { %v1901_v20 = vadd.f32 %v1614_v19, %v1475_v17  ;;  %v608_v21 = vpop.f32.mrb[3].mxu0 }
  0xfe   : > { %v1905_v23 = vadd.f32 %v1475_v17, %v608_v21 }
  0xff   : > { %v637_v26 = vpack.c.bf16 %v1901_v20, %v1907_v24 }
 0x100   : > { %v636_v25 = vpack.c.bf16 %v1905_v23, %v1903_v22 }
 0x102   : > { %v1617_v27 = vpop.f32.mrb[4].mxu0  ;;  %1627 = vmatprep.mubr.msk.bf16.mxu1 %vm679_vm0, %v636_v25 }
 0x103   : > { %v621_v28 = vpop.f32.mrb[5].mxu0  ;;  %1628 = vmatmul.mubr.msk.bf16.vlgmr.msra.gmra.mrb[0].mxu1 %vm679_vm0, %v637_v26  ;;  %v1921_v34 = vadd.f32 %v1617_v27, %v1475_v17 }
 0x104   : > { %v1618_v29 = vpop.f32.mrb[6].mxu0  ;;  %v1917_v32 = vadd.f32 %v1475_v17, %v621_v28  ;;  %1636 = vmatpush3.bf16.msra.mxu1 %v1716_v37 }
 0x105   : > { %v1915_v30 = vadd.f32 %v1618_v29, %v1475_v17  ;;  %v624_v31 = vpop.f32.mrb[7].mxu0  ;;  %1637 = vmatprep.subr.bf16.mxu1 %v1717_v38 }
 0x106   : > { %v1919_v33 = vadd.f32 %v1475_v17, %v624_v31 }
 0x107   : > { %v639_v36 = vpack.c.bf16 %v1915_v30, %v1921_v34 }
 0x108   : > { %v638_v35 = vpack.c.bf16 %v1919_v33, %v1917_v32  ;;  %1638 = vmatpush3.bf16.msra.mxu1 %v1717_v38 }
 0x109   : > { %1639 = vmatprep.subr.bf16.mxu1 %v1718_v39 }
 0x10a   : > { %1631 = vmatprep.mubr.msk.bf16.mxu1 %vm679_vm0, %v638_v35 }
 0x10b   : > { %1632 = vmatmul.mubr.msk.bf16.gmra.mrb[4].mxu1 %vm679_vm0, %v639_v36 }
 0x10c   : > { %1640 = vmatpush3.bf16.msra.mxu1 %v1718_v39 }
 0x10d   : > { %1641 = vmatprep.subr.bf16.mxu1 %v1719_v40 }
 0x110   : > { %1642 = vmatpush3.bf16.msra.mxu1 %v1719_v40 }
 0x111   : > { %1643 = vmatprep.subr.bf16.mxu1 %v1720_v41 }
 0x114   : > { %1644 = vmatpush3.bf16.msra.mxu1 %v1720_v41 }
 0x115   : > { %1645 = vmatprep.subr.bf16.mxu1 %v1721_v42 }
 0x118   : > { %1646 = vmatpush3.bf16.msra.mxu1 %v1721_v42 }
 0x119   : > { %1647 = vmatprep.subr.bf16.mxu1 %v1722_v43 }
 0x11c   : > { %1648 = vmatpush3.bf16.msra.mxu1 %v1722_v43 }
 0x11d   : > { %1649 = vmatprep.subr.bf16.mxu1 %v1723_v44 }
 0x120   : > { %1650 = vmatpush3.bf16.msra.mxu1 %v1723_v44 }
 0x1d6   : > { %v1629_v48 = vpop.f32.mrb[0].mxu1 }
 0x1d7   : > { %v1962_v49 = vadd.f32 %v1629_v48, %v1488_v47  ;;  %v726_v50 = vpop.f32.mrb[1].mxu1 }
 0x1d8   : > { %v1964_v51 = vadd.f32 %v1488_v47, %v726_v50  ;;  %v1630_v52 = vpop.f32.mrb[2].mxu1 }
 0x1d9   : > { %v759_v53 = vmul.f32 %v1962_v49, %v1962_v49  ;;  %v1968_v54 = vadd.f32 %v1630_v52, %v1488_v47  ;;  %v729_v55 = vpop.f32.mrb[3].mxu1 }
 0x1da   : > { %v757_v56 = vmul.f32 %v1964_v51, %v1964_v51  ;;  %v1972_v57 = vadd.f32 %v1488_v47, %v729_v55 }
 0x1db   : > { %v767_v58 = vmul.f32 %v759_v53, %v1962_v49  ;;  %v760_v59 = vmul.f32 %v1968_v54, %v1968_v54 }
 0x1dc   : > { %v765_v60 = vmul.f32 %v757_v56, %v1964_v51  ;;  %v758_v61 = vmul.f32 %v1972_v57, %v1972_v57 }
 0x1dd   : > { %v775_v62 = vmul.f32 0.044715, %v767_v58  ;;  %v768_v63 = vmul.f32 %v760_v59, %v1968_v54 }
 0x1de   : > { %v773_v0 = vmul.f32 0.044715, %v765_v60  ;;  %v766_v1 = vmul.f32 %v758_v61, %v1972_v57  ;;  %v1633_v2 = vpop.f32.mrb[4].mxu1 }
 0x1df   : > { %v783_v3 = vadd.f32 %v775_v62, %v1962_v49  ;;  %v776_v4 = vmul.f32 0.044715, %v768_v63  ;;  %v1983_v5 = vadd.f32 %v1633_v2, %v1488_v47  ;;  %v742_v6 = vpop.f32.mrb[5].mxu1 }
 0x1e0   : > { %v781_v7 = vadd.f32 %v773_v0, %v1964_v51  ;;  %v774_v8 = vmul.f32 0.044715, %v766_v1  ;;  %v1986_v9 = vadd.f32 %v1488_v47, %v742_v6  ;;  %v1634_v10 = vpop.f32.mrb[6].mxu1 }
 0x1e1   : > { %v791_v11 = vmul.f32 0.7978846, %v783_v3  ;;  %v784_v12 = vadd.f32 %v776_v4, %v1968_v54  ;;  %v763_v13 = vmul.f32 %v1983_v5, %v1983_v5  ;;  %v1991_v14 = vadd.f32 %v1634_v10, %v1488_v47  ;;  %v745_v15 = vpop.f32.mrb[7].mxu1 }
 0x1e2   : > { %v789_v16 = vmul.f32 0.7978846, %v781_v7  ;;  %v782_v17 = vadd.f32 %v774_v8, %v1972_v57  ;;  %v761_v18 = vmul.f32 %v1986_v9, %v1986_v9  ;;  %v1996_v19 = vadd.f32 %v1488_v47, %v745_v15 }
 0x1e3   : > { %1728 = vtanh.f32 %v791_v11  ;;  %v792_v21 = vmul.f32 0.7978846, %v784_v12  ;;  %v771_v25 = vmul.f32 %v763_v13, %v1983_v5  ;;  %v764_v26 = vmul.f32 %v1991_v14, %v1991_v14 }
 0x1e4   : > { %1730 = vtanh.f32 %v789_v16  ;;  %v790_v27 = vmul.f32 0.7978846, %v782_v17  ;;  %v769_v28 = vmul.f32 %v761_v18, %v1986_v9  ;;  %v762_v29 = vmul.f32 %v1996_v19, %v1996_v19 }
 0x1e5   : > { %1732 = vtanh.f32 %v792_v21  ;;  %v779_v31 = vmul.f32 0.044715, %v771_v25  ;;  %v772_v35 = vmul.f32 %v764_v26, %v1991_v14 }
 0x1e6   : > { %1734 = vtanh.f32 %v790_v27  ;;  %v777_v36 = vmul.f32 0.044715, %v769_v28  ;;  %v770_v37 = vmul.f32 %v762_v29, %v1996_v19  ;;  %v1726_v28 = vld [vmem:[%s2133_s7 + $0x10] sm:$0xff]  }
 0x1e7   : > { %v787_v38 = vadd.f32 %v779_v31, %v1983_v5  ;;  %v780_v39 = vmul.f32 0.044715, %v772_v35  ;;  %1663 = vmatprep.subr.bf16.mxu0 %v1726_v28 }
 0x1e8   : > { %v785_v40 = vadd.f32 %v777_v36, %v1986_v9  ;;  %v778_v41 = vmul.f32 0.044715, %v770_v37  ;;  %1664 = vmatpush3.bf16.msra.mxu0 %v1726_v28 }
 0x1e9   : > { %v795_v42 = vmul.f32 0.7978846, %v787_v38  ;;  %v788_v43 = vadd.f32 %v780_v39, %v1991_v14 }
 0x1ea   : > { %v793_v44 = vmul.f32 0.7978846, %v785_v40  ;;  %v786_v45 = vadd.f32 %v778_v41, %v1996_v19 }
 0x1eb   : > { %1736 = vtanh.f32 %v795_v42  ;;  %v796_v46 = vmul.f32 0.7978846, %v788_v43 }
 0x1ec   : > { %1738 = vtanh.f32 %v793_v44  ;;  %v794_v47 = vmul.f32 0.7978846, %v786_v45 }
 0x1ed   : > { %v1729_v48 = vpop.eup %1728  ;;  %1740 = vtanh.f32 %v796_v46 }
 0x1ee   : > { %v1731_v50 = vpop.eup %1730  ;;  %v807_v52 = vadd.f32 1.0, %v1729_v48  ;;  %1742 = vtanh.f32 %v794_v47 }
 0x1ef   : > { %v1733_v53 = vpop.eup %1732  ;;  %v805_v55 = vadd.f32 1.0, %v1731_v50 }
 0x1f0   : > { %v1735_v56 = vpop.eup %1734  ;;  %v815_v58 = vmul.f32 0.5, %v807_v52  ;;  %v808_v59 = vadd.f32 1.0, %v1733_v53 }
 0x1f1   : > { %v806_v60 = vadd.f32 1.0, %v1735_v56  ;;  %v813_v61 = vmul.f32 0.5, %v805_v55 }
 0x1f2   : > { %v816_v62 = vmul.f32 0.5, %v808_v59  ;;  %v823_v0 = vmul.f32 %v815_v58, %v1962_v49 }
 0x1f3   : > { %v814_v63 = vmul.f32 0.5, %v806_v60  ;;  %v821_v3 = vmul.f32 %v813_v61, %v1964_v51 }
 0x1f4   : > { %v824_v1 = vmul.f32 %v816_v62, %v1968_v54 }
 0x1f5   : > { %v1737_v2 = vpop.eup %1736  ;;  %v822_v4 = vmul.f32 %v814_v63, %v1972_v57 }
 0x1f6   : > { %v1739_v6 = vpop.eup %1738  ;;  %v830_v7 = vpack.c.bf16 %v824_v1, %v823_v0  ;;  %v811_v8 = vadd.f32 1.0, %v1737_v2 }
 0x1f7   : > { %v1741_v10 = vpop.eup %1740  ;;  %v829_v11 = vpack.c.bf16 %v822_v4, %v821_v3  ;;  %v809_v12 = vadd.f32 1.0, %v1739_v6 }
 0x1f8   : > { %v1743_v13 = vpop.eup %1742  ;;  %v812_v15 = vadd.f32 1.0, %v1741_v10  ;;  %v819_v16 = vmul.f32 0.5, %v811_v8 }
 0x1f9   : > { %1651 = vmatprep.mubr.bf16.mxu1 %v829_v11  ;;  %v810_v17 = vadd.f32 1.0, %v1743_v13  ;;  %v817_v18 = vmul.f32 0.5, %v809_v12 }
 0x1fa   : > { %1652 = vmatmul.mubr.bf16.vlgmr.msra.gmra.mrb[8].mxu1 %v830_v7  ;;  %v820_v49 = vmul.f32 0.5, %v812_v15  ;;  %v827_v21 = vmul.f32 %v819_v16, %v1983_v5  ;;  %v1727_v5 = vld [vmem:[%s2133_s7 + $0x18] sm:$0xff]  }
 0x1fb   : > { %v818_v54 = vmul.f32 0.5, %v810_v17  ;;  %v825_v57 = vmul.f32 %v817_v18, %v1986_v9  ;;  %1665 = vmatprep.subr.bf16.mxu0 %v1727_v5  ;;  %v1497_v9 = vld [vmem:[%s2132_s6] ss:$0 sm:$0xff] }
 0x1fc   : > { %v828_v51 = vmul.f32 %v820_v49, %v1991_v14  ;;  %1666 = vmatpush3.bf16.msra.mxu0 %v1727_v5 }
 0x1fd   : > { %v826_v25 = vmul.f32 %v818_v54, %v1996_v19 }
 0x1fe   : > { %v832_v26 = vpack.c.bf16 %v828_v51, %v827_v21 }
 0x1ff   : > { %v831_v27 = vpack.c.bf16 %v826_v25, %v825_v57 }
 0x201   : > { %1655 = vmatprep.mubr.bf16.mxu1 %v831_v27 }
 0x202   : > { %1656 = vmatmul.mubr.bf16.gmra.mrb[12].mxu1 %v832_v26 }
 0x2cd   : > { %v1653_v14 = vpop.f32.mrb[8].mxu1 }
 0x2ce   : > { %v947_v19 = vadd.f32 %v1653_v14, %v1497_v9  ;;  %v938_v29 = vpop.f32.mrb[9].mxu1 }
 0x2cf   : > { %v939_v31 = vadd.f32 %v1497_v9, %v938_v29  ;;  %v1654_v35 = vpop.f32.mrb[10].mxu1 }
 0x2d0   : > { %v971_v36 = vadd.f32 %v947_v19, %v1907_v24  ;;  %v950_v37 = vadd.f32 %v1654_v35, %v1497_v9  ;;  %v941_v38 = vpop.f32.mrb[11].mxu1 }
 0x2d1   : > { %v969_v39 = vadd.f32 %v939_v31, %v1903_v22  ;;  %v942_v40 = vadd.f32 %v1497_v9, %v941_v38 }
 0x2d2   : > { %v1541_v41 = vpack.c.bf16 %v971_v36, %v971_v36  ;;  %v972_v42 = vadd.f32 %v950_v37, %v1901_v20 }
 0x2d3   : > { %v1539_v43 = vpack.c.bf16 %v969_v39, %v969_v39  ;;  %v970_v24 = vadd.f32 %v942_v40, %v1905_v23 }
 0x2d4   : > { %1012 = vst.msk [vmem:[%s2032_s24 + $0x8] sm:$0xf] %vm1009_vm1, %v1541_v41  ;;  %v978_v44 = vpack.c.bf16 %v972_v42, %v971_v36  ;;  %v1542_v45 = vpack.c.bf16 %v972_v42, %v972_v42 }
 0x2d5   : > { %1010 = vst.msk [vmem:[%s2032_s24] sm:$0xf] %vm1009_vm1, %v1539_v43  ;;  %v977_v46 = vpack.c.bf16 %v970_v24, %v969_v39  ;;  %v1540_v47 = vpack.c.bf16 %v970_v24, %v970_v24  ;;  %v1657_v48 = vpop.f32.mrb[12].mxu1 }
 0x2d6   : > { %1013 = vst.msk [vmem:[%s2032_s24 + $0xc] sm:$0xf] %vm1009_vm1, %v1542_v45  ;;  %v963_v22 = vadd.f32 %v1657_v48, %v1497_v9  ;;  %v954_v50 = vpop.f32.mrb[13].mxu1 }
 0x2d7   : > { %1011 = vst.msk [vmem:[%s2032_s24 + $0x4] sm:$0xf] %vm1009_vm1, %v1540_v47  ;;  %v955_v20 = vadd.f32 %v1497_v9, %v954_v50  ;;  %v1658_v52 = vpop.f32.mrb[14].mxu1  ;;  %1667 = vmatprep.mubr.msk.bf16.mxu0 %vm679_vm0, %v977_v46 }
 0x2d8   : > { %v975_v23 = vadd.f32 %v963_v22, %v1921_v34  ;;  %v966_v53 = vadd.f32 %v1658_v52, %v1497_v9  ;;  %v957_v55 = vpop.f32.mrb[15].mxu1  ;;  %1668 = vmatmul.mubr.msk.bf16.vlgmr.msra.gmra.mrb[8].mxu0 %vm679_vm0, %v978_v44 }
 0x2d9   : > { %v973_v56 = vadd.f32 %v955_v20, %v1917_v32  ;;  %v958_v58 = vadd.f32 %v1497_v9, %v957_v55  ;;  %v1514_v32 = vld [vmem:[%s2134_s8] ss:$0 sm:$0xff] }
 0x2da   : > { %v1545_v59 = vpack.c.bf16 %v975_v23, %v975_v23  ;;  %v976_v60 = vadd.f32 %v966_v53, %v1915_v30  ;;  %v1768_v30 = vmov 0.0  }
 0x2db   : > { %v1543_v61 = vpack.c.bf16 %v973_v56, %v973_v56  ;;  %v974_v62 = vadd.f32 %v958_v58, %v1919_v33  ;;  %466 = vst.msk [vmem:[#allocation2] sm:$0x1] %vm465_vm2, %v1768_v30  ;;  %467 = vst.msk [vmem:[#allocation3] sm:$0x1] %vm465_vm2, %v1768_v30 }
 0x2dc   : > { %1016 = vst.msk [vmem:[%s2032_s24 + $0x18] sm:$0xf] %vm1009_vm1, %v1545_v59  ;;  %v980_v63 = vpack.c.bf16 %v976_v60, %v975_v23  ;;  %v1546_v0 = vpack.c.bf16 %v976_v60, %v976_v60 }
 0x2dd   : > { %1014 = vst.msk [vmem:[%s2032_s24 + $0x10] sm:$0xf] %vm1009_vm1, %v1543_v61  ;;  %v979_v34 = vpack.c.bf16 %v974_v62, %v973_v56  ;;  %v1544_v1 = vpack.c.bf16 %v974_v62, %v974_v62 }
 0x2de   : > { %1017 = vst.msk [vmem:[%s2032_s24 + $0x1c] sm:$0xf] %vm1009_vm1, %v1546_v0 }
 0x2df   : > { %1015 = vst.msk [vmem:[%s2032_s24 + $0x14] sm:$0xf] %vm1009_vm1, %v1544_v1  ;;  %1671 = vmatprep.mubr.msk.bf16.mxu0 %vm679_vm0, %v979_v34 }
 0x2e0   : > { %1672 = vmatmul.mubr.msk.bf16.gmra.mrb[12].mxu0 %vm679_vm0, %v980_v63  ;;  %v1236_v63 = vlaneseq }
 0x3ab   : > { %v1669_v33 = vpop.f32.mrb[8].mxu0 }
 0x3ac   : > { %v1112_v2 = vadd.f32 %v1669_v33, %v1514_v32  ;;  %v1103_v3 = vpop.f32.mrb[9].mxu0 }
 0x3ad   : > { %v1104_v4 = vadd.f32 %v1514_v32, %v1103_v3  ;;  %v1670_v6 = vpop.f32.mrb[10].mxu0 }
 0x3ae   : > { %v1549_v7 = vpack.c.bf16 %v1112_v2, %v1112_v2  ;;  %v1115_v8 = vadd.f32 %v1670_v6, %v1514_v32  ;;  %v1106_v10 = vpop.f32.mrb[11].mxu0  ;;  %v1204_v15 = vmul.f32 %v1112_v2, %v1112_v2  ;;  %v1180_v57 = vsel %vm1176_vm4, %v1112_v2, 0.0 }
 0x3af   : > { %v1547_v11 = vpack.c.bf16 %v1104_v4, %v1104_v4  ;;  %v1202_v12 = vmul.f32 %v1104_v4, %v1104_v4  ;;  %v1107_v13 = vadd.f32 %v1514_v32, %v1106_v10  ;;  %v1177_v17 = vsel %vm1176_vm4, %v1104_v4, 0.0 }
 0x3b0   : > { %1169 = vst.msk [vmem:[%s2072_s12 + $0x8] sm:$0xf] %vm1166_vm3, %v1549_v7  ;;  %v1550_v16 = vpack.c.bf16 %v1115_v8, %v1115_v8  ;;  %v1205_v21 = vmul.f32 %v1115_v8, %v1115_v8  ;;  %v1213_v19 = vsel %vm1176_vm4, %v1204_v15, 0.0  ;;  %v1182_v35 = vsel %vm1176_vm4, %v1115_v8, 0.0  ;;  %v1175_v15 = vld [vmem:[#allocation2] sm:$0x1] }
 0x3b1   : > { %1167 = vst.msk [vmem:[%s2072_s12] sm:$0xf] %vm1166_vm3, %v1547_v11  ;;  %v1548_v18 = vpack.c.bf16 %v1107_v13, %v1107_v13  ;;  %v1178_v49 = vsel %vm1176_vm4, %v1107_v13, 0.0  ;;  %v1203_v54 = vmul.f32 %v1107_v13, %v1107_v13  ;;  %v1210_v25 = vsel %vm1176_vm4, %v1202_v12, 0.0 }
 0x3b2   : > { %1170 = vst.msk [vmem:[%s2072_s12 + $0xc] sm:$0xf] %vm1166_vm3, %v1550_v16  ;;  %v1179_v51 = vadd.f32 %v1178_v49, %v1177_v17  ;;  %v1215_v36 = vsel %vm1176_vm4, %v1205_v21, 0.0  ;;  %v1239_v2 = vshrl.u32 %v1236_v63, 7  ;;  %v1237_v16 = vand.u32 127, %v1236_v63 }
 0x3b3   : > { %1168 = vst.msk [vmem:[%s2072_s12 + $0x4] sm:$0xf] %vm1166_vm3, %v1548_v18  ;;  %v1211_v26 = vsel %vm1176_vm4, %v1203_v54, 0.0  ;;  %v1673_v27 = vpop.f32.mrb[12].mxu0  ;;  %v1201_v54 = vld [vmem:[#allocation3] sm:$0x1] }
 0x3b4   : > { %v1181_v28 = vadd.f32 %v1180_v57, %v1179_v51  ;;  %v1212_v5 = vadd.f32 %v1211_v26, %v1210_v25  ;;  %v1128_v9 = vadd.f32 %v1673_v27, %v1514_v32  ;;  %v1119_v14 = vpop.f32.mrb[13].mxu0  ;;  %v1240_v8 = vmul.u32 8, %v1239_v2 }
 0x3b5   : > { %v1120_v29 = vadd.f32 %v1514_v32, %v1119_v14  ;;  %v1674_v31 = vpop.f32.mrb[14].mxu0 }
 0x3b6   : > { %v1214_v37 = vadd.f32 %v1213_v19, %v1212_v5  ;;  %v1553_v38 = vpack.c.bf16 %v1128_v9, %v1128_v9  ;;  %v1122_v39 = vpop.f32.mrb[15].mxu0  ;;  %v1183_v41 = vadd.f32 %v1182_v35, %v1181_v28  ;;  %v1131_v44 = vadd.f32 %v1674_v31, %v1514_v32 }
 0x3b7   : > { %v1551_v40 = vpack.c.bf16 %v1120_v29, %v1120_v29  ;;  %v1184_v42 = vsel %vm1176_vm4, %v1120_v29, 0.0  ;;  %v1206_v43 = vmul.f32 %v1120_v29, %v1120_v29  ;;  %v1123_v45 = vadd.f32 %v1514_v32, %v1122_v39 }
 0x3b8   : > { %1173 = vst.msk [vmem:[%s2072_s12 + $0x18] sm:$0xf] %vm1166_vm3, %v1553_v38  ;;  %v1216_v24 = vadd.f32 %v1215_v36, %v1214_v37  ;;  %v1185_v46 = vadd.f32 %v1184_v42, %v1183_v41  ;;  %v1554_v22 = vpack.c.bf16 %v1131_v44, %v1131_v44  ;;  %v1208_v50 = vmul.f32 %v1128_v9, %v1128_v9 }
 0x3b9   : > { %1171 = vst.msk [vmem:[%s2072_s12 + $0x10] sm:$0xf] %vm1166_vm3, %v1551_v40  ;;  %v1217_v47 = vsel %vm1176_vm4, %v1206_v43, 0.0  ;;  %v1552_v20 = vpack.c.bf16 %v1123_v45, %v1123_v45  ;;  %v1186_v52 = vsel %vm1176_vm4, %v1123_v45, 0.0  ;;  %v1207_v23 = vmul.f32 %v1123_v45, %v1123_v45 }
 0x3ba   : > { %v1218_v48 = vadd.f32 %v1217_v47, %v1216_v24  ;;  %1174 = vst.msk [vmem:[%s2072_s12 + $0x1c] sm:$0xf] %vm1166_vm3, %v1554_v22  ;;  %v1187_v53 = vadd.f32 %v1186_v52, %v1185_v46  ;;  %v1188_v55 = vsel %vm1176_vm4, %v1128_v9, 0.0  ;;  %v1209_v56 = vmul.f32 %v1131_v44, %v1131_v44 }
 0x3bb   : > { %1172 = vst.msk [vmem:[%s2072_s12 + $0x14] sm:$0xf] %vm1166_vm3, %v1552_v20  ;;  %v1219_v58 = vsel %vm1176_vm4, %v1207_v23, 0.0  ;;  %v1221_v61 = vsel %vm1176_vm4, %v1208_v50, 0.0  ;;  %v1190_v62 = vsel %vm1176_vm4, %v1131_v44, 0.0  ;;  %v1242_v17 = vadd.s32 8, %v1240_v8 }
 0x3bc   : > { %v1189_v59 = vadd.f32 %v1188_v55, %v1187_v53  ;;  %v1220_v60 = vadd.f32 %v1219_v58, %v1218_v48  ;;  %v1223_v1 = vsel %vm1176_vm4, %v1209_v56, 0.0  ;;  %vm1241_vm5 = vcmp.ge.s32.totalorder %v1237_v16, %v1240_v8 }
 0x3bd   : > { %vm1243_vm6 = vcmp.lt.s32.totalorder %v1237_v16, %v1242_v17 }
 0x3be   : > { %v1191_v0 = vadd.f32 %v1190_v62, %v1189_v59  ;;  %v1222_v34 = vadd.f32 %v1221_v61, %v1220_v60  ;;  %vm1244_vm7 = vmand %vm1241_vm5, %vm1243_vm6 }
 0x3bf   : > { %v1531_v25 = vsel %vm1244_vm7, 1.0, %v1768_v30 }
 0x3c0   : > { %v1192_v32 = vrot.slane %v1191_v0, 4  ;;  %v1224_v33 = vadd.f32 %v1223_v1, %v1222_v34 }
 0x3c2   : > { %v1193_v3 = vadd.f32 %v1192_v32, %v1191_v0  ;;  %v1225_v4 = vrot.slane %v1224_v33, 4 }
 0x3c4   : > { %v1194_v6 = vrot.slane %v1193_v3, 2  ;;  %v1226_v7 = vadd.f32 %v1225_v4, %v1224_v33 }
 0x3c6   : > { %v1195_v10 = vadd.f32 %v1194_v6, %v1193_v3  ;;  %v1227_v11 = vrot.slane %v1226_v7, 2 }
 0x3c8   : > { %v1196_v12 = vrot.slane %v1195_v10, 1  ;;  %v1228_v13 = vadd.f32 %v1227_v11, %v1226_v7 }
 0x3ca   : > { %v1197_v18 = vadd.f32 %v1196_v12, %v1195_v10  ;;  %v1229_v49 = vrot.slane %v1228_v13, 1 }
 0x3cc   : > { %v1230_v21 = vadd.f32 %v1229_v49, %v1228_v13  ;;  %v1198_v51 = vadd.f32 %v1197_v18, %v1175_v15 }
 0x3ce   : > { %1200 = vst.msk [vmem:[#allocation2] sm:$0x1] %vm465_vm2, %v1198_v51  ;;  %v1231_v57 = vadd.f32 %v1230_v21, %v1201_v54 }
 0x3d0   : > { %1232 = vst.msk [vmem:[#allocation3] sm:$0x1] %vm465_vm2, %v1231_v57 }
 0x3d5   : > { %v1532_v26 = vld [vmem:[#allocation2] ss:$0 sm:$0xff] }
 0x3d6   : > { %v1254_v27 = vmul.f32 %v1532_v26, %v1531_v25 }
 0x3d7   : > { %v1533_v28 = vld [vmem:[#allocation3] ss:$0 sm:$0xff] }
 0x3d8   : > { %v1255_v5 = vsel %vm1166_vm3, %v1254_v27, 0.0  ;;  %v1267_v9 = vmul.f32 %v1533_v28, %v1531_v25 }
 0x3d9   : > { %1256 = vadd.xlane.f32.xlu0 %v1255_v5 }
 0x3da   : > { %v1268_v14 = vsel %vm1166_vm3, %v1267_v9, 0.0 }
 0x3dd   : > { %1269 = vadd.xlane.f32.xlu0 %v1268_v14 }
 0x466   : > { %v1257_v19 = vpop.xlane.xlu0 %1256 }
 0x467   : > { %v1259_v29 = vmul.f32 0.001953125, %v1257_v19 }
 0x469   : > { %v1275_v31 = vmul.f32 %v1531_v25, %v1259_v29  ;;  %v1272_v36 = vmul.f32 %v1259_v29, %v1259_v29 }
 0x46a   : > { %v1270_v35 = vpop.xlane.xlu0 %1269 }
 0x46b   : > { %v1276_v37 = vsel %vm1166_vm3, %v1275_v31, 0.0  ;;  %v1271_v38 = vmul.f32 0.001953125, %v1270_v35 }
 0x46c   : > { %v1277_v30 = vrot.slane %v1276_v37, 4 }
 0x46d   : > { %v1273_v39 = vsub.f32 %v1271_v38, %v1272_v36 }
 0x46e   : > { %v1278_v40 = vadd.f32 %v1277_v30, %v1276_v37 }
 0x46f   : > { %v1274_v41 = vmax.f32 %v1273_v39, 0.0 }
 0x470   : > { %v1279_v43 = vrot.slane %v1278_v40, 2 }
 0x471   : > { %v1283_v42 = vmul.f32 %v1531_v25, %v1274_v41 }
 0x472   : > { %v1280_v45 = vadd.f32 %v1279_v43, %v1278_v40 }
 0x473   : > { %v1284_v24 = vsel %vm1166_vm3, %v1283_v42, 0.0 }
 0x474   : > { %v1285_v44 = vrot.slane %v1284_v24, 4  ;;  %v1281_v48 = vrot.slane %v1280_v45, 1 }
 0x476   : > { %v1286_v46 = vadd.f32 %v1285_v44, %v1284_v24  ;;  %v1282_v20 = vadd.f32 %v1281_v48, %v1280_v45 }
 0x478   : > { %v1287_v47 = vrot.slane %v1286_v46, 2 }
 0x47a   : > { %v1288_v22 = vadd.f32 %v1287_v47, %v1286_v46 }
 0x47c   : > { %v1289_v50 = vrot.slane %v1288_v22, 1 }
 0x47e   : > { %v1290_v52 = vadd.f32 %v1289_v50, %v1288_v22 }
 0x480   : > { %v1292_v23 = vsel %vm1291_vm8, %v1282_v20, %v1290_v52 }
 0x481   : > { %1294 = vst.msk [vmem:[%s459_s15] sm:$0x3] %vm1293_vm9, %v1292_v23 }
 0x482 PF: > { %s22_s19 = sadd.s32 1, %s1766_s19   ;;  %s2138_s17 = smov %s1762_s18 }
 0x483   : > { %p19_p5 = scmp.ge.s32.totalorder %s22_s19, 4   ;;  %s2139_s18 = smov %s2141_s20 }
 0x485   :  { %21 = sbr.rel (!%p19_p5) target bundleno = 2 (0x2), region = 118 }

// kernel: a_call__.11
= control target key start
LH: loop header
LB: loop body
LE: loop exit
PB: predicated region body
PF: predicated region fallthrough
CT: control target
= control target key end

     0   :  { %s524_s15 = smov 0   ;;  %s526_s16 = smov 0   ;;  %s571_s0 = inlined_call_operand.vmem [shape: bf16[2,16,32], index: 0, kind: input, shape index: {}]   ;;  %s572_s1 = inlined_call_operand.vmem [shape: f32[2,2,32], index: 1, kind: input, shape index: {}]   ;;  %s573_s2 = inlined_call_operand.vmem [shape: f32[1,32], index: 2, kind: input, shape index: {}]   ;;  %s574_s3 = inlined_call_operand.vmem [shape: f32[1,32], index: 3, kind: input, shape index: {}]   ;;  %s575_s4 = inlined_call_operand.vmem [shape: f32[2,32,16], index: 4, kind: output, shape index: {}]  }
   0x1   :  { %s528_s17 = smov 0  }
   0x2 LB: > { %s26_s18 = sadd.s32 1, %s492_s16  ;;  %p432_p0 = scmp.ge.s32.totalorder %s496_s17, 1  ;;  %s496_s17 = sphi %s528_s17, %s14_s17   ;;  %s492_s16 = sphi %s526_s16, %s577_s16   ;;  %s488_s15 = sphi %s524_s15, %s576_s15  }
   0x3   : > { %p28_p1 = scmp.ge.s32.totalorder %s26_s18, 2  ;;  %p192_p2 = scmp.lt.s32.totalorder %s496_s17, 3 }
   0x5   : > { %s579_s18 = smov (%p28_p1, %s26_s18), 0  ;;  %p193_p3 = pnand %p432_p0, %p192_p2 }
   0x6   : > { %p230_p4 = scmp.lt.s32.totalorder (!%p193_p3), %s488_s15, 1  ;;  %v498_v2 = vmov (!%p193_p3), 1966171168   ;;  %v263_v4 = vlaneseq (!%p193_p3)  ;;  %v256_v12 = vld [vmem:[%s573_s2] sm:$0x1] (!%p193_p3)  ;;  %vm328_vm0 = vcmask (!%p193_p3), 130048  }
   0x7   : > { %196 = sbr.rel (%p193_p3) target bundleno = 189 (0xbd), region = 36  ;;  %v261_v3 = vunpack.c.l.s4 (!%p193_p3), %v498_v2  ;;  %v277_v17 = vld [vmem:[%s574_s3] sm:$0x1] (!%p193_p3) }
   0x8   : > { %v264_v6 = vshrl.u32 (!%p193_p3), %v263_v4, 7 }
   0x9   : > { %v262_v5 = vunpack.c.0.s8 (!%p193_p3), %v261_v3 }
   0xa   : > { %v283_v14 = vsub.s32 (!%p193_p3), 0, %v264_v6 }
   0xb   : > { %v265_v7 = vsub.s32 (!%p193_p3), %v262_v5, %v264_v6 }
   0xe   : > { %s581_s15 = smov (!%p230_p4, %s488_s15), 1 }
   0xf   : > { %s435_s19 = sshll.u32 %s581_s15, 1  ;;  %s440_s23 = sshll.u32 %s581_s15, 3 }
  0x10   : > { %s242_s22 = scalar_lea.vmem %s572_s1, %s435_s19  ;;  %s237_s26 = scalar_lea.vmem %s571_s0, %s440_s23 }
  0x11   : > { %v255_v0 = vld [vmem:[%s242_s22] sm:$0x3]  ;;  %s441_s5 = sshll.u32 %s581_s15, 5 }
  0x12   : > { %v257_v1 = vadd.f32 1e-05, %v255_v0  ;;  %v443_v11 = vld [vmem:[%s237_s26] sm:$0xff]   ;;  %s250_s8 = scalar_lea.vmem %s575_s4, %s441_s5 }
  0x13   : > { %v444_v15 = vunpack.c.l.bf16 %v443_v11  ;;  %v445_v20 = vunpack.c.h.bf16 %v443_v11 }
  0x14   : > { %472 = vrsqrt.f32 %v257_v1 }
  0x1e   : > { %v473_v8 = vpop.eup %472 }
  0x1f   : > { %v266_v9 = vrot.slane %v473_v8, %v265_v7 }
  0x21   : > { %v267_v10 = vcombine.high %v266_v9, %v266_v9 }
  0x23   : > { %v274_v13 = vrot.slane %v267_v10, %v265_v7 }
  0x25   : > { %v276_v16 = vmul.f32 %v274_v13, %v256_v12 }
  0x27   : > { %v278_v18 = vmul.f32 %v276_v16, %v255_v0  ;;  %v284_v19 = vrot.slane %v276_v16, %v283_v14 }
  0x29   : > { %v279_v21 = vsub.f32 %v277_v17, %v278_v18  ;;  %v286_v22 = vmul.f32 %v444_v15, %v284_v19  ;;  %v287_v24 = vmul.f32 %v445_v20, %v284_v19 }
  0x2b   : > { %v292_v23 = vrot.slane %v279_v21, %v283_v14 }
  0x2d   : > { %v294_v25 = vadd.f32 %v292_v23, %v286_v22  ;;  %v295_v26 = vadd.f32 %v292_v23, %v287_v24 }
  0x2f   : > { %296 = vxpose.xlu0.b32.start [1/2] (short) (narrow) %v294_v25, 32 }
  0x33   : > { %297 = vxpose.xlu0.b32.end [2/2] (short) (narrow) %v295_v26, 32 }
  0xaf   : > { %v312_v27 = vpop.trf.xlu0 }
  0xb0   : > { %329 = vst.msk [vmem:[%s250_s8] sm:$0xff] %vm328_vm0, %v312_v27 }
  0xb3   : > { %v313_v28 = vpop.trf.xlu0 }
  0xb4   : > { %330 = vst.msk [vmem:[%s250_s8 + $0x8] sm:$0xff] %vm328_vm0, %v313_v28 }
  0xb7   : > { %v314_v29 = vpop.trf.xlu0 }
  0xb8   : > { %331 = vst.msk [vmem:[%s250_s8 + $0x10] sm:$0xff] %vm328_vm0, %v314_v29 }
  0xbb   : > { %v315_v30 = vpop.trf.xlu0 }
  0xbc   : > { %332 = vst.msk [vmem:[%s250_s8 + $0x18] sm:$0xff] %vm328_vm0, %v315_v30 }
  0xbd PF: > { %s14_s17 = sadd.s32 1, %s496_s17   ;;  %s576_s15 = smov %s492_s16 }
  0xbe   : > { %p11_p5 = scmp.ge.s32.totalorder %s14_s17, 4   ;;  %s577_s16 = smov %s579_s18 }
  0xc0   :  { %13 = sbr.rel (!%p11_p5) target bundleno = 2 (0x2), region = 69 }

// kernel: a_call__.10
= control target key start
LH: loop header
LB: loop body
LE: loop exit
PB: predicated region body
PF: predicated region fallthrough
CT: control target
= control target key end

     0   :  { %s1651_s13 = smov 0   ;;  %s1653_s14 = smov 0   ;;  %s1913_s0 = inlined_call_operand.vmem [shape: bf16[2,16,256], index: 0, kind: input, shape index: {}]   ;;  %s1914_s1 = inlined_call_operand.vmem [shape: bf16[256,128], index: 1, kind: input, shape index: {}]   ;;  %s1915_s2 = inlined_call_operand.vmem [shape: f32[1,128], index: 2, kind: input, shape index: {}, may-alias: {2,6}]   ;;  %s1916_s3 = inlined_call_operand.vmem [shape: bf16[128,256], index: 3, kind: input, shape index: {}]   ;;  %s1917_s4 = inlined_call_operand.vmem [shape: f32[1,256], index: 4, kind: input, shape index: {}]   ;;  %s1918_s5 = inlined_call_operand.vmem [shape: bf16[256,128], index: 5, kind: input, shape index: {}]   ;;  %s1919_s6 = inlined_call_operand.vmem [shape: f32[1,128], index: 6, kind: input, shape index: {}, may-alias: {2,6}]   ;;  %s1920_s7 = inlined_call_operand.vmem [shape: bf16[128,32], index: 7, kind: input, shape index: {}]   ;;  %s1921_s8 = inlined_call_operand.vmem [shape: f32[1,32], index: 8, kind: input, shape index: {}]   ;;  %s1922_s9 = inlined_call_operand.vmem [shape: bf16[2,16,32], index: 9, kind: output, shape index: {0}]   ;;  %s1923_s10 = inlined_call_operand.vmem [shape: f32[2,2,32], index: 10, kind: output, shape index: {1}]  }
   0x1   :  { %s1655_s15 = smov 0  }
   0x2 LB: > { %s33_s16 = sadd.s32 1, %s1587_s14  ;;  %p1316_p0 = scmp.ge.s32.totalorder %s1591_s15, 1  ;;  %s1591_s15 = sphi %s1655_s15, %s21_s15   ;;  %s1587_s14 = sphi %s1653_s14, %s1925_s14   ;;  %s1583_s13 = sphi %s1651_s13, %s1924_s13  }
   0x3   : > { %p35_p1 = scmp.ge.s32.totalorder %s33_s16, 2  ;;  %p337_p2 = scmp.lt.s32.totalorder %s1591_s15, 3 }
   0x5   : > { %s1927_s16 = smov (%p35_p1, %s33_s16), 0  ;;  %p338_p3 = pnand %p1316_p0, %p337_p2 }
   0x6   : > { %v1494_v0 = vld [vmem:[%s1914_s1 + $0x40] sm:$0xff] (!%p338_p3)   ;;  %v1496_v2 = vld [vmem:[%s1914_s1 + $0x48] sm:$0xff] (!%p338_p3)   ;;  %p389_p4 = scmp.lt.s32.totalorder (!%p338_p3), %s1583_s13, 1  ;;  %v1498_v4 = vld [vmem:[%s1914_s1 + $0x50] sm:$0xff] (!%p338_p3)   ;;  %v1593_v34 = vmov (!%p338_p3), 0   ;;  %v1594_v62 = vmov (!%p338_p3), 0.0  }
   0x7   : > { %341 = sbr.rel (%p338_p3) target bundleno = 1143 (0x477), region = 56  ;;  %v1495_v1 = vld [vmem:[%s1914_s1] sm:$0xff] (!%p338_p3)   ;;  %1394 = vmatprep.subr.bf16.mxu0 (!%p338_p3), %v1494_v0  ;;  %v1497_v3 = vld [vmem:[%s1914_s1 + $0x8] sm:$0xff] (!%p338_p3)   ;;  %v1499_v5 = vld [vmem:[%s1914_s1 + $0x10] sm:$0xff] (!%p338_p3)   ;;  %750 = vmatprep.mubr.bf16.mxu1 (!%p338_p3), %v1593_v34  ;;  %vm1595_vm0 = vmmov (!%p338_p3), 0   ;;  %vm418_vm1 = vcmask (!%p338_p3), 253952  }
   0x8   : > { %1395 = vmatpush3.bf16.msra.mxu0 (!%p338_p3), %v1495_v1  ;;  %v1500_v6 = vld [vmem:[%s1914_s1 + $0x58] sm:$0xff] (!%p338_p3)   ;;  %v1502_v8 = vld [vmem:[%s1914_s1 + $0x60] sm:$0xff] (!%p338_p3)   ;;  %v1504_v10 = vld [vmem:[%s1914_s1 + $0x68] sm:$0xff] (!%p338_p3)   ;;  %419 = vst.msk [vmem:[#allocation2] sm:$0x1] (!%p338_p3), %vm418_vm1, %v1594_v62  ;;  %vm1102_vm2 = vcmask (!%p338_p3), 261120  }
   0x9   : > { %1396 = vmatprep.subr.bf16.mxu0 (!%p338_p3), %v1496_v2  ;;  %v1501_v7 = vld [vmem:[%s1914_s1 + $0x18] sm:$0xff] (!%p338_p3)   ;;  %v1503_v9 = vld [vmem:[%s1914_s1 + $0x20] sm:$0xff] (!%p338_p3)   ;;  %v1505_v14 = vld [vmem:[%s1914_s1 + $0x28] sm:$0xff] (!%p338_p3)   ;;  %420 = vst.msk [vmem:[#allocation3] sm:$0x1] (!%p338_p3), %vm418_vm1, %v1594_v62  ;;  %vm1098_vm3 = vcmask (!%p338_p3), 257024  }
   0xa   : > { %v1513_v12 = vld [vmem:[%s1916_s3 + $0x4] ss:$8 sps:$4 sm:$0xff] (!%p338_p3)   ;;  %v1515_v13 = vld [vmem:[%s1916_s3] ss:$8 sps:$4 sm:$0xff] (!%p338_p3)   ;;  %v1516_v15 = vld [vmem:[%s1916_s3 + $0x14] ss:$8 sps:$4 sm:$0xff] (!%p338_p3)  }
   0xb   : > { %v1506_v16 = vld [vmem:[%s1914_s1 + $0x70] sm:$0xff] (!%p338_p3)   ;;  %718 = vmatprep.subr.bf16.mxu1 (!%p338_p3), %v1513_v12  ;;  %v1519_v18 = vld [vmem:[%s1916_s3 + $0x24] ss:$8 sps:$4 sm:$0xff] (!%p338_p3)   ;;  %v1508_v20 = vld [vmem:[%s1914_s1 + $0x78] sm:$0xff] (!%p338_p3)   ;;  %vm1187_vm7 = vcmask (!%p338_p3), 1040384   ;;  %vm1189_vm8 = vcmask (!%p338_p3), 254976  }
   0xc   : > { %1397 = vmatpush3.bf16.msra.mxu0 (!%p338_p3), %v1497_v3  ;;  %719 = vmatpush1.bf16.msra.mxu1 (!%p338_p3), %v1515_v13  ;;  %v1518_v17 = vld [vmem:[%s1916_s3 + $0x10] ss:$8 sps:$4 sm:$0xff] (!%p338_p3)   ;;  %v1521_v21 = vld [vmem:[%s1916_s3 + $0x20] ss:$8 sps:$4 sm:$0xff] (!%p338_p3)   ;;  %v1522_v23 = vld [vmem:[%s1916_s3 + $0x34] ss:$8 sps:$4 sm:$0xff] (!%p338_p3)   ;;  %v628_v3 = vlaneseq (!%p338_p3) }
   0xd   : > { %1398 = vmatprep.subr.bf16.mxu0 (!%p338_p3), %v1498_v4  ;;  %720 = vmatprep.subr.bf16.mxu1 (!%p338_p3), %v1516_v15  ;;  %v1507_v19 = vld [vmem:[%s1914_s1 + $0x30] sm:$0xff] (!%p338_p3)   ;;  %v1509_v22 = vld [vmem:[%s1914_s1 + $0x38] sm:$0xff] (!%p338_p3)   ;;  %v1525_v26 = vld [vmem:[%s1916_s3 + $0x44] ss:$8 sps:$4 sm:$0xff] (!%p338_p3)  }
   0xe   : > { %s1929_s13 = smov (!%p389_p4, %s1583_s13), 1  ;;  %v1524_v24 = vld [vmem:[%s1916_s3 + $0x30] ss:$8 sps:$4 sm:$0xff]   ;;  %v1527_v27 = vld [vmem:[%s1916_s3 + $0x40] ss:$8 sps:$4 sm:$0xff]   ;;  %v1854_v4 = vshrl.u32 %v628_v3, 7 }
   0xf   : > { %s1390_s17 = sshll.u32 %s1929_s13, 4  ;;  %v1528_v28 = vld [vmem:[%s1916_s3 + $0x54] ss:$8 sps:$4 sm:$0xff]   ;;  %v1530_v29 = vld [vmem:[%s1916_s3 + $0x50] ss:$8 sps:$4 sm:$0xff]   ;;  %v1537_v45 = vld [vmem:[%s1918_s5 + $0x40] sm:$0xff]  }
  0x10   : > { %1399 = vmatpush3.bf16.msra.mxu0 %v1499_v5  ;;  %s1702_s22 = scalar_lea.vmem %s1913_s0, %s1390_s17  ;;  %721 = vmatpush1.bf16.msra.mxu1 %v1518_v17  ;;  %v1531_v30 = vld [vmem:[%s1916_s3 + $0x64] ss:$8 sps:$4 sm:$0xff]   ;;  %v1533_v31 = vld [vmem:[%s1916_s3 + $0x60] ss:$8 sps:$4 sm:$0xff]   ;;  %v1534_v32 = vld [vmem:[%s1916_s3 + $0x74] ss:$8 sps:$4 sm:$0xff]  }
  0x11   : > { %1400 = vmatprep.subr.bf16.mxu0 %v1500_v6  ;;  %v1512_v11 = vld [vmem:[%s1702_s22 + $0x4] ss:$8 sps:$4 sm:$0xff]   ;;  %722 = vmatprep.subr.bf16.mxu1 %v1519_v18  ;;  %v1510_v25 = vld [vmem:[%s1702_s22] ss:$8 sps:$4 sm:$0xff]   ;;  %v1536_v33 = vld [vmem:[%s1916_s3 + $0x70] ss:$8 sps:$4 sm:$0xff]  }
  0x12   : > { %600 = vmatprep.mubr.bf16.mxu0 %v1512_v11  ;;  %v1322_v39 = vld [vmem:[%s1915_s2] ss:$0 sm:$0xff]  ;;  %v1539_v47 = vld [vmem:[%s1918_s5 + $0x48] sm:$0xff]   ;;  %v1541_v49 = vld [vmem:[%s1918_s5 + $0x50] sm:$0xff]   ;;  %v630_v5 = vsub.s32 0, %v1854_v4  ;;  %s1391_s30 = sshll.u32 %s1929_s13, 3 }
  0x13   : > { %v1538_v46 = vld [vmem:[%s1918_s5] sm:$0xff]   ;;  %v1540_v48 = vld [vmem:[%s1918_s5 + $0x8] sm:$0xff]   ;;  %v1542_v50 = vld [vmem:[%s1918_s5 + $0x10] sm:$0xff]   ;;  %s407_s17 = scalar_lea.vmem %s1922_s9, %s1391_s30  ;;  %s1321_s18 = sshll.u32 %s1929_s13, 1 }
  0x14   : > { %1401 = vmatpush3.bf16.msra.mxu0 %v1501_v7  ;;  %723 = vmatpush1.bf16.msra.mxu1 %v1521_v21  ;;  %v1543_v51 = vld [vmem:[%s1918_s5 + $0x58] sm:$0xff]   ;;  %v1545_v53 = vld [vmem:[%s1918_s5 + $0x60] sm:$0xff]   ;;  %v1547_v55 = vld [vmem:[%s1918_s5 + $0x68] sm:$0xff]   ;;  %v634_v7 = vsub.s32 1, %v1854_v4  ;;  %s412_s21 = scalar_lea.vmem %s1923_s10, %s1321_s18 }
  0x15   : > { %1402 = vmatprep.subr.bf16.mxu0 %v1502_v8  ;;  %724 = vmatprep.subr.bf16.mxu1 %v1522_v23  ;;  %v1544_v52 = vld [vmem:[%s1918_s5 + $0x18] sm:$0xff]   ;;  %v1546_v54 = vld [vmem:[%s1918_s5 + $0x20] sm:$0xff]   ;;  %v1548_v56 = vld [vmem:[%s1918_s5 + $0x28] sm:$0xff]  }
  0x16   : > { %v1549_v57 = vld [vmem:[%s1918_s5 + $0x70] sm:$0xff]   ;;  %v1551_v59 = vld [vmem:[%s1918_s5 + $0x78] sm:$0xff]   ;;  %v1553_v61 = vld [vmem:[%s1920_s7] sm:$0xff]  }
  0x17   : > { %v1550_v58 = vld [vmem:[%s1918_s5 + $0x30] sm:$0xff]   ;;  %v1552_v60 = vld [vmem:[%s1918_s5 + $0x38] sm:$0xff]   ;;  %v1554_v63 = vld [vmem:[%s1920_s7 + $0x8] sm:$0xff]  }
  0x18   : > { %1403 = vmatpush3.bf16.msra.mxu0 %v1503_v9  ;;  %725 = vmatpush1.bf16.msra.mxu1 %v1524_v24  ;;  %v1555_v0 = vld [vmem:[%s1920_s7 + $0x10] sm:$0xff]   ;;  %v1556_v1 = vld [vmem:[%s1920_s7 + $0x18] sm:$0xff]   ;;  %v1557_v2 = vld [vmem:[%s1920_s7 + $0x20] sm:$0xff]  }
  0x19   : > { %1404 = vmatprep.subr.bf16.mxu0 %v1504_v10  ;;  %726 = vmatprep.subr.bf16.mxu1 %v1525_v26  ;;  %v626_v6 = vld [vmem:[%s1917_s4] sm:$0x3] }
  0x1a   : > { %v631_v8 = vrot.slane %v626_v6, %v630_v5  ;;  %v635_v9 = vrot.slane %v626_v6, %v634_v7 }
  0x1c   : > { %1405 = vmatpush3.bf16.msra.mxu0 %v1505_v14  ;;  %727 = vmatpush1.bf16.msra.mxu1 %v1527_v27 }
  0x1d   : > { %1406 = vmatprep.subr.bf16.mxu0 %v1506_v16  ;;  %728 = vmatprep.subr.bf16.mxu1 %v1528_v28 }
  0x20   : > { %1407 = vmatpush3.bf16.msra.mxu0 %v1507_v19  ;;  %729 = vmatpush1.bf16.msra.mxu1 %v1530_v29 }
  0x21   : > { %1408 = vmatprep.subr.bf16.mxu0 %v1508_v20  ;;  %730 = vmatprep.subr.bf16.mxu1 %v1531_v30 }
  0x24   : > { %1409 = vmatpush3.bf16.msra.mxu0 %v1509_v22  ;;  %731 = vmatpush1.bf16.msra.mxu1 %v1533_v31 }
  0x25   : > { %732 = vmatprep.subr.bf16.mxu1 %v1534_v32  ;;  %1416 = vmatprep.subr.bf16.mxu0 %v1537_v45 }
  0x27   : > { %601 = vmatmul.mubr.bf16.vlgmr.msra.gmra.mrb[0].mxu0 %v1510_v25 }
  0x28   : > { %733 = vmatpush1.bf16.msra.mxu1 %v1536_v33  ;;  %1417 = vmatpush3.bf16.msra.mxu0 %v1538_v46 }
  0x29   : > { %1418 = vmatprep.subr.bf16.mxu0 %v1539_v47  ;;  %1447 = vmatprep.subr.bf16.mxu1 %v1594_v62 }
  0x2c   : > { %1419 = vmatpush3.bf16.msra.mxu0 %v1540_v48 }
  0x2d   : > { %1420 = vmatprep.subr.bf16.mxu0 %v1541_v49 }
  0x30   : > { %1421 = vmatpush3.bf16.msra.mxu0 %v1542_v50 }
  0x31   : > { %1422 = vmatprep.subr.bf16.mxu0 %v1543_v51 }
  0x34   : > { %1423 = vmatpush3.bf16.msra.mxu0 %v1544_v52 }
  0x35   : > { %1424 = vmatprep.subr.bf16.mxu0 %v1545_v53 }
  0x38   : > { %1425 = vmatpush3.bf16.msra.mxu0 %v1546_v54 }
  0x39   : > { %1426 = vmatprep.subr.bf16.mxu0 %v1547_v55 }
  0x3c   : > { %1427 = vmatpush3.bf16.msra.mxu0 %v1548_v56 }
  0x3d   : > { %1428 = vmatprep.subr.bf16.mxu0 %v1549_v57 }
  0x40   : > { %1429 = vmatpush3.bf16.msra.mxu0 %v1550_v58  ;;  %v1558_v58 = vld [vmem:[%s1920_s7 + $0x28] sm:$0xff]  }
  0x41   : > { %1430 = vmatprep.subr.bf16.mxu0 %v1551_v59  ;;  %v1559_v59 = vld [vmem:[%s1920_s7 + $0x30] sm:$0xff]  }
  0x44   : > { %1431 = vmatpush3.bf16.msra.mxu0 %v1552_v60  ;;  %v1560_v60 = vld [vmem:[%s1920_s7 + $0x38] sm:$0xff]  }
  0xfa   : > { %v1410_v35 = vpop.f32.mrb[0].mxu0 }
  0xfb   : > { %v1411_v36 = vpop.f32.mrb[1].mxu0 }
  0xfc   : > { %v1412_v37 = vadd.f32 %v1411_v36, %v1410_v35  ;;  %v1413_v38 = vpop.f32.mrb[2].mxu0 }
  0xfd   : > { %v1414_v40 = vpop.f32.mrb[3].mxu0 }
  0xfe   : > { %v1415_v41 = vadd.f32 %v1414_v40, %v1413_v38  ;;  %v1778_v42 = vadd.f32 %v1412_v37, %v1322_v39 }
 0x100   : > { %v1780_v43 = vadd.f32 %v1415_v41, %v1322_v39 }
 0x102   : > { %v609_v44 = vpack.c.bf16 %v1780_v43, %v1778_v42 }
 0x104   : > { %751 = vmatmul.mubr.bf16.vlgmr.msra.gmra.mrb[0].mxu1 %v609_v44 }
 0x105   : > { %1448 = vmatpush3.bf16.msra.mxu1 %v1553_v61  ;;  %1463 = vmatprep.mubr.msk.bf16.mxu1 %vm1595_vm0, %v1594_v62 }
 0x106   : > { %1449 = vmatprep.subr.bf16.mxu1 %v1594_v62 }
 0x109   : > { %1450 = vmatpush3.bf16.msra.mxu1 %v1554_v63  ;;  %v1357_v63 = vld [vmem:[%s1919_s6] ss:$0 sm:$0xff] }
 0x10a   : > { %1451 = vmatprep.subr.bf16.mxu1 %v1594_v62 }
 0x10d   : > { %1452 = vmatpush3.bf16.msra.mxu1 %v1555_v0 }
 0x10e   : > { %1453 = vmatprep.subr.bf16.mxu1 %v1594_v62 }
 0x111   : > { %1454 = vmatpush3.bf16.msra.mxu1 %v1556_v1 }
 0x112   : > { %1455 = vmatprep.subr.bf16.mxu1 %v1594_v62 }
 0x115   : > { %1456 = vmatpush3.bf16.msra.mxu1 %v1557_v2 }
 0x116   : > { %1457 = vmatprep.subr.bf16.mxu1 %v1594_v62 }
 0x119   : > { %1458 = vmatpush3.bf16.msra.mxu1 %v1558_v58 }
 0x11a   : > { %1459 = vmatprep.subr.bf16.mxu1 %v1594_v62 }
 0x11d   : > { %1460 = vmatpush3.bf16.msra.mxu1 %v1559_v59 }
 0x11e   : > { %1461 = vmatprep.subr.bf16.mxu1 %v1594_v62 }
 0x121   : > { %1462 = vmatpush3.bf16.msra.mxu1 %v1560_v60 }
 0x1d7   : > { %v752_v10 = vpop.f32.mrb[0].mxu1 }
 0x1d8   : > { %v753_v11 = vadd.f32 %v752_v10, %v631_v8  ;;  %v754_v12 = vpop.f32.mrb[1].mxu1 }
 0x1d9   : > { %v755_v13 = vadd.f32 %v754_v12, %v635_v9  ;;  %v756_v14 = vpop.f32.mrb[2].mxu1  ;;  %v1374_v12 = vld [vmem:[%s1921_s8] ss:$0 sm:$0xff] }
 0x1da   : > { %v761_v15 = vmul.f32 %v753_v11, %v753_v11  ;;  %v757_v16 = vadd.f32 %v756_v14, %v631_v8  ;;  %v758_v17 = vpop.f32.mrb[3].mxu1 }
 0x1db   : > { %v762_v18 = vmul.f32 %v755_v13, %v755_v13  ;;  %v759_v19 = vadd.f32 %v758_v17, %v635_v9 }
 0x1dc   : > { %v765_v20 = vmul.f32 %v761_v15, %v753_v11  ;;  %v763_v21 = vmul.f32 %v757_v16, %v757_v16 }
 0x1dd   : > { %v766_v22 = vmul.f32 %v762_v18, %v755_v13  ;;  %v764_v23 = vmul.f32 %v759_v19, %v759_v19 }
 0x1de   : > { %v769_v24 = vmul.f32 0.044715, %v765_v20  ;;  %v767_v25 = vmul.f32 %v763_v21, %v757_v16 }
 0x1df   : > { %v770_v26 = vmul.f32 0.044715, %v766_v22  ;;  %v768_v27 = vmul.f32 %v764_v23, %v759_v19 }
 0x1e0   : > { %v773_v28 = vadd.f32 %v769_v24, %v753_v11  ;;  %v771_v29 = vmul.f32 0.044715, %v767_v25 }
 0x1e1   : > { %v774_v30 = vadd.f32 %v770_v26, %v755_v13  ;;  %v772_v31 = vmul.f32 0.044715, %v768_v27 }
 0x1e2   : > { %v777_v32 = vmul.f32 0.7978846, %v773_v28  ;;  %v775_v33 = vadd.f32 %v771_v29, %v757_v16 }
 0x1e3   : > { %v778_v34 = vmul.f32 0.7978846, %v774_v30  ;;  %v776_v35 = vadd.f32 %v772_v31, %v759_v19 }
 0x1e4   : > { %1561 = vtanh.f32 %v777_v32  ;;  %v779_v36 = vmul.f32 0.7978846, %v775_v33  ;;  %v1136_v32 = vmul.u32 8, %v1854_v4 }
 0x1e5   : > { %1563 = vtanh.f32 %v778_v34  ;;  %v780_v37 = vmul.f32 0.7978846, %v776_v35 }
 0x1e6   : > { %1565 = vtanh.f32 %v779_v36 }
 0x1e7   : > { %1567 = vtanh.f32 %v780_v37  ;;  %v1101_v37 = vld [vmem:[#allocation2] sm:$0x1] }
 0x1ee   : > { %v1562_v38 = vpop.eup %1561 }
 0x1ef   : > { %v1564_v39 = vpop.eup %1563  ;;  %v785_v40 = vadd.f32 1.0, %v1562_v38  ;;  %v1133_v38 = vand.u32 127, %v628_v3 }
 0x1f0   : > { %v1566_v41 = vpop.eup %1565  ;;  %v786_v44 = vadd.f32 1.0, %v1564_v39  ;;  %v1138_v39 = vadd.s32 8, %v1136_v32 }
 0x1f1   : > { %v1568_v45 = vpop.eup %1567  ;;  %v789_v46 = vmul.f32 0.5, %v785_v40  ;;  %v787_v47 = vadd.f32 1.0, %v1566_v41  ;;  %vm1137_vm4 = vcmp.ge.s32.totalorder %v1133_v38, %v1136_v32 }
 0x1f2   : > { %v788_v48 = vadd.f32 1.0, %v1568_v45  ;;  %v790_v49 = vmul.f32 0.5, %v786_v44  ;;  %v1115_v44 = vld [vmem:[#allocation3] sm:$0x1]  ;;  %vm1139_vm5 = vcmp.lt.s32.totalorder %v1133_v38, %v1138_v39 }
 0x1f3   : > { %v791_v50 = vmul.f32 0.5, %v787_v47  ;;  %v793_v52 = vmul.f32 %v789_v46, %v753_v11  ;;  %vm1140_vm6 = vmand %vm1137_vm4, %vm1139_vm5 }
 0x1f4   : > { %v792_v51 = vmul.f32 0.5, %v788_v48  ;;  %v794_v54 = vmul.f32 %v790_v49, %v755_v13  ;;  %v1385_v4 = vsel %vm1140_vm6, 1.0, %v1594_v62 }
 0x1f5   : > { %v795_v53 = vmul.f32 %v791_v50, %v757_v16 }
 0x1f6   : > { %v796_v55 = vmul.f32 %v792_v51, %v759_v19 }
 0x1f7   : > { %v797_v56 = vpack.c.bf16 %v795_v53, %v793_v52 }
 0x1f8   : > { %v798_v57 = vpack.c.bf16 %v796_v55, %v794_v54 }
 0x1fa   : > { %966 = vmatprep.mubr.bf16.mxu0 %v798_v57 }
 0x1fb   : > { %967 = vmatmul.mubr.bf16.vlgmr.msra.gmra.mrb[4].mxu0 %v797_v56 }
 0x2ce   : > { %v1432_v61 = vpop.f32.mrb[4].mxu0 }
 0x2cf   : > { %v1433_v0 = vpop.f32.mrb[5].mxu0 }
 0x2d0   : > { %v1434_v1 = vadd.f32 %v1433_v0, %v1432_v61  ;;  %v1435_v2 = vpop.f32.mrb[6].mxu0 }
 0x2d1   : > { %v1436_v5 = vpop.f32.mrb[7].mxu0 }
 0x2d2   : > { %v969_v6 = vadd.f32 %v1434_v1, %v1357_v63  ;;  %v1437_v7 = vadd.f32 %v1436_v5, %v1435_v2 }
 0x2d4   : > { %v972_v8 = vadd.f32 %v1437_v7, %v1357_v63  ;;  %v975_v9 = vadd.f32 %v969_v6, %v1778_v42 }
 0x2d6   : > { %v976_v10 = vadd.f32 %v972_v8, %v1780_v43 }
 0x2d8   : > { %v977_v11 = vpack.c.bf16 %v976_v10, %v975_v9 }
 0x2da   : > { %1464 = vmatmul.mubr.bf16.vlgmr.msra.gmra.mrb[4].mxu1 %v977_v11 }
 0x3ad   : > { %v1083_v13 = vpop.f32.mrb[4].mxu1 }
 0x3ae   : > { %v1084_v14 = vadd.f32 %v1374_v12, %v1083_v13  ;;  %v1465_v15 = vpop.f32.mrb[5].mxu1 }
 0x3af   : > { %v1086_v42 = vpop.f32.mrb[6].mxu1 }
 0x3b0   : > { %v1392_v43 = vpack.c.bf16 %v1084_v14, %v1084_v14  ;;  %v1116_v16 = vmul.f32 %v1084_v14, %v1084_v14  ;;  %v1087_v17 = vadd.f32 %v1374_v12, %v1086_v42  ;;  %v1466_v18 = vpop.f32.mrb[7].mxu1  ;;  %v1103_v19 = vsel %vm1102_vm2, %v1084_v14, 0.0 }
 0x3b2   : > { %v1393_v20 = vpack.c.bf16 %v1087_v17, %v1087_v17  ;;  %v1104_v21 = vsel %vm1102_vm2, %v1087_v17, 0.0  ;;  %v1117_v22 = vmul.f32 %v1087_v17, %v1087_v17  ;;  %1099 = vst.msk [vmem:[%s407_s17] sm:$0xf] %vm1098_vm3, %v1392_v43  ;;  %v1118_v24 = vsel %vm1102_vm2, %v1116_v16, 0.0 }
 0x3b3   : > { %v1105_v23 = vadd.f32 %v1104_v21, %v1103_v19 }
 0x3b4   : > { %v1119_v25 = vsel %vm1102_vm2, %v1117_v22, 0.0  ;;  %1100 = vst.msk [vmem:[%s407_s17 + $0x4] sm:$0xf] %vm1098_vm3, %v1393_v20 }
 0x3b5   : > { %v1106_v26 = vrot.slane %v1105_v23, 4  ;;  %v1120_v27 = vadd.f32 %v1119_v25, %v1118_v24 }
 0x3b7   : > { %v1107_v28 = vadd.f32 %v1106_v26, %v1105_v23  ;;  %v1121_v29 = vrot.slane %v1120_v27, 4 }
 0x3b9   : > { %v1108_v30 = vrot.slane %v1107_v28, 2  ;;  %v1122_v31 = vadd.f32 %v1121_v29, %v1120_v27 }
 0x3bb   : > { %v1109_v33 = vadd.f32 %v1108_v30, %v1107_v28  ;;  %v1123_v34 = vrot.slane %v1122_v31, 2 }
 0x3bd   : > { %v1110_v35 = vrot.slane %v1109_v33, 1  ;;  %v1124_v36 = vadd.f32 %v1123_v34, %v1122_v31 }
 0x3bf   : > { %v1111_v40 = vadd.f32 %v1110_v35, %v1109_v33  ;;  %v1125_v41 = vrot.slane %v1124_v36, 1 }
 0x3c1   : > { %v1112_v45 = vadd.f32 %v1111_v40, %v1101_v37  ;;  %v1126_v46 = vadd.f32 %v1125_v41, %v1124_v36 }
 0x3c3   : > { %1114 = vst.msk [vmem:[#allocation2] sm:$0x1] %vm418_vm1, %v1112_v45  ;;  %v1127_v47 = vadd.f32 %v1126_v46, %v1115_v44 }
 0x3c5   : > { %1128 = vst.msk [vmem:[#allocation3] sm:$0x1] %vm418_vm1, %v1127_v47 }
 0x3ca   : > { %v1386_v48 = vld [vmem:[#allocation2] ss:$0 sm:$0xff] }
 0x3cb   : > { %v1150_v49 = vmul.f32 %v1386_v48, %v1385_v4 }
 0x3cc   : > { %v1387_v50 = vld [vmem:[#allocation3] ss:$0 sm:$0xff] }
 0x3cd   : > { %v1151_v3 = vsel %vm1098_vm3, %v1150_v49, 0.0  ;;  %v1163_v51 = vmul.f32 %v1387_v50, %v1385_v4 }
 0x3ce   : > { %1152 = vadd.xlane.f32.xlu0 %v1151_v3 }
 0x3cf   : > { %v1164_v52 = vsel %vm1098_vm3, %v1163_v51, 0.0 }
 0x3d2   : > { %1165 = vadd.xlane.f32.xlu0 %v1164_v52 }
 0x45b   : > { %v1153_v53 = vpop.xlane.xlu0 %1152 }
 0x45c   : > { %v1155_v54 = vmul.f32 0.0078125, %v1153_v53 }
 0x45e   : > { %v1171_v55 = vmul.f32 %v1385_v4, %v1155_v54  ;;  %v1168_v57 = vmul.f32 %v1155_v54, %v1155_v54 }
 0x45f   : > { %v1166_v56 = vpop.xlane.xlu0 %1165 }
 0x460   : > { %v1172_v58 = vsel %vm1098_vm3, %v1171_v55, 0.0  ;;  %v1167_v59 = vmul.f32 0.0078125, %v1166_v56 }
 0x461   : > { %v1173_v62 = vrot.slane %v1172_v58, 4 }
 0x462   : > { %v1169_v60 = vsub.f32 %v1167_v59, %v1168_v57 }
 0x463   : > { %v1174_v61 = vadd.f32 %v1173_v62, %v1172_v58 }
 0x464   : > { %v1170_v63 = vmax.f32 %v1169_v60, 0.0 }
 0x465   : > { %v1175_v1 = vrot.slane %v1174_v61, 2 }
 0x466   : > { %v1179_v0 = vmul.f32 %v1385_v4, %v1170_v63 }
 0x467   : > { %v1176_v6 = vadd.f32 %v1175_v1, %v1174_v61 }
 0x468   : > { %v1180_v2 = vsel %vm1098_vm3, %v1179_v0, 0.0 }
 0x469   : > { %v1181_v5 = vrot.slane %v1180_v2, 4  ;;  %v1177_v9 = vrot.slane %v1176_v6, 1 }
 0x46b   : > { %v1182_v7 = vadd.f32 %v1181_v5, %v1180_v2  ;;  %v1178_v12 = vadd.f32 %v1177_v9, %v1176_v6 }
 0x46d   : > { %v1183_v8 = vrot.slane %v1182_v7, 2 }
 0x46f   : > { %v1184_v10 = vadd.f32 %v1183_v8, %v1182_v7 }
 0x471   : > { %v1185_v11 = vrot.slane %v1184_v10, 1 }
 0x473   : > { %v1186_v13 = vadd.f32 %v1185_v11, %v1184_v10 }
 0x475   : > { %v1188_v14 = vsel %vm1187_vm7, %v1178_v12, %v1186_v13 }
 0x476   : > { %1190 = vst.msk [vmem:[%s412_s21] sm:$0x3] %vm1189_vm8, %v1188_v14 }
 0x477 PF: > { %s21_s15 = sadd.s32 1, %s1591_s15   ;;  %s1924_s13 = smov %s1587_s14 }
 0x478   : > { %p18_p5 = scmp.ge.s32.totalorder %s21_s15, 4   ;;  %s1925_s14 = smov %s1927_s16 }
 0x47a   :  { %20 = sbr.rel (!%p18_p5) target bundleno = 2 (0x2), region = 106 }

</bundles_post_ra>
